<compile_context>
chip_gen: v7x
topology: tpu7x:2x2x1
jax: 0.10.0
libtpu: 0.0.40
codegen_flags: <defaults>
</compile_context>

<pallas_src>
import functools

import jax
import jax.numpy as jnp
import numpy as np
from jax.experimental import pallas as pl
from jax.experimental.pallas import tpu as pltpu


# --------------------------------------------------------------------------
# Pallas kernel: the whole SequentialFlow forward pass for one batch tile.
# --------------------------------------------------------------------------
def _sequential_flow_kernel(n_layers, half, x_ref, *refs):
    # refs = (w1_0, b1_0, w2s_0, b2s_0, w2t_0, b2t_0, ..., out_ref)
    out_ref = refs[-1]
    p = refs[:-1]
    assert len(p) == 6 * n_layers

    # Split ONCE on load; halves are carried as separate f32 arrays and the
    # per-layer swap is just variable renaming (no per-layer concat/slice).
    xa = x_ref[:, :half].astype(jnp.float32)   # conditioning half (x1)
    xb = x_ref[:, half:].astype(jnp.float32)   # transformed half  (x2)

    for l in range(n_layers):                  # static unroll -> straight-line
        w1 = p[6 * l + 0][...]
        b1 = p[6 * l + 1][...]
        w2s = p[6 * l + 2][...]
        b2s = p[6 * l + 3][...]
        w2t = p[6 * l + 4][...]
        b2t = p[6 * l + 5][...]

        # MXU matmuls on bf16 operands, f32 accumulation; VPU/EUP work in f32.
        h = jnp.tanh(
            jnp.dot(xa.astype(w1.dtype), w1,
                    preferred_element_type=jnp.float32) + b1)
        hb = h.astype(w2s.dtype)
        s = jnp.tanh(
            jnp.dot(hb, w2s, preferred_element_type=jnp.float32) + b2s)
        t = jnp.dot(hb, w2t, preferred_element_type=jnp.float32) + b2t

        yb = xb * jnp.exp(s) + t
        # x <- concat(y2, x1): new first half = yb, new second half = old xa.
        xa, xb = yb, xa

    # Single write of the two halves at the end.
    out_ref[:, :half] = xa.astype(out_ref.dtype)
    out_ref[:, half:] = xb.astype(out_ref.dtype)


# --------------------------------------------------------------------------
# JAX-side wrapper mirroring SequentialFlow.forward
# --------------------------------------------------------------------------
class SequentialFlow:
    """Chain of affine-coupling flow layers, executed in one Pallas kernel."""

    def __init__(self, dim, hidden, n_layers, key, *,
                 mxu_dtype=jnp.bfloat16, block_batch=256):
        assert dim % 2 == 0
        self.dim = dim
        self.hidden = hidden
        self.n_layers = n_layers
        self.block_batch = block_batch
        half = dim // 2
        self.params = []
        for _ in range(n_layers):
            k1, k2, k3, key = jax.random.split(key, 4)
            w1 = (jax.random.normal(k1, (half, hidden), jnp.float32)
                  / np.sqrt(half)).astype(mxu_dtype)
            b1 = jnp.zeros((1, hidden), jnp.float32)
            w2s = (jax.random.normal(k2, (hidden, half), jnp.float32)
                   / np.sqrt(hidden)).astype(mxu_dtype)
            b2s = jnp.zeros((1, half), jnp.float32)
            w2t = (jax.random.normal(k3, (hidden, half), jnp.float32)
                   / np.sqrt(hidden)).astype(mxu_dtype)
            b2t = jnp.zeros((1, half), jnp.float32)
            self.params += [w1, b1, w2s, b2s, w2t, b2t]
        # TODO(synk): for deep/wide configs whose weights exceed VMEM, stack
        # params into (L, ...) arrays and stream them over a layer grid axis
        # (or pipeline_mode=pl.Buffered(2)) instead of keeping all resident.

    def __call__(self, x):
        B, dim = x.shape
        assert dim == self.dim
        half = dim // 2

        # Batch tile: full batch if small, else 256-row tiles (pad if needed).
        TB = B if B <= self.block_batch else self.block_batch
        Bp = pl.cdiv(B, TB) * TB
        x_in = x if Bp == B else jnp.pad(x, ((0, Bp - B), (0, 0)))

        x_spec = pl.BlockSpec((TB, dim), lambda i: (i, 0))
        out_spec = pl.BlockSpec((TB, dim), lambda i: (i, 0))
        # Constant block index -> weights stay resident in VMEM across steps.
        param_specs = [pl.BlockSpec(p.shape, lambda i: (0, 0))
                       for p in self.params]

        flops = 6 * Bp * self.n_layers * half * self.hidden
        transcendentals = Bp * self.n_layers * (self.hidden + 2 * half)
        bytes_accessed = (2 * Bp * dim * 4
                          + sum(int(p.size) * p.dtype.itemsize
                                for p in self.params))

        kernel = functools.partial(_sequential_flow_kernel,
                                   self.n_layers, half)
        out = pl.pallas_call(
            kernel,
            out_shape=jax.ShapeDtypeStruct((Bp, dim), x.dtype),
            grid_spec=pltpu.PrefetchScalarGridSpec(
                num_scalar_prefetch=0,
                grid=(Bp // TB,),
                in_specs=[x_spec] + param_specs,
                out_specs=out_spec,
            ),
            compiler_params=pltpu.CompilerParams(
                dimension_semantics=("parallel",)),
            input_output_aliases={0: 0},   # x tile overwritten in place
            cost_estimate=pl.CostEstimate(
                flops=flops,
                transcendentals=transcendentals,
                bytes_accessed=bytes_accessed),
        )(x_in, *self.params)
        return out if Bp == B else out[:B]

    # Pure-JAX reference (same math, same bf16 MXU-operand casts) for checks.
    def reference(self, x):
        x = x.astype(jnp.float32)
        half = self.dim // 2
        for l in range(self.n_layers):
            w1, b1, w2s, b2s, w2t, b2t = self.params[6 * l:6 * l + 6]
            x1, x2 = x[:, :half], x[:, half:]
            h = jnp.tanh(
                jnp.dot(x1.astype(w1.dtype), w1,
                        preferred_element_type=jnp.float32) + b1)
            hb = h.astype(w2s.dtype)
            s = jnp.tanh(
                jnp.dot(hb, w2s, preferred_element_type=jnp.float32) + b2s)
            t = jnp.dot(hb, w2t, preferred_element_type=jnp.float32) + b2t
            y2 = x2 * jnp.exp(s) + t
            x = jnp.concatenate([y2, x1], axis=1)
        return x


if __name__ == "__main__":
    key = jax.random.PRNGKey(0)
    k_x, k_p = jax.random.split(key)

    # Lane-dense demo sizes: half = 128, hidden = 128, batch tile = 256.
    batch, dim, hidden, n_layers = 512, 256, 128, 3
    x = jax.random.normal(k_x, (batch, dim), jnp.float32)

    flow = SequentialFlow(dim=dim, hidden=hidden, n_layers=n_layers, key=k_p)

    # Compute the reference first (the kernel aliases/donates its input).
    y_ref = jax.block_until_ready(flow.reference(x))

    y = jax.block_until_ready(flow(x))

    np.testing.assert_allclose(np.asarray(y), np.asarray(y_ref),
                               rtol=1e-3, atol=1e-3)

    print("KERNEL_OK")
</pallas_src>

<mosaic_0001>
module attributes {stable_mosaic.version = 11 : i64} {
  func.func @_sequential_flow_kernel(%arg0: i32, %arg1: memref<256x256xf32, #tpu.memory_space<vmem>>, %arg2: memref<128x128xbf16, #tpu.memory_space<vmem>>, %arg3: memref<1x128xf32, #tpu.memory_space<vmem>>, %arg4: memref<128x128xbf16, #tpu.memory_space<vmem>>, %arg5: memref<1x128xf32, #tpu.memory_space<vmem>>, %arg6: memref<128x128xbf16, #tpu.memory_space<vmem>>, %arg7: memref<1x128xf32, #tpu.memory_space<vmem>>, %arg8: memref<128x128xbf16, #tpu.memory_space<vmem>>, %arg9: memref<1x128xf32, #tpu.memory_space<vmem>>, %arg10: memref<128x128xbf16, #tpu.memory_space<vmem>>, %arg11: memref<1x128xf32, #tpu.memory_space<vmem>>, %arg12: memref<128x128xbf16, #tpu.memory_space<vmem>>, %arg13: memref<1x128xf32, #tpu.memory_space<vmem>>, %arg14: memref<128x128xbf16, #tpu.memory_space<vmem>>, %arg15: memref<1x128xf32, #tpu.memory_space<vmem>>, %arg16: memref<128x128xbf16, #tpu.memory_space<vmem>>, %arg17: memref<1x128xf32, #tpu.memory_space<vmem>>, %arg18: memref<128x128xbf16, #tpu.memory_space<vmem>>, %arg19: memref<1x128xf32, #tpu.memory_space<vmem>>, %arg20: memref<256x256xf32, #tpu.memory_space<vmem>>) attributes {dimension_semantics = [#tpu.dimension_semantics<parallel>], iteration_bounds = array<i64: 2>, scalar_prefetch = 0 : i64, scratch_operands = 0 : i64, tpu.core_type = #tpu.core_type<tc>, window_params = [{transform_indices = @transform_0, window_bounds = array<i64: 256, 256>}, {pipeline_mode = #tpu.pipeline_mode<synchronous>, transform_indices = @transform_1, window_bounds = array<i64: 128, 128>}, {pipeline_mode = #tpu.pipeline_mode<synchronous>, transform_indices = @transform_2, window_bounds = array<i64: 1, 128>}, {pipeline_mode = #tpu.pipeline_mode<synchronous>, transform_indices = @transform_3, window_bounds = array<i64: 128, 128>}, {pipeline_mode = #tpu.pipeline_mode<synchronous>, transform_indices = @transform_4, window_bounds = array<i64: 1, 128>}, {pipeline_mode = #tpu.pipeline_mode<synchronous>, transform_indices = @transform_5, window_bounds = array<i64: 128, 128>}, {pipeline_mode = #tpu.pipeline_mode<synchronous>, transform_indices = @transform_6, window_bounds = array<i64: 1, 128>}, {pipeline_mode = #tpu.pipeline_mode<synchronous>, transform_indices = @transform_7, window_bounds = array<i64: 128, 128>}, {pipeline_mode = #tpu.pipeline_mode<synchronous>, transform_indices = @transform_8, window_bounds = array<i64: 1, 128>}, {pipeline_mode = #tpu.pipeline_mode<synchronous>, transform_indices = @transform_9, window_bounds = array<i64: 128, 128>}, {pipeline_mode = #tpu.pipeline_mode<synchronous>, transform_indices = @transform_10, window_bounds = array<i64: 1, 128>}, {pipeline_mode = #tpu.pipeline_mode<synchronous>, transform_indices = @transform_11, window_bounds = array<i64: 128, 128>}, {pipeline_mode = #tpu.pipeline_mode<synchronous>, transform_indices = @transform_12, window_bounds = array<i64: 1, 128>}, {pipeline_mode = #tpu.pipeline_mode<synchronous>, transform_indices = @transform_13, window_bounds = array<i64: 128, 128>}, {pipeline_mode = #tpu.pipeline_mode<synchronous>, transform_indices = @transform_14, window_bounds = array<i64: 1, 128>}, {pipeline_mode = #tpu.pipeline_mode<synchronous>, transform_indices = @transform_15, window_bounds = array<i64: 128, 128>}, {pipeline_mode = #tpu.pipeline_mode<synchronous>, transform_indices = @transform_16, window_bounds = array<i64: 1, 128>}, {pipeline_mode = #tpu.pipeline_mode<synchronous>, transform_indices = @transform_17, window_bounds = array<i64: 128, 128>}, {pipeline_mode = #tpu.pipeline_mode<synchronous>, transform_indices = @transform_18, window_bounds = array<i64: 1, 128>}, {transform_indices = @transform_19, window_bounds = array<i64: 256, 256>}]} {
    %c0 = arith.constant 0 : index
    %c0_0 = arith.constant 0 : index
    %0 = vector.load %arg1[%c0, %c0_0] : memref<256x256xf32, #tpu.memory_space<vmem>>, vector<256x128xf32>
    %c0_1 = arith.constant 0 : index
    %c128 = arith.constant 128 : index
    %1 = vector.load %arg1[%c0_1, %c128] : memref<256x256xf32, #tpu.memory_space<vmem>>, vector<256x128xf32>
    %c0_2 = arith.constant 0 : index
    %c0_3 = arith.constant 0 : index
    %2 = vector.load %arg2[%c0_2, %c0_3] : memref<128x128xbf16, #tpu.memory_space<vmem>>, vector<128x128xbf16>
    %c0_4 = arith.constant 0 : index
    %c0_5 = arith.constant 0 : index
    %3 = vector.load %arg3[%c0_4, %c0_5] : memref<1x128xf32, #tpu.memory_space<vmem>>, vector<1x128xf32>
    %c0_6 = arith.constant 0 : index
    %c0_7 = arith.constant 0 : index
    %4 = vector.load %arg4[%c0_6, %c0_7] : memref<128x128xbf16, #tpu.memory_space<vmem>>, vector<128x128xbf16>
    %c0_8 = arith.constant 0 : index
    %c0_9 = arith.constant 0 : index
    %5 = vector.load %arg5[%c0_8, %c0_9] : memref<1x128xf32, #tpu.memory_space<vmem>>, vector<1x128xf32>
    %c0_10 = arith.constant 0 : index
    %c0_11 = arith.constant 0 : index
    %6 = vector.load %arg6[%c0_10, %c0_11] : memref<128x128xbf16, #tpu.memory_space<vmem>>, vector<128x128xbf16>
    %c0_12 = arith.constant 0 : index
    %c0_13 = arith.constant 0 : index
    %7 = vector.load %arg7[%c0_12, %c0_13] : memref<1x128xf32, #tpu.memory_space<vmem>>, vector<1x128xf32>
    %8 = arith.truncf %0 : vector<256x128xf32> to vector<256x128xbf16>
    %cst = arith.constant dense<0.000000e+00> : vector<256x128xf32>
    %9 = tpu.matmul %8, %2, %cst {dimension_numbers = #tpu.dot_dimension_numbers<[1], [0], [0], [1], [0, 0, 1, 1], [], []>} : vector<256x128xbf16>, vector<128x128xbf16>, vector<256x128xf32> -> vector<256x128xf32>
    %10 = vector.broadcast %3 : vector<1x128xf32> to vector<256x128xf32>
    %11 = arith.addf %9, %10 : vector<256x128xf32>
    %12 = math.tanh %11 : vector<256x128xf32>
    %13 = arith.truncf %12 : vector<256x128xf32> to vector<256x128xbf16>
    %cst_14 = arith.constant dense<0.000000e+00> : vector<256x128xf32>
    %14 = tpu.matmul %13, %4, %cst_14 {dimension_numbers = #tpu.dot_dimension_numbers<[1], [0], [0], [1], [0, 0, 1, 1], [], []>} : vector<256x128xbf16>, vector<128x128xbf16>, vector<256x128xf32> -> vector<256x128xf32>
    %15 = vector.broadcast %5 : vector<1x128xf32> to vector<256x128xf32>
    %16 = arith.addf %14, %15 : vector<256x128xf32>
    %17 = math.tanh %16 : vector<256x128xf32>
    %cst_15 = arith.constant dense<0.000000e+00> : vector<256x128xf32>
    %18 = tpu.matmul %13, %6, %cst_15 {dimension_numbers = #tpu.dot_dimension_numbers<[1], [0], [0], [1], [0, 0, 1, 1], [], []>} : vector<256x128xbf16>, vector<128x128xbf16>, vector<256x128xf32> -> vector<256x128xf32>
    %19 = vector.broadcast %7 : vector<1x128xf32> to vector<256x128xf32>
    %20 = arith.addf %18, %19 : vector<256x128xf32>
    %21 = math.exp %17 : vector<256x128xf32>
    %22 = arith.mulf %1, %21 : vector<256x128xf32>
    %23 = arith.addf %22, %20 : vector<256x128xf32>
    %c0_16 = arith.constant 0 : index
    %c0_17 = arith.constant 0 : index
    %24 = vector.load %arg8[%c0_16, %c0_17] : memref<128x128xbf16, #tpu.memory_space<vmem>>, vector<128x128xbf16>
    %c0_18 = arith.constant 0 : index
    %c0_19 = arith.constant 0 : index
    %25 = vector.load %arg9[%c0_18, %c0_19] : memref<1x128xf32, #tpu.memory_space<vmem>>, vector<1x128xf32>
    %c0_20 = arith.constant 0 : index
    %c0_21 = arith.constant 0 : index
    %26 = vector.load %arg10[%c0_20, %c0_21] : memref<128x128xbf16, #tpu.memory_space<vmem>>, vector<128x128xbf16>
    %c0_22 = arith.constant 0 : index
    %c0_23 = arith.constant 0 : index
    %27 = vector.load %arg11[%c0_22, %c0_23] : memref<1x128xf32, #tpu.memory_space<vmem>>, vector<1x128xf32>
    %c0_24 = arith.constant 0 : index
    %c0_25 = arith.constant 0 : index
    %28 = vector.load %arg12[%c0_24, %c0_25] : memref<128x128xbf16, #tpu.memory_space<vmem>>, vector<128x128xbf16>
    %c0_26 = arith.constant 0 : index
    %c0_27 = arith.constant 0 : index
    %29 = vector.load %arg13[%c0_26, %c0_27] : memref<1x128xf32, #tpu.memory_space<vmem>>, vector<1x128xf32>
    %30 = arith.truncf %23 : vector<256x128xf32> to vector<256x128xbf16>
    %cst_28 = arith.constant dense<0.000000e+00> : vector<256x128xf32>
    %31 = tpu.matmul %30, %24, %cst_28 {dimension_numbers = #tpu.dot_dimension_numbers<[1], [0], [0], [1], [0, 0, 1, 1], [], []>} : vector<256x128xbf16>, vector<128x128xbf16>, vector<256x128xf32> -> vector<256x128xf32>
    %32 = vector.broadcast %25 : vector<1x128xf32> to vector<256x128xf32>
    %33 = arith.addf %31, %32 : vector<256x128xf32>
    %34 = math.tanh %33 : vector<256x128xf32>
    %35 = arith.truncf %34 : vector<256x128xf32> to vector<256x128xbf16>
    %cst_29 = arith.constant dense<0.000000e+00> : vector<256x128xf32>
    %36 = tpu.matmul %35, %26, %cst_29 {dimension_numbers = #tpu.dot_dimension_numbers<[1], [0], [0], [1], [0, 0, 1, 1], [], []>} : vector<256x128xbf16>, vector<128x128xbf16>, vector<256x128xf32> -> vector<256x128xf32>
    %37 = vector.broadcast %27 : vector<1x128xf32> to vector<256x128xf32>
    %38 = arith.addf %36, %37 : vector<256x128xf32>
    %39 = math.tanh %38 : vector<256x128xf32>
    %cst_30 = arith.constant dense<0.000000e+00> : vector<256x128xf32>
    %40 = tpu.matmul %35, %28, %cst_30 {dimension_numbers = #tpu.dot_dimension_numbers<[1], [0], [0], [1], [0, 0, 1, 1], [], []>} : vector<256x128xbf16>, vector<128x128xbf16>, vector<256x128xf32> -> vector<256x128xf32>
    %41 = vector.broadcast %29 : vector<1x128xf32> to vector<256x128xf32>
    %42 = arith.addf %40, %41 : vector<256x128xf32>
    %43 = math.exp %39 : vector<256x128xf32>
    %44 = arith.mulf %0, %43 : vector<256x128xf32>
    %45 = arith.addf %44, %42 : vector<256x128xf32>
    %c0_31 = arith.constant 0 : index
    %c0_32 = arith.constant 0 : index
    %46 = vector.load %arg14[%c0_31, %c0_32] : memref<128x128xbf16, #tpu.memory_space<vmem>>, vector<128x128xbf16>
    %c0_33 = arith.constant 0 : index
    %c0_34 = arith.constant 0 : index
    %47 = vector.load %arg15[%c0_33, %c0_34] : memref<1x128xf32, #tpu.memory_space<vmem>>, vector<1x128xf32>
    %c0_35 = arith.constant 0 : index
    %c0_36 = arith.constant 0 : index
    %48 = vector.load %arg16[%c0_35, %c0_36] : memref<128x128xbf16, #tpu.memory_space<vmem>>, vector<128x128xbf16>
    %c0_37 = arith.constant 0 : index
    %c0_38 = arith.constant 0 : index
    %49 = vector.load %arg17[%c0_37, %c0_38] : memref<1x128xf32, #tpu.memory_space<vmem>>, vector<1x128xf32>
    %c0_39 = arith.constant 0 : index
    %c0_40 = arith.constant 0 : index
    %50 = vector.load %arg18[%c0_39, %c0_40] : memref<128x128xbf16, #tpu.memory_space<vmem>>, vector<128x128xbf16>
    %c0_41 = arith.constant 0 : index
    %c0_42 = arith.constant 0 : index
    %51 = vector.load %arg19[%c0_41, %c0_42] : memref<1x128xf32, #tpu.memory_space<vmem>>, vector<1x128xf32>
    %52 = arith.truncf %45 : vector<256x128xf32> to vector<256x128xbf16>
    %cst_43 = arith.constant dense<0.000000e+00> : vector<256x128xf32>
    %53 = tpu.matmul %52, %46, %cst_43 {dimension_numbers = #tpu.dot_dimension_numbers<[1], [0], [0], [1], [0, 0, 1, 1], [], []>} : vector<256x128xbf16>, vector<128x128xbf16>, vector<256x128xf32> -> vector<256x128xf32>
    %54 = vector.broadcast %47 : vector<1x128xf32> to vector<256x128xf32>
    %55 = arith.addf %53, %54 : vector<256x128xf32>
    %56 = math.tanh %55 : vector<256x128xf32>
    %57 = arith.truncf %56 : vector<256x128xf32> to vector<256x128xbf16>
    %cst_44 = arith.constant dense<0.000000e+00> : vector<256x128xf32>
    %58 = tpu.matmul %57, %48, %cst_44 {dimension_numbers = #tpu.dot_dimension_numbers<[1], [0], [0], [1], [0, 0, 1, 1], [], []>} : vector<256x128xbf16>, vector<128x128xbf16>, vector<256x128xf32> -> vector<256x128xf32>
    %59 = vector.broadcast %49 : vector<1x128xf32> to vector<256x128xf32>
    %60 = arith.addf %58, %59 : vector<256x128xf32>
    %61 = math.tanh %60 : vector<256x128xf32>
    %cst_45 = arith.constant dense<0.000000e+00> : vector<256x128xf32>
    %62 = tpu.matmul %57, %50, %cst_45 {dimension_numbers = #tpu.dot_dimension_numbers<[1], [0], [0], [1], [0, 0, 1, 1], [], []>} : vector<256x128xbf16>, vector<128x128xbf16>, vector<256x128xf32> -> vector<256x128xf32>
    %63 = vector.broadcast %51 : vector<1x128xf32> to vector<256x128xf32>
    %64 = arith.addf %62, %63 : vector<256x128xf32>
    %65 = math.exp %61 : vector<256x128xf32>
    %66 = arith.mulf %23, %65 : vector<256x128xf32>
    %67 = arith.addf %66, %64 : vector<256x128xf32>
    %c0_46 = arith.constant 0 : index
    %c0_47 = arith.constant 0 : index
    %68 = vector.load %arg20[%c0_46, %c0_47] : memref<256x256xf32, #tpu.memory_space<vmem>>, vector<256x128xf32>
    tpu.vector_store %arg20[%c0_46, %c0_47], %67 {strides = array<i32>} : memref<256x256xf32, #tpu.memory_space<vmem>>, vector<256x128xf32>,
    %c0_48 = arith.constant 0 : index
    %c128_49 = arith.constant 128 : index
    %69 = vector.load %arg20[%c0_48, %c128_49] : memref<256x256xf32, #tpu.memory_space<vmem>>, vector<256x128xf32>
    tpu.vector_store %arg20[%c0_48, %c128_49], %45 {strides = array<i32>} : memref<256x256xf32, #tpu.memory_space<vmem>>, vector<256x128xf32>,
    return
  }
  func.func @transform_0(%arg0: i32) -> (i32, i32) {
    %c0_i32 = arith.constant 0 : i32
    %c0_i32_0 = arith.constant 0 : i32
    return %arg0, %c0_i32 : i32, i32
  }
  func.func @transform_1(%arg0: i32) -> (i32, i32) {
    %c0_i32 = arith.constant 0 : i32
    %c0_i32_0 = arith.constant 0 : i32
    %c0_i32_1 = arith.constant 0 : i32
    return %c0_i32, %c0_i32_0 : i32, i32
  }
  func.func @transform_2(%arg0: i32) -> (i32, i32) {
    %c0_i32 = arith.constant 0 : i32
    %c0_i32_0 = arith.constant 0 : i32
    %c0_i32_1 = arith.constant 0 : i32
    return %c0_i32, %c0_i32_0 : i32, i32
  }
  func.func @transform_3(%arg0: i32) -> (i32, i32) {
    %c0_i32 = arith.constant 0 : i32
    %c0_i32_0 = arith.constant 0 : i32
    %c0_i32_1 = arith.constant 0 : i32
    return %c0_i32, %c0_i32_0 : i32, i32
  }
  func.func @transform_4(%arg0: i32) -> (i32, i32) {
    %c0_i32 = arith.constant 0 : i32
    %c0_i32_0 = arith.constant 0 : i32
    %c0_i32_1 = arith.constant 0 : i32
    return %c0_i32, %c0_i32_0 : i32, i32
  }
  func.func @transform_5(%arg0: i32) -> (i32, i32) {
    %c0_i32 = arith.constant 0 : i32
    %c0_i32_0 = arith.constant 0 : i32
    %c0_i32_1 = arith.constant 0 : i32
    return %c0_i32, %c0_i32_0 : i32, i32
  }
  func.func @transform_6(%arg0: i32) -> (i32, i32) {
    %c0_i32 = arith.constant 0 : i32
    %c0_i32_0 = arith.constant 0 : i32
    %c0_i32_1 = arith.constant 0 : i32
    return %c0_i32, %c0_i32_0 : i32, i32
  }
  func.func @transform_7(%arg0: i32) -> (i32, i32) {
    %c0_i32 = arith.constant 0 : i32
    %c0_i32_0 = arith.constant 0 : i32
    %c0_i32_1 = arith.constant 0 : i32
    return %c0_i32, %c0_i32_0 : i32, i32
  }
  func.func @transform_8(%arg0: i32) -> (i32, i32) {
    %c0_i32 = arith.constant 0 : i32
    %c0_i32_0 = arith.constant 0 : i32
    %c0_i32_1 = arith.constant 0 : i32
    return %c0_i32, %c0_i32_0 : i32, i32
  }
  func.func @transform_9(%arg0: i32) -> (i32, i32) {
    %c0_i32 = arith.constant 0 : i32
    %c0_i32_0 = arith.constant 0 : i32
    %c0_i32_1 = arith.constant 0 : i32
    return %c0_i32, %c0_i32_0 : i32, i32
  }
  func.func @transform_10(%arg0: i32) -> (i32, i32) {
    %c0_i32 = arith.constant 0 : i32
    %c0_i32_0 = arith.constant 0 : i32
    %c0_i32_1 = arith.constant 0 : i32
    return %c0_i32, %c0_i32_0 : i32, i32
  }
  func.func @transform_11(%arg0: i32) -> (i32, i32) {
    %c0_i32 = arith.constant 0 : i32
    %c0_i32_0 = arith.constant 0 : i32
    %c0_i32_1 = arith.constant 0 : i32
    return %c0_i32, %c0_i32_0 : i32, i32
  }
  func.func @transform_12(%arg0: i32) -> (i32, i32) {
    %c0_i32 = arith.constant 0 : i32
    %c0_i32_0 = arith.constant 0 : i32
    %c0_i32_1 = arith.constant 0 : i32
    return %c0_i32, %c0_i32_0 : i32, i32
  }
  func.func @transform_13(%arg0: i32) -> (i32, i32) {
    %c0_i32 = arith.constant 0 : i32
    %c0_i32_0 = arith.constant 0 : i32
    %c0_i32_1 = arith.constant 0 : i32
    return %c0_i32, %c0_i32_0 : i32, i32
  }
  func.func @transform_14(%arg0: i32) -> (i32, i32) {
    %c0_i32 = arith.constant 0 : i32
    %c0_i32_0 = arith.constant 0 : i32
    %c0_i32_1 = arith.constant 0 : i32
    return %c0_i32, %c0_i32_0 : i32, i32
  }
  func.func @transform_15(%arg0: i32) -> (i32, i32) {
    %c0_i32 = arith.constant 0 : i32
    %c0_i32_0 = arith.constant 0 : i32
    %c0_i32_1 = arith.constant 0 : i32
    return %c0_i32, %c0_i32_0 : i32, i32
  }
  func.func @transform_16(%arg0: i32) -> (i32, i32) {
    %c0_i32 = arith.constant 0 : i32
    %c0_i32_0 = arith.constant 0 : i32
    %c0_i32_1 = arith.constant 0 : i32
    return %c0_i32, %c0_i32_0 : i32, i32
  }
  func.func @transform_17(%arg0: i32) -> (i32, i32) {
    %c0_i32 = arith.constant 0 : i32
    %c0_i32_0 = arith.constant 0 : i32
    %c0_i32_1 = arith.constant 0 : i32
    return %c0_i32, %c0_i32_0 : i32, i32
  }
  func.func @transform_18(%arg0: i32) -> (i32, i32) {
    %c0_i32 = arith.constant 0 : i32
    %c0_i32_0 = arith.constant 0 : i32
    %c0_i32_1 = arith.constant 0 : i32
    return %c0_i32, %c0_i32_0 : i32, i32
  }
  func.func @transform_19(%arg0: i32) -> (i32, i32) {
    %c0_i32 = arith.constant 0 : i32
    %c0_i32_0 = arith.constant 0 : i32
    return %arg0, %c0_i32 : i32, i32
  }
}

</mosaic_0001>

<bundles_post_ra>
// kernel: tpu_custom_call.1
= control target key start
LH: loop header
LB: loop body
LE: loop exit
PB: predicated region body
PF: predicated region fallthrough
CT: control target
= control target key end

     0   :  { %s6648_s0 = inlined_call_operand.hbm [shape: f32[512,256], index: 0, kind: input, shape index: {}, may-alias: {0,19}]   ;;  %s6649_s1 = inlined_call_operand.vmem [shape: bf16[128,128], index: 1, kind: input, shape index: {}]   ;;  %s6650_s2 = inlined_call_operand.vmem [shape: f32[1,128], index: 2, kind: input, shape index: {}]   ;;  %s6651_s3 = inlined_call_operand.vmem [shape: bf16[128,128], index: 3, kind: input, shape index: {}]   ;;  %s6652_s4 = inlined_call_operand.vmem [shape: f32[1,128], index: 4, kind: input, shape index: {}]   ;;  %s6653_s5 = inlined_call_operand.vmem [shape: bf16[128,128], index: 5, kind: input, shape index: {}]   ;;  %s6654_s6 = inlined_call_operand.vmem [shape: f32[1,128], index: 6, kind: input, shape index: {}]   ;;  %s6655_s7 = inlined_call_operand.vmem [shape: bf16[128,128], index: 7, kind: input, shape index: {}]   ;;  %s6656_s8 = inlined_call_operand.vmem [shape: f32[1,128], index: 8, kind: input, shape index: {}]   ;;  %s6657_s9 = inlined_call_operand.vmem [shape: bf16[128,128], index: 9, kind: input, shape index: {}]   ;;  %s6658_s10 = inlined_call_operand.vmem [shape: f32[1,128], index: 10, kind: input, shape index: {}]   ;;  %s6659_s11 = inlined_call_operand.vmem [shape: bf16[128,128], index: 11, kind: input, shape index: {}]   ;;  %s6660_s12 = inlined_call_operand.vmem [shape: f32[1,128], index: 12, kind: input, shape index: {}]   ;;  %s6661_s13 = inlined_call_operand.vmem [shape: bf16[128,128], index: 13, kind: input, shape index: {}]   ;;  %s6662_s14 = inlined_call_operand.vmem [shape: f32[1,128], index: 14, kind: input, shape index: {}]   ;;  %s6663_s15 = inlined_call_operand.vmem [shape: bf16[128,128], index: 15, kind: input, shape index: {}]   ;;  %s6664_s16 = inlined_call_operand.vmem [shape: f32[1,128], index: 16, kind: input, shape index: {}]   ;;  %s6665_s17 = inlined_call_operand.vmem [shape: bf16[128,128], index: 17, kind: input, shape index: {}]   ;;  %s6666_s18 = inlined_call_operand.vmem [shape: f32[1,128], index: 18, kind: input, shape index: {}]   ;;  %s6667_s19 = inlined_call_operand.hbm [shape: f32[512,256], index: 19, kind: output, shape index: {}, may-alias: {0,19}]  }
   0x1   :  { %6691 = sst [smem:[#allocation23_spill]] %s6648_s0 }
   0x2   :  { %6692 = sst [smem:[#allocation24_spill]] %s6649_s1 }
   0x3   :  { %6693 = sst [smem:[#allocation25_spill]] %s6650_s2 }
   0x4   :  { %6694 = sst [smem:[#allocation26_spill]] %s6651_s3 }
   0x5   :  { %6695 = sst [smem:[#allocation27_spill]] %s6652_s4 }
   0x6   :  { %6696 = sst [smem:[#allocation28_spill]] %s6653_s5 }
   0x7   :  { %6697 = sst [smem:[#allocation29_spill]] %s6666_s18 }
   0x8   :  { %6698 = sst [smem:[#allocation30_spill]] %s6667_s19 }
   0x9   :  { %24 = vsyncpa [#allocation3], 0 }
   0xa   :  { %26 = vsyncpa [#allocation3 + $0x1], 0 }
   0xb   :  { %27 = vsyncpa [#allocation4], 0 }
   0xc   :  { %29 = vsyncpa [#allocation4 + $0x1], 0  ;;  %s5300_s0 = smov 0   ;;  %s5302_s30 = smov 0  }
   0xd   :  { %s5304_s20 = smov 0   ;;  %s5306_s21 = smov 0  }
   0xe LB: > { %6699 = sst [smem:[#allocation8_spill]] %s5180_s0  ;;  %s5321_s1 = sadd.s32 4294967295, %s5192_s21   ;;  %s5192_s21 = sphi %s5306_s21, %s6745_s21   ;;  %s5188_s20 = sphi %s5304_s20, %s6750_s20   ;;  %s5184_s30 = sphi %s5302_s30, %s6749_s30   ;;  %s5180_s0 = sphi %s5300_s0, %s6748_s0  }
   0xf   : > { %6700 = sst [smem:[#allocation9_spill]] %s5188_s20  ;;  %s3601_s22 = sadd.s32 4294967294, %s5192_s21  }
  0x10   : > { %6701 = sst [smem:[#allocation10_spill]] %s5321_s1  ;;  %s5325_s2 = sadd.s32 1, %s5192_s21  }
  0x11   : > { %6702 = sst [smem:[#allocation11_spill]] %s5325_s2  ;;  %s42_s23 = sadd.s32 1, %s5188_s20 }
  0x12   : > { %s39_s24 = ssub.s32 %s5192_s21, %s5325_s2  ;;  %p49_p0 = scmp.ne.s32.totalorder %s5188_s20, %s5184_s30 }
  0x13   : > { %p40_p1 = scmp.eq.s32.totalorder %s39_s24, 0  ;;  %p50_p2 = scmp.eq.s32.totalorder %s5192_s21, 0 }
  0x14   : > { %p55_p3 = scmp.ne.s32.totalorder %s5184_s30, %s5180_s0  ;;  %p56_p4 = scmp.eq.s32.totalorder %s5321_s1, 0 }
  0x15   : > { %s5337_s25 = scalar_select %p40_p1, %s5188_s20, %s42_s23  }
  0x16   : > { %p5339_p5 = por %p50_p2, %p49_p0  ;;  %p5343_p6 = por %p56_p4, %p55_p3 }
  0x17   : > { %6703 = sst [smem:[#allocation12_spill]] %s5337_s25  ;;  %p457_p7 = scmp.eq.s32.totalorder %s5321_s1, 1 }
  0x18   : > { %p463_p8 = scmp.eq.s32.totalorder %s3601_s22, 1  ;;  %p4378_p10 = scmp.lt.s32.totalorder %s5192_s21, 2 }
  0x19   : > { %p5350_p11 = por %p457_p7, %p49_p0  ;;  %s537_s29 = sand.u32 1, %s5188_s20  }
  0x1a   : > { %p5354_p12 = por %p463_p8, %p55_p3  ;;  %s3699_s23 = sshll.u32 %s5192_s21, 13 }
  0x1b   : > { %s6706_s27 = scalar_select %p5350_p11, 1, 0 }
  0x1c   : > { %s6708_s28 = scalar_select %p5354_p12, 1, 0 }
  0x1d   : > { %6707 = sst [smem:[#allocation13_spill]] %s6706_s27  ;;  %s3604_s24 = sshll.u32 %s537_s29, 9 }
  0x1e   : > { %s6709_s0 = sld [smem:[#allocation23_spill]]  ;;  %s541_s22 = scalar_lea.vmem [#allocation2], %s3604_s24 }
  0x1f   : > { %s549_s1 = sshll.u32 %s541_s22, 4  ;;  %p5367_p13 = pnand %p4378_p10, %p5339_p5  ;;  %s5371_s1 = int_to_ptr.vmem [resolvable:$true] %s549_s1 }
  0x20   : > { %s5373_s20 = scalar_lea.sflag [#allocation3], %s537_s29 }
  0x21   : > { %p5098_p1 = pneg %p5367_p13 }
  0x24   : > { %s6710_s19 = smov %s6709_s0  ;;  %s5363_s18 = scalar_lea.hbm %s6709_s0, %s3699_s23 }
  0x25   : > { %s5096_s2 = scalar_lea.hbm %s5363_s18, 8192  ;;  %s5101_s3 = scalar_lea.hbm %s6710_s19, 16384 }
  0x26   : > { %p5097_p0 = scmp.ne.s32.totalorder %s5363_s18, %s5096_s2  ;;  %p5102_p4 = scmp.lt.u32.totalorder %s5363_s18, %s6710_s19 }
  0x27   : > { %p5103_p5 = scmp.lt.u32.totalorder %s5101_s3, %s5096_s2  ;;  %p5105_p8 = scmp.lt.u32.totalorder %s5096_s2, %s5363_s18 }
  0x28   : > { %p5099_p2 = pnand %p5098_p1, %p5097_p0 }
  0x29   : > { %p5104_p7 = por %p5103_p5, %p5102_p4 }
  0x2a   : > { %p5100_p3 = pneg %p5099_p2 }
  0x2b   : > { %p5106_p10 = por %p5105_p8, %p5104_p7 }
  0x2d   : > { %p5107_p9 = pnand %p5106_p10, %p5100_p3 }
  0x2f   : > { %5110 = shalt.err (!%p5107_p9)
}
  0x30   : > { %s5111_s29 = scalar_lea.vmem %s5371_s1, 8192  ;;  %s5194_s22 = smov [#allocation2]  }
  0x31   : > { %p5112_p0 = scmp.ne.s32.totalorder %s5371_s1, %s5111_s29  ;;  %s5116_s0 = sshll.u32 %s5194_s22, 4  ;;  %s5117_s0 = int_to_ptr.vmem [resolvable:$false] %s5116_s0 }
  0x32   : > { %s5118_s25 = scalar_lea.vmem %s5117_s0, 16384  ;;  %p5119_p11 = scmp.lt.s32.totalorder %s5371_s1, %s5117_s0 }
  0x33   : > { %p5114_p2 = pnand %p5112_p0, %p5098_p1  ;;  %p5120_p4 = scmp.lt.s32.totalorder %s5118_s25, %s5111_s29 }
  0x35   : > { %p5115_p12 = pneg %p5114_p2  ;;  %p5121_p5 = por %p5120_p4, %p5119_p11 }
  0x37   : > { %p5122_p7 = pnand %p5121_p5, %p5115_p12 }
  0x39   : > { %5125 = shalt.err (!%p5122_p7)
}
  0x3a   : > { %s5195_s2 = smov 256   ;;  %s5196_s3 = smov 16  }
  0x3b   : > { %4373 = dma.hbm_to_vmem [thread:$0]  (!%p5367_p13), %s5363_s18, 8192, %s5371_s1, %s5373_s20, %s5195_s2, %s5195_s2, %s5196_s3  }
  0x3c   : > { %p3608_p9 = scmp.ge.s32.totalorder %s5192_s21, 1  ;;  %p557_p1 = scmp.lt.s32.totalorder %s5192_s21, 3 }
  0x3e   : > { %p558_p3 = pnand %p3608_p9, %p557_p1 }
  0x40   : > { %561 = sbr.rel (%p558_p3) target bundleno = 1638 (0x666), region = 96 }
  0x47   : > { %s5404_s23 = sand.u32 1, %s5184_s30  }
  0x48   : > { %s6680_s24 = sshll.u32 %s5404_s23, 9  ;;  %s564_s29 = scalar_lea.sflag [#allocation3], %s5404_s23 }
  0x49   : > { %s5410_s22 = scalar_lea.vmem [#allocation2], %s6680_s24 }
  0x4a   : > { %5171 = dma.done.wait (%p5343_p6), %s564_s29, 8192  }
  0x4b   : > { %5173 = vsyncadd (%p5343_p6), %s564_s29, 4294959104  ;;  %s6712_s1 = sld [smem:[#allocation24_spill]]  ;;  %v625_v4 = vld [vmem:[%s5410_s22] sm:$0xff]  ;;  %v626_v5 = vld [vmem:[%s5410_s22 + $0x10] sm:$0xff]  ;;  %s6713_s5 = sld [smem:[#allocation28_spill]] }
  0x4c   : > { %v740_v6 = vpack.c.bf16 %v626_v5, %v625_v4  ;;  %v641_v8 = vld [vmem:[%s5410_s22 + $0x100] sm:$0xff]  ;;  %v642_v9 = vld [vmem:[%s5410_s22 + $0x110] sm:$0xff]  ;;  %s6714_s27 = sld [smem:[#allocation26_spill]]  ;;  %s6715_s24 = sld [smem:[#allocation25_spill]] }
  0x4d   : > { %v748_v10 = vpack.c.bf16 %v642_v9, %v641_v8  ;;  %v627_v14 = vld [vmem:[%s5410_s22 + $0x20] sm:$0xff]  ;;  %v628_v15 = vld [vmem:[%s5410_s22 + $0x30] sm:$0xff]  ;;  %s6716_s4 = sld [smem:[#allocation27_spill]]  ;;  %s6726_s29 = sshll.u32 %s5404_s23, 9 }
  0x4e   : > { %3934 = vmatprep.mubr.bf16.mxu0 %v740_v6  ;;  %v629_v16 = vld [vmem:[%s5410_s22 + $0x40] sm:$0xff]  ;;  %v630_v17 = vld [vmem:[%s5410_s22 + $0x50] sm:$0xff]  ;;  %v741_v24 = vpack.c.bf16 %v628_v15, %v627_v14  ;;  %s6104_s18 = scalar_lea.vmem [#allocation5], %s6726_s29  ;;  %s6727_s2 = sld [smem:[#allocation29_spill]] }
  0x4f   : > { %3950 = vmatprep.mubr.bf16.mxu1 %v748_v10  ;;  %v643_v18 = vld [vmem:[%s5410_s22 + $0x120] sm:$0xff]  ;;  %v644_v19 = vld [vmem:[%s5410_s22 + $0x130] sm:$0xff]  ;;  %v742_v25 = vpack.c.bf16 %v630_v17, %v629_v16  ;;  %s6732_s26 = sld [smem:[#allocation10_spill]]  ;;  %s6737_s3 = sld [smem:[#allocation13_spill]] }
  0x50   : > { %v645_v21 = vld [vmem:[%s5410_s22 + $0x140] sm:$0xff]  ;;  %v646_v22 = vld [vmem:[%s5410_s22 + $0x150] sm:$0xff]  ;;  %v749_v26 = vpack.c.bf16 %v644_v19, %v643_v18 }
  0x51   : > { %v4416_v0 = vld [vmem:[%s6712_s1] sm:$0xff]   ;;  %v4417_v1 = vld [vmem:[%s6712_s1 + $0x8] sm:$0xff]   ;;  %v4418_v2 = vld [vmem:[%s6712_s1 + $0x10] sm:$0xff]   ;;  %v750_v28 = vpack.c.bf16 %v646_v22, %v645_v21 }
  0x52   : > { %3918 = vmatprep.subr.bf16.mxu0 %v4416_v0  ;;  %4350 = vmatprep.subr.bf16.mxu1 %v4416_v0  ;;  %v4419_v3 = vld [vmem:[%s6712_s1 + $0x18] sm:$0xff]   ;;  %v4420_v7 = vld [vmem:[%s6712_s1 + $0x20] sm:$0xff]   ;;  %v4421_v11 = vld [vmem:[%s6712_s1 + $0x28] sm:$0xff]  }
  0x53   : > { %3919 = vmatpush3.bf16.msra.mxu0 %v4416_v0  ;;  %4358 = vmatpush3.bf16.msra.mxu1 %v4416_v0  ;;  %v4422_v12 = vld [vmem:[%s6712_s1 + $0x30] sm:$0xff]   ;;  %v4423_v13 = vld [vmem:[%s6712_s1 + $0x38] sm:$0xff]   ;;  %v4425_v20 = vld [vmem:[%s6713_s5] sm:$0xff]  }
  0x54   : > { %3920 = vmatprep.subr.bf16.mxu0 %v4417_v1  ;;  %4351 = vmatprep.subr.bf16.mxu1 %v4417_v1  ;;  %v4424_v23 = vld [vmem:[%s6714_s27] sm:$0xff]   ;;  %v4426_v27 = vld [vmem:[%s6714_s27 + $0x8] sm:$0xff]   ;;  %v632_v31 = vld [vmem:[%s5410_s22 + $0x70] sm:$0xff] }
  0x55   : > { %v4427_v29 = vld [vmem:[%s6713_s5 + $0x8] sm:$0xff]   ;;  %v631_v30 = vld [vmem:[%s5410_s22 + $0x60] sm:$0xff]  ;;  %v634_v33 = vld [vmem:[%s5410_s22 + $0x90] sm:$0xff]  ;;  %s3701_s1 = sshll.u32 %s6732_s26, 13  ;;  %p6740_p11 = scmp.ne.s32.totalorder %s6737_s3, 0 }
  0x56   : > { %v633_v32 = vld [vmem:[%s5410_s22 + $0x80] sm:$0xff]  ;;  %v648_v35 = vld [vmem:[%s5410_s22 + $0x170] sm:$0xff]  ;;  %v743_v40 = vpack.c.bf16 %v632_v31, %v631_v30  ;;  %v4430_v43 = vld [vmem:[%s6714_s27 + $0x18] sm:$0xff]   ;;  %s5197_s26 = smov [#allocation5]  }
  0x57   : > { %3921 = vmatpush3.bf16.msra.mxu0 %v4417_v1  ;;  %4359 = vmatpush3.bf16.msra.mxu1 %v4417_v1  ;;  %v647_v34 = vld [vmem:[%s5410_s22 + $0x160] sm:$0xff]  ;;  %v650_v37 = vld [vmem:[%s5410_s22 + $0x190] sm:$0xff]  ;;  %v744_v41 = vpack.c.bf16 %v634_v33, %v633_v32  ;;  %v4431_v63 = vld [vmem:[%s6713_s5 + $0x18] sm:$0xff]  }
  0x58   : > { %3922 = vmatprep.subr.bf16.mxu0 %v4418_v2  ;;  %4352 = vmatprep.subr.bf16.mxu1 %v4418_v2  ;;  %v649_v36 = vld [vmem:[%s5410_s22 + $0x180] sm:$0xff]  ;;  %v4428_v38 = vld [vmem:[%s6714_s27 + $0x10] sm:$0xff]   ;;  %v751_v42 = vpack.c.bf16 %v648_v35, %v647_v34  ;;  %v4438_v6 = vld [vmem:[%s6714_s27 + $0x38] sm:$0xff]  }
  0x59   : > { %v4429_v39 = vld [vmem:[%s6713_s5 + $0x10] sm:$0xff]   ;;  %v752_v44 = vpack.c.bf16 %v650_v37, %v649_v36  ;;  %v635_v45 = vld [vmem:[%s5410_s22 + $0xa0] sm:$0xff] }
  0x5a   : > { %v636_v46 = vld [vmem:[%s5410_s22 + $0xb0] sm:$0xff]  ;;  %v637_v47 = vld [vmem:[%s5410_s22 + $0xc0] sm:$0xff] }
  0x5b   : > { %3923 = vmatpush3.bf16.msra.mxu0 %v4418_v2  ;;  %4360 = vmatpush3.bf16.msra.mxu1 %v4418_v2  ;;  %v638_v48 = vld [vmem:[%s5410_s22 + $0xd0] sm:$0xff]  ;;  %v651_v49 = vld [vmem:[%s5410_s22 + $0x1a0] sm:$0xff]  ;;  %v745_v53 = vpack.c.bf16 %v636_v46, %v635_v45  ;;  %v4434_v2 = vld [vmem:[%s6714_s27 + $0x28] sm:$0xff]  }
  0x5c   : > { %3924 = vmatprep.subr.bf16.mxu0 %v4419_v3  ;;  %4353 = vmatprep.subr.bf16.mxu1 %v4419_v3  ;;  %v652_v50 = vld [vmem:[%s5410_s22 + $0x1b0] sm:$0xff]  ;;  %v653_v51 = vld [vmem:[%s5410_s22 + $0x1c0] sm:$0xff]  ;;  %v746_v54 = vpack.c.bf16 %v638_v48, %v637_v47 }
  0x5d   : > { %v654_v52 = vld [vmem:[%s5410_s22 + $0x1d0] sm:$0xff]  ;;  %v753_v55 = vpack.c.bf16 %v652_v50, %v651_v49  ;;  %v639_v57 = vld [vmem:[%s5410_s22 + $0xe0] sm:$0xff] }
  0x5e   : > { %v754_v56 = vpack.c.bf16 %v654_v52, %v653_v51  ;;  %v640_v58 = vld [vmem:[%s5410_s22 + $0xf0] sm:$0xff]  ;;  %v655_v59 = vld [vmem:[%s5410_s22 + $0x1e0] sm:$0xff] }
  0x5f   : > { %3925 = vmatpush3.bf16.msra.mxu0 %v4419_v3  ;;  %4361 = vmatpush3.bf16.msra.mxu1 %v4419_v3  ;;  %v656_v60 = vld [vmem:[%s5410_s22 + $0x1f0] sm:$0xff]  ;;  %v747_v61 = vpack.c.bf16 %v640_v58, %v639_v57  ;;  %v4432_v0 = vld [vmem:[%s6714_s27 + $0x20] sm:$0xff]   ;;  %v4435_v3 = vld [vmem:[%s6713_s5 + $0x28] sm:$0xff]  }
  0x60   : > { %3926 = vmatprep.subr.bf16.mxu0 %v4420_v7  ;;  %4354 = vmatprep.subr.bf16.mxu1 %v4420_v7  ;;  %v755_v62 = vpack.c.bf16 %v656_v60, %v655_v59  ;;  %v4433_v1 = vld [vmem:[%s6713_s5 + $0x20] sm:$0xff]   ;;  %v4436_v4 = vld [vmem:[%s6714_s27 + $0x30] sm:$0xff]   ;;  %v4441_v57 = vld [vmem:[%s6655_s7 + $0x8] sm:$0xff]  }
  0x61   : > { %v4437_v5 = vld [vmem:[%s6713_s5 + $0x30] sm:$0xff]   ;;  %v5523_v8 = vld [vmem:[%s6655_s7] sm:$0xff]  }
  0x62   : > { %v5529_v9 = vld [vmem:[%s6715_s24] ss:$0 sm:$0xff]  ;;  %s6739_s24 = sld [smem:[#allocation30_spill]] }
  0x63   : > { %3927 = vmatpush3.bf16.msra.mxu0 %v4420_v7  ;;  %4362 = vmatpush3.bf16.msra.mxu1 %v4420_v7  ;;  %v4439_v7 = vld [vmem:[%s6713_s5 + $0x38] sm:$0xff]  }
  0x64   : > { %3928 = vmatprep.subr.bf16.mxu0 %v4421_v11  ;;  %4355 = vmatprep.subr.bf16.mxu1 %v4421_v11 }
  0x67   : > { %3929 = vmatpush3.bf16.msra.mxu0 %v4421_v11  ;;  %4363 = vmatpush3.bf16.msra.mxu1 %v4421_v11 }
  0x68   : > { %3930 = vmatprep.subr.bf16.mxu0 %v4422_v12  ;;  %4356 = vmatprep.subr.bf16.mxu1 %v4422_v12  ;;  %s6599_s0 = scalar_lea.hbm %s6739_s24, %s3701_s1 }
  0x6b   : > { %3931 = vmatpush3.bf16.msra.mxu0 %v4422_v12  ;;  %4364 = vmatpush3.bf16.msra.mxu1 %v4422_v12 }
  0x6c   : > { %3932 = vmatprep.subr.bf16.mxu0 %v4423_v13  ;;  %4357 = vmatprep.subr.bf16.mxu1 %v4423_v13 }
  0x6f   : > { %3933 = vmatpush3.bf16.msra.mxu0 %v4423_v13  ;;  %4365 = vmatpush3.bf16.msra.mxu1 %v4423_v13 }
  0x70   : > { %4014 = vmatprep.subr.bf16.mxu0 %v4425_v20  ;;  %3966 = vmatprep.subr.bf16.mxu1 %v4424_v23 }
  0x72   : > { %3935 = vmatmul.mubr.bf16.vlgmr.msra.gmra.mrb[0].mxu0 %v741_v24  ;;  %3951 = vmatmul.mubr.bf16.vlgmr.msra.gmra.mrb[0].mxu1 %v749_v26 }
  0x73   : > { %3938 = vmatprep.mubr.bf16.mxu0 %v742_v25  ;;  %3954 = vmatprep.mubr.bf16.mxu1 %v750_v28 }
  0x74   : > { %3967 = vmatpush3.bf16.msra.mxu1 %v4424_v23  ;;  %4015 = vmatpush3.bf16.msra.mxu0 %v4425_v20 }
  0x75   : > { %3968 = vmatprep.subr.bf16.mxu1 %v4426_v27  ;;  %4016 = vmatprep.subr.bf16.mxu0 %v4427_v29 }
  0x78   : > { %3969 = vmatpush3.bf16.msra.mxu1 %v4426_v27  ;;  %4017 = vmatpush3.bf16.msra.mxu0 %v4427_v29 }
  0x79   : > { %3970 = vmatprep.subr.bf16.mxu1 %v4428_v38  ;;  %4018 = vmatprep.subr.bf16.mxu0 %v4429_v39 }
  0x7a   : > { %3939 = vmatmul.mubr.bf16.gmra.mrb[4].mxu0 %v743_v40  ;;  %3955 = vmatmul.mubr.bf16.gmra.mrb[4].mxu1 %v751_v42 }
  0x7b   : > { %3942 = vmatprep.mubr.bf16.mxu0 %v744_v41  ;;  %3958 = vmatprep.mubr.bf16.mxu1 %v752_v44 }
  0x7c   : > { %3971 = vmatpush3.bf16.msra.mxu1 %v4428_v38  ;;  %4019 = vmatpush3.bf16.msra.mxu0 %v4429_v39 }
  0x7d   : > { %3972 = vmatprep.subr.bf16.mxu1 %v4430_v43  ;;  %4020 = vmatprep.subr.bf16.mxu0 %v4431_v63 }
  0x80   : > { %3973 = vmatpush3.bf16.msra.mxu1 %v4430_v43  ;;  %4021 = vmatpush3.bf16.msra.mxu0 %v4431_v63 }
  0x81   : > { %3974 = vmatprep.subr.bf16.mxu1 %v4432_v0  ;;  %4022 = vmatprep.subr.bf16.mxu0 %v4433_v1 }
  0x82   : > { %3943 = vmatmul.mubr.bf16.gmra.mrb[8].mxu0 %v745_v53  ;;  %3959 = vmatmul.mubr.bf16.gmra.mrb[8].mxu1 %v753_v55 }
  0x83   : > { %3946 = vmatprep.mubr.bf16.mxu0 %v746_v54  ;;  %3962 = vmatprep.mubr.bf16.mxu1 %v754_v56 }
  0x84   : > { %3975 = vmatpush3.bf16.msra.mxu1 %v4432_v0  ;;  %4023 = vmatpush3.bf16.msra.mxu0 %v4433_v1 }
  0x85   : > { %3976 = vmatprep.subr.bf16.mxu1 %v4434_v2  ;;  %4024 = vmatprep.subr.bf16.mxu0 %v4435_v3 }
  0x88   : > { %3977 = vmatpush3.bf16.msra.mxu1 %v4434_v2  ;;  %4025 = vmatpush3.bf16.msra.mxu0 %v4435_v3 }
  0x89   : > { %3978 = vmatprep.subr.bf16.mxu1 %v4436_v4  ;;  %4026 = vmatprep.subr.bf16.mxu0 %v4437_v5 }
  0x8a   : > { %3947 = vmatmul.mubr.bf16.gmra.mrb[12].mxu0 %v747_v61  ;;  %3963 = vmatmul.mubr.bf16.gmra.mrb[12].mxu1 %v755_v62 }
  0x8c   : > { %3979 = vmatpush3.bf16.msra.mxu1 %v4436_v4  ;;  %4027 = vmatpush3.bf16.msra.mxu0 %v4437_v5 }
  0x8d   : > { %3980 = vmatprep.subr.bf16.mxu1 %v4438_v6  ;;  %4028 = vmatprep.subr.bf16.mxu0 %v4439_v7 }
  0x90   : > { %3981 = vmatpush3.bf16.msra.mxu1 %v4438_v6  ;;  %4029 = vmatpush3.bf16.msra.mxu0 %v4439_v7 }
  0x91   : > { %4062 = vmatprep.subr.bf16.mxu1 %v5523_v8 }
 0x145   : > { %v3936_v10 = vpop.f32.mrb[0].mxu0  ;;  %v3952_v13 = vpop.f32.mrb[0].mxu1 }
 0x146   : > { %v853_v11 = vadd.f32 %v3936_v10, %v5529_v9  ;;  %v844_v12 = vpop.f32.mrb[1].mxu0  ;;  %v908_v16 = vpop.f32.mrb[1].mxu1  ;;  %v917_v19 = vadd.f32 %v3952_v13, %v5529_v9 }
 0x147   : > { %v845_v14 = vadd.f32 %v5529_v9, %v844_v12  ;;  %v3937_v15 = vpop.f32.mrb[2].mxu0  ;;  %v3953_v20 = vpop.f32.mrb[2].mxu1  ;;  %v909_v22 = vadd.f32 %v5529_v9, %v908_v16 }
 0x148   : > { %4488 = vtanh.f32 %v853_v11  ;;  %v856_v17 = vadd.f32 %v3937_v15, %v5529_v9  ;;  %v847_v18 = vpop.f32.mrb[3].mxu0  ;;  %v911_v23 = vpop.f32.mrb[3].mxu1  ;;  %v920_v24 = vadd.f32 %v3953_v20, %v5529_v9  ;;  %v4442_v11 = vld [vmem:[%s6655_s7 + $0x10] sm:$0xff]  }
 0x149   : > { %4490 = vtanh.f32 %v845_v14  ;;  %v848_v21 = vadd.f32 %v5529_v9, %v847_v18  ;;  %v912_v25 = vadd.f32 %v5529_v9, %v911_v23 }
 0x14a   : > { %4492 = vtanh.f32 %v856_v17 }
 0x14b   : > { %4494 = vtanh.f32 %v848_v21 }
 0x14c   : > { %4496 = vtanh.f32 %v917_v19 }
 0x14d   : > { %v3940_v26 = vpop.f32.mrb[4].mxu0  ;;  %4498 = vtanh.f32 %v909_v22  ;;  %v3956_v29 = vpop.f32.mrb[4].mxu1 }
 0x14e   : > { %v869_v27 = vadd.f32 %v3940_v26, %v5529_v9  ;;  %v860_v28 = vpop.f32.mrb[5].mxu0  ;;  %4500 = vtanh.f32 %v920_v24  ;;  %v924_v32 = vpop.f32.mrb[5].mxu1  ;;  %v933_v35 = vadd.f32 %v3956_v29, %v5529_v9  ;;  %v4443_v24 = vld [vmem:[%s6655_s7 + $0x18] sm:$0xff]  }
 0x14f   : > { %v861_v30 = vadd.f32 %v5529_v9, %v860_v28  ;;  %v3941_v31 = vpop.f32.mrb[6].mxu0  ;;  %4502 = vtanh.f32 %v912_v25  ;;  %v3957_v36 = vpop.f32.mrb[6].mxu1  ;;  %v925_v38 = vadd.f32 %v5529_v9, %v924_v32 }
 0x150   : > { %4504 = vtanh.f32 %v869_v27  ;;  %v872_v33 = vadd.f32 %v3941_v31, %v5529_v9  ;;  %v863_v34 = vpop.f32.mrb[7].mxu0  ;;  %v927_v39 = vpop.f32.mrb[7].mxu1  ;;  %v936_v41 = vadd.f32 %v3957_v36, %v5529_v9 }
 0x151   : > { %4506 = vtanh.f32 %v861_v30  ;;  %v864_v37 = vadd.f32 %v5529_v9, %v863_v34  ;;  %v928_v43 = vadd.f32 %v5529_v9, %v927_v39 }
 0x152   : > { %v4489_v40 = vpop.eup %4488  ;;  %4508 = vtanh.f32 %v872_v33 }
 0x153   : > { %v4491_v42 = vpop.eup %4490  ;;  %4510 = vtanh.f32 %v864_v37 }
 0x154   : > { %v4493_v44 = vpop.eup %4492  ;;  %4512 = vtanh.f32 %v933_v35 }
 0x155   : > { %v4495_v45 = vpop.eup %4494  ;;  %v3944_v46 = vpop.f32.mrb[8].mxu0  ;;  %v1004_v47 = vpack.c.bf16 %v4493_v44, %v4489_v40  ;;  %4514 = vtanh.f32 %v925_v38 }
 0x156   : > { %v4497_v48 = vpop.eup %4496  ;;  %v885_v49 = vadd.f32 %v3944_v46, %v5529_v9  ;;  %v876_v50 = vpop.f32.mrb[9].mxu0  ;;  %v1003_v51 = vpack.c.bf16 %v4495_v45, %v4491_v42  ;;  %4516 = vtanh.f32 %v936_v41 }
 0x157   : > { %v3960_v52 = vpop.f32.mrb[8].mxu1  ;;  %v4499_v53 = vpop.eup %4498  ;;  %v877_v54 = vadd.f32 %v5529_v9, %v876_v50  ;;  %4518 = vtanh.f32 %v928_v43 }
 0x158   : > { %v3945_v55 = vpop.f32.mrb[10].mxu0  ;;  %v940_v56 = vpop.f32.mrb[9].mxu1  ;;  %4520 = vtanh.f32 %v885_v49  ;;  %3982 = vmatprep.mubr.bf16.mxu1 %v1003_v51  ;;  %4030 = vmatprep.mubr.bf16.mxu0 %v1003_v51  ;;  %v949_v61 = vadd.f32 %v3960_v52, %v5529_v9 }
 0x159   : > { %v4501_v58 = vpop.eup %4500  ;;  %v888_v59 = vadd.f32 %v3945_v55, %v5529_v9  ;;  %v879_v60 = vpop.f32.mrb[11].mxu0  ;;  %4522 = vtanh.f32 %v877_v54  ;;  %3983 = vmatmul.mubr.bf16.vlgmr.msra.gmra.mrb[16].mxu1 %v1004_v47  ;;  %4031 = vmatmul.mubr.bf16.vlgmr.msra.gmra.mrb[16].mxu0 %v1004_v47  ;;  %v941_v1 = vadd.f32 %v5529_v9, %v940_v56 }
 0x15a   : > { %v3961_v62 = vpop.f32.mrb[10].mxu1  ;;  %v4503_v63 = vpop.eup %4502  ;;  %v880_v0 = vadd.f32 %v5529_v9, %v879_v60  ;;  %v5556_v3 = vpack.c.bf16 %v4501_v58, %v4497_v48  ;;  %4063 = vmatpush3.bf16.msra.mxu1 %v5523_v8 }
 0x15b   : > { %v943_v2 = vpop.f32.mrb[11].mxu1  ;;  %v4505_v4 = vpop.eup %4504  ;;  %4524 = vtanh.f32 %v888_v59  ;;  %v952_v5 = vadd.f32 %v3961_v62, %v5529_v9  ;;  %v5559_v6 = vpack.c.bf16 %v4503_v63, %v4499_v53  ;;  %4064 = vmatprep.subr.bf16.mxu1 %v4441_v57  ;;  %v4445_v62 = vld [vmem:[%s6655_s7 + $0x28] sm:$0xff]   ;;  %v4446_v63 = vld [vmem:[%s6655_s7 + $0x30] sm:$0xff]  }
 0x15c   : > { %v4507_v7 = vpop.eup %4506  ;;  %4526 = vtanh.f32 %v880_v0  ;;  %v944_v10 = vadd.f32 %v5529_v9, %v943_v2  ;;  %v4447_v0 = vld [vmem:[%s6655_s7 + $0x38] sm:$0xff]   ;;  %v4449_v2 = vld [vmem:[%s6657_s9 + $0x8] sm:$0xff]  }
 0x15d   : > { %v4509_v12 = vpop.eup %4508  ;;  %4528 = vtanh.f32 %v949_v61  ;;  %v3948_v14 = vpop.f32.mrb[12].mxu0  ;;  %v4444_v61 = vld [vmem:[%s6655_s7 + $0x20] sm:$0xff]  }
 0x15e   : > { %v4511_v13 = vpop.eup %4510  ;;  %v1006_v15 = vpack.c.bf16 %v4509_v12, %v4505_v4  ;;  %4530 = vtanh.f32 %v941_v1  ;;  %v901_v17 = vadd.f32 %v3948_v14, %v5529_v9  ;;  %v892_v18 = vpop.f32.mrb[13].mxu0  ;;  %4065 = vmatpush3.bf16.msra.mxu1 %v4441_v57  ;;  %v4448_v1 = vld [vmem:[%s6657_s9] sm:$0xff]   ;;  %v4450_v4 = vld [vmem:[%s6657_s9 + $0x10] sm:$0xff]  }
 0x15f   : > { %v4513_v16 = vpop.eup %4512  ;;  %v1005_v8 = vpack.c.bf16 %v4511_v13, %v4507_v7  ;;  %4532 = vtanh.f32 %v952_v5  ;;  %v3964_v19 = vpop.f32.mrb[12].mxu1  ;;  %v893_v21 = vadd.f32 %v5529_v9, %v892_v18  ;;  %4066 = vmatprep.subr.bf16.mxu1 %v4442_v11  ;;  %4110 = vmatprep.subr.bf16.mxu0 %v4448_v1  ;;  %v4451_v5 = vld [vmem:[%s6657_s9 + $0x18] sm:$0xff]   ;;  %v4455_v7 = vld [vmem:[%s6657_s9 + $0x28] sm:$0xff]  }
 0x160   : > { %v4515_v20 = vpop.eup %4514  ;;  %v3949_v22 = vpop.f32.mrb[14].mxu0  ;;  %4534 = vtanh.f32 %v944_v10  ;;  %v965_v28 = vadd.f32 %v3964_v19, %v5529_v9  ;;  %4111 = vmatpush3.bf16.msra.mxu0 %v4448_v1  ;;  %v5620_v10 = vld [vmem:[%s6716_s4] ss:$0 sm:$0xff]  ;;  %s5130_s4 = sshll.u32 %s5197_s26, 4  ;;  %s5131_s4 = int_to_ptr.vmem [resolvable:$false] %s5130_s4 }
 0x161   : > { %v956_v23 = vpop.f32.mrb[13].mxu1  ;;  %v4517_v25 = vpop.eup %4516  ;;  %4536 = vtanh.f32 %v901_v17  ;;  %v904_v26 = vadd.f32 %v3949_v22, %v5529_v9  ;;  %3986 = vmatprep.mubr.bf16.mxu1 %v1005_v8  ;;  %4034 = vmatprep.mubr.bf16.mxu0 %v1005_v8  ;;  %s5132_s1 = scalar_lea.vmem %s5131_s4, 16384 }
 0x162   : > { %v895_v27 = vpop.f32.mrb[15].mxu0  ;;  %v3965_v29 = vpop.f32.mrb[14].mxu1  ;;  %4538 = vtanh.f32 %v893_v21  ;;  %3987 = vmatmul.mubr.bf16.gmra.mrb[20].mxu1 %v1006_v15  ;;  %4035 = vmatmul.mubr.bf16.gmra.mrb[20].mxu0 %v1006_v15  ;;  %v957_v32 = vadd.f32 %v5529_v9, %v956_v23  ;;  %v1014_v34 = vpack.c.bf16 %v4517_v25, %v4513_v16 }
 0x163   : > { %v4519_v30 = vpop.eup %4518  ;;  %v896_v31 = vadd.f32 %v5529_v9, %v895_v27  ;;  %v959_v33 = vpop.f32.mrb[15].mxu1  ;;  %4540 = vtanh.f32 %v904_v26  ;;  %v968_v36 = vadd.f32 %v3965_v29, %v5529_v9  ;;  %4067 = vmatpush3.bf16.msra.mxu1 %v4442_v11  ;;  %4112 = vmatprep.subr.bf16.mxu0 %v4449_v2 }
 0x164   : > { %v4521_v35 = vpop.eup %4520  ;;  %v1013_v37 = vpack.c.bf16 %v4519_v30, %v4515_v20  ;;  %v960_v39 = vadd.f32 %v5529_v9, %v959_v33  ;;  %4068 = vmatprep.subr.bf16.mxu1 %v4443_v24  ;;  %4113 = vmatpush3.bf16.msra.mxu0 %v4449_v2 }
 0x165   : > { %v4523_v38 = vpop.eup %4522  ;;  %4542 = vtanh.f32 %v896_v31  ;;  %4114 = vmatprep.subr.bf16.mxu0 %v4450_v4 }
 0x166   : > { %v4525_v40 = vpop.eup %4524  ;;  %4544 = vtanh.f32 %v965_v28 }
 0x167   : > { %v4527_v41 = vpop.eup %4526  ;;  %v1008_v42 = vpack.c.bf16 %v4525_v40, %v4521_v35  ;;  %4546 = vtanh.f32 %v957_v32  ;;  %4069 = vmatpush3.bf16.msra.mxu1 %v4443_v24 }
 0x168   : > { %v4529_v43 = vpop.eup %4528  ;;  %v1007_v44 = vpack.c.bf16 %v4527_v41, %v4523_v38  ;;  %4548 = vtanh.f32 %v968_v36  ;;  %4070 = vmatprep.subr.bf16.mxu1 %v4444_v61  ;;  %4115 = vmatpush3.bf16.msra.mxu0 %v4450_v4 }
 0x169   : > { %v4531_v45 = vpop.eup %4530  ;;  %4550 = vtanh.f32 %v960_v39  ;;  %4116 = vmatprep.subr.bf16.mxu0 %v4451_v5 }
 0x16a   : > { %v4533_v46 = vpop.eup %4532  ;;  %3990 = vmatprep.mubr.bf16.mxu1 %v1007_v44  ;;  %4038 = vmatprep.mubr.bf16.mxu0 %v1007_v44 }
 0x16b   : > { %v4535_v47 = vpop.eup %4534  ;;  %3991 = vmatmul.mubr.bf16.gmra.mrb[24].mxu1 %v1008_v42  ;;  %4039 = vmatmul.mubr.bf16.gmra.mrb[24].mxu0 %v1008_v42  ;;  %v1016_v48 = vpack.c.bf16 %v4533_v46, %v4529_v43 }
 0x16c   : > { %v4537_v9 = vpop.eup %4536  ;;  %v1015_v49 = vpack.c.bf16 %v4535_v47, %v4531_v45  ;;  %4071 = vmatpush3.bf16.msra.mxu1 %v4444_v61  ;;  %4117 = vmatpush3.bf16.msra.mxu0 %v4451_v5 }
 0x16d   : > { %v4539_v50 = vpop.eup %4538  ;;  %4072 = vmatprep.subr.bf16.mxu1 %v4445_v62 }
 0x16e   : > { %v4541_v51 = vpop.eup %4540 }
 0x16f   : > { %v4543_v52 = vpop.eup %4542  ;;  %v1010_v53 = vpack.c.bf16 %v4541_v51, %v4537_v9 }
 0x170   : > { %v4545_v54 = vpop.eup %4544  ;;  %v1009_v55 = vpack.c.bf16 %v4543_v52, %v4539_v50  ;;  %4073 = vmatpush3.bf16.msra.mxu1 %v4445_v62 }
 0x171   : > { %v4547_v56 = vpop.eup %4546  ;;  %4074 = vmatprep.subr.bf16.mxu1 %v4446_v63 }
 0x172   : > { %v4549_v57 = vpop.eup %4548  ;;  %3994 = vmatprep.mubr.bf16.mxu1 %v1009_v55  ;;  %4042 = vmatprep.mubr.bf16.mxu0 %v1009_v55 }
 0x173   : > { %v4551_v58 = vpop.eup %4550  ;;  %3995 = vmatmul.mubr.bf16.gmra.mrb[28].mxu1 %v1010_v53  ;;  %4043 = vmatmul.mubr.bf16.gmra.mrb[28].mxu0 %v1010_v53  ;;  %v1018_v59 = vpack.c.bf16 %v4549_v57, %v4545_v54  ;;  %v5661_v57 = vld [vmem:[%s6654_s6] ss:$0 sm:$0xff] }
 0x174   : > { %3998 = vmatprep.mubr.bf16.mxu1 %v5559_v6  ;;  %4046 = vmatprep.mubr.bf16.mxu0 %v5559_v6  ;;  %v1017_v60 = vpack.c.bf16 %v4551_v58, %v4547_v56  ;;  %v4453_v6 = vld [vmem:[%s6657_s9 + $0x20] sm:$0xff]  }
 0x175   : > { %4075 = vmatpush3.bf16.msra.mxu1 %v4446_v63  ;;  %4118 = vmatprep.subr.bf16.mxu0 %v4453_v6 }
 0x176   : > { %4076 = vmatprep.subr.bf16.mxu1 %v4447_v0  ;;  %4119 = vmatpush3.bf16.msra.mxu0 %v4453_v6 }
 0x177   : > { %4120 = vmatprep.subr.bf16.mxu0 %v4455_v7 }
 0x179   : > { %4077 = vmatpush3.bf16.msra.mxu1 %v4447_v0  ;;  %v657_v0 = vld [vmem:[%s5410_s22 + $0x8] sm:$0xff] }
 0x17a   : > { %4121 = vmatpush3.bf16.msra.mxu0 %v4455_v7  ;;  %v660_v7 = vld [vmem:[%s5410_s22 + $0x38] sm:$0xff] }
 0x17b   : > { %3999 = vmatmul.mubr.bf16.gmra.mrb[32].mxu1 %v5556_v3  ;;  %4047 = vmatmul.mubr.bf16.gmra.mrb[32].mxu0 %v5556_v3  ;;  %v5602_v3 = vld [vmem:[%s6659_s11] sm:$0xff]  }
 0x17c   : > { %4002 = vmatprep.mubr.bf16.mxu1 %v1013_v37  ;;  %4050 = vmatprep.mubr.bf16.mxu0 %v1013_v37 }
 0x17d   : > { %4158 = vmatprep.subr.bf16.mxu1 %v5602_v3 }
 0x183   : > { %4003 = vmatmul.mubr.bf16.gmra.mrb[36].mxu1 %v1014_v34  ;;  %4051 = vmatmul.mubr.bf16.gmra.mrb[36].mxu0 %v1014_v34 }
 0x184   : > { %4006 = vmatprep.mubr.bf16.mxu1 %v1015_v49  ;;  %4054 = vmatprep.mubr.bf16.mxu0 %v1015_v49 }
 0x18b   : > { %4007 = vmatmul.mubr.bf16.gmra.mrb[40].mxu1 %v1016_v48  ;;  %4055 = vmatmul.mubr.bf16.gmra.mrb[40].mxu0 %v1016_v48 }
 0x18c   : > { %4010 = vmatprep.mubr.bf16.mxu1 %v1017_v60  ;;  %4058 = vmatprep.mubr.bf16.mxu0 %v1017_v60  ;;  %v659_v60 = vld [vmem:[%s5410_s22 + $0x28] sm:$0xff] }
 0x193   : > { %4011 = vmatmul.mubr.bf16.gmra.mrb[44].mxu1 %v1018_v59  ;;  %4059 = vmatmul.mubr.bf16.gmra.mrb[44].mxu0 %v1018_v59 }
 0x22c   : > { %v3984_v11 = vpop.f32.mrb[16].mxu1  ;;  %v5622_v12 = vpop.f32.mrb[16].mxu0 }
 0x22d   : > { %v1116_v13 = vadd.f32 %v3984_v11, %v5620_v10  ;;  %v1107_v14 = vpop.f32.mrb[17].mxu1  ;;  %v5625_v15 = vpop.f32.mrb[17].mxu0 }
 0x22e   : > { %v1108_v16 = vadd.f32 %v5620_v10, %v1107_v14  ;;  %v3985_v17 = vpop.f32.mrb[18].mxu1  ;;  %v5628_v18 = vpop.f32.mrb[18].mxu0 }
 0x22f   : > { %4552 = vtanh.f32 %v1116_v13  ;;  %v1119_v8 = vadd.f32 %v3985_v17, %v5620_v10  ;;  %v1110_v19 = vpop.f32.mrb[19].mxu1  ;;  %v5631_v20 = vpop.f32.mrb[19].mxu0  ;;  %v1363_v17 = vadd.f32 %v5622_v12, %v5661_v57  ;;  %v1366_v12 = vadd.f32 %v5628_v18, %v5661_v57  ;;  %v663_v18 = vld [vmem:[%s5410_s22 + $0x68] sm:$0xff] }
 0x230   : > { %4554 = vtanh.f32 %v1108_v16  ;;  %v1111_v21 = vadd.f32 %v5620_v10, %v1110_v19  ;;  %v658_v19 = vld [vmem:[%s5410_s22 + $0x18] sm:$0xff] }
 0x231   : > { %4556 = vtanh.f32 %v1119_v8 }
 0x232   : > { %4558 = vtanh.f32 %v1111_v21 }
 0x235   : > { %v3988_v22 = vpop.f32.mrb[20].mxu1  ;;  %v5634_v23 = vpop.f32.mrb[20].mxu0 }
 0x236   : > { %v1132_v24 = vadd.f32 %v3988_v22, %v5620_v10  ;;  %v1123_v25 = vpop.f32.mrb[21].mxu1  ;;  %v5637_v26 = vpop.f32.mrb[21].mxu0 }
 0x237   : > { %v1124_v27 = vadd.f32 %v5620_v10, %v1123_v25  ;;  %v3989_v28 = vpop.f32.mrb[22].mxu1  ;;  %v5640_v29 = vpop.f32.mrb[22].mxu0 }
 0x238   : > { %4560 = vtanh.f32 %v1132_v24  ;;  %v1135_v30 = vadd.f32 %v3989_v28, %v5620_v10  ;;  %v1126_v31 = vpop.f32.mrb[23].mxu1  ;;  %v5643_v32 = vpop.f32.mrb[23].mxu0 }
 0x239   : > { %4562 = vtanh.f32 %v1124_v27  ;;  %v1127_v33 = vadd.f32 %v5620_v10, %v1126_v31  ;;  %v4553_v34 = vpop.eup %4552  ;;  %v1355_v27 = vadd.f32 %v5661_v57, %v5625_v15  ;;  %v1358_v15 = vadd.f32 %v5661_v57, %v5631_v20 }
 0x23a   : > { %4564 = vtanh.f32 %v1135_v30  ;;  %v4555_v35 = vpop.eup %4554  ;;  %v1485_v36 = vmul.f32 1.442695, %v4553_v34 }
 0x23b   : > { %4566 = vtanh.f32 %v1127_v33  ;;  %v4557_v37 = vpop.eup %4556  ;;  %v1481_v38 = vmul.f32 1.442695, %v4555_v35 }
 0x23c   : > { %v4559_v39 = vpop.eup %4558  ;;  %4568 = vpow2.f32 %v1485_v36  ;;  %v1487_v40 = vmul.f32 1.442695, %v4557_v37 }
 0x23d   : > { %4570 = vpow2.f32 %v1481_v38  ;;  %v1483_v43 = vmul.f32 1.442695, %v4559_v39 }
 0x23e   : > { %v3992_v41 = vpop.f32.mrb[24].mxu1  ;;  %v5646_v42 = vpop.f32.mrb[24].mxu0  ;;  %4572 = vpow2.f32 %v1487_v40 }
 0x23f   : > { %v1148_v44 = vadd.f32 %v3992_v41, %v5620_v10  ;;  %v1139_v45 = vpop.f32.mrb[25].mxu1  ;;  %v5649_v46 = vpop.f32.mrb[25].mxu0  ;;  %4574 = vpow2.f32 %v1483_v43 }
 0x240   : > { %v1140_v47 = vadd.f32 %v5620_v10, %v1139_v45  ;;  %v3993_v48 = vpop.f32.mrb[26].mxu1  ;;  %v5652_v9 = vpop.f32.mrb[26].mxu0 }
 0x241   : > { %v1151_v49 = vadd.f32 %v3993_v48, %v5620_v10  ;;  %v1142_v50 = vpop.f32.mrb[27].mxu1  ;;  %v5655_v51 = vpop.f32.mrb[27].mxu0  ;;  %4576 = vtanh.f32 %v1148_v44 }
 0x242   : > { %v1143_v52 = vadd.f32 %v5620_v10, %v1142_v50  ;;  %v4561_v53 = vpop.eup %4560  ;;  %4578 = vtanh.f32 %v1140_v47 }
 0x243   : > { %v4563_v54 = vpop.eup %4562  ;;  %v1493_v55 = vmul.f32 1.442695, %v4561_v53  ;;  %4580 = vtanh.f32 %v1151_v49  ;;  %v661_v49 = vld [vmem:[%s5410_s22 + $0x48] sm:$0xff] }
 0x244   : > { %v4565_v56 = vpop.eup %4564  ;;  %v1489_v58 = vmul.f32 1.442695, %v4563_v54  ;;  %4582 = vtanh.f32 %v1143_v52 }
 0x245   : > { %v4567_v59 = vpop.eup %4566  ;;  %4584 = vpow2.f32 %v1493_v55  ;;  %v1495_v61 = vmul.f32 1.442695, %v4565_v56  ;;  %v1379_v55 = vadd.f32 %v5634_v23, %v5661_v57  ;;  %v664_v56 = vld [vmem:[%s5410_s22 + $0x78] sm:$0xff] }
 0x246   : > { %v3996_v62 = vpop.f32.mrb[28].mxu1  ;;  %v5664_v63 = vpop.f32.mrb[28].mxu0  ;;  %4586 = vpow2.f32 %v1489_v58  ;;  %v1491_v1 = vmul.f32 1.442695, %v4567_v59 }
 0x247   : > { %v1164_v2 = vadd.f32 %v3996_v62, %v5620_v10  ;;  %v1155_v4 = vpop.f32.mrb[29].mxu1  ;;  %v5668_v5 = vpop.f32.mrb[29].mxu0  ;;  %4588 = vpow2.f32 %v1495_v61 }
 0x248   : > { %v4569_v6 = vpop.eup %4568  ;;  %v1156_v11 = vadd.f32 %v5620_v10, %v1155_v4  ;;  %v3997_v13 = vpop.f32.mrb[30].mxu1  ;;  %4590 = vpow2.f32 %v1491_v1  ;;  %v1371_v1 = vadd.f32 %v5661_v57, %v5637_v26  ;;  %v1374_v26 = vadd.f32 %v5661_v57, %v5643_v32  ;;  %v4454_v32 = vld [vmem:[%s6659_s11 + $0x8] sm:$0xff]  }
 0x249   : > { %v5672_v14 = vpop.f32.mrb[30].mxu0  ;;  %v4571_v16 = vpop.eup %4570  ;;  %v1547_v8 = vmul.f32 %v4569_v6, %v659_v60  ;;  %v1167_v21 = vadd.f32 %v3997_v13, %v5620_v10  ;;  %4592 = vtanh.f32 %v1164_v2  ;;  %v662_v2 = vld [vmem:[%s5410_s22 + $0x58] sm:$0xff]  ;;  %v1382_v13 = vadd.f32 %v5640_v29, %v5661_v57 }
 0x24a   : > { %v1158_v22 = vpop.f32.mrb[31].mxu1  ;;  %v5678_v24 = vpop.f32.mrb[31].mxu0  ;;  %v1545_v28 = vmul.f32 %v4571_v16, %v657_v0  ;;  %4594 = vtanh.f32 %v1156_v11 }
 0x24b   : > { %v4573_v25 = vpop.eup %4572  ;;  %v1159_v30 = vadd.f32 %v5620_v10, %v1158_v22  ;;  %v5683_v33 = vadd.f32 %v1547_v8, %v1363_v17  ;;  %4596 = vtanh.f32 %v1167_v21 }
 0x24c   : > { %v4575_v31 = vpop.eup %4574  ;;  %v1548_v34 = vmul.f32 %v4573_v25, %v660_v7  ;;  %v5687_v36 = vadd.f32 %v1545_v28, %v1355_v27 }
 0x24d   : > { %v4577_v35 = vpop.eup %4576  ;;  %v1546_v37 = vmul.f32 %v4575_v31, %v658_v19  ;;  %4598 = vtanh.f32 %v1159_v30 }
 0x24e   : > { %v4579_v38 = vpop.eup %4578  ;;  %v5691_v39 = vadd.f32 %v1548_v34, %v1366_v12  ;;  %v1501_v40 = vmul.f32 1.442695, %v4577_v35  ;;  %v4000_v45 = vpop.f32.mrb[32].mxu1 }
 0x24f   : > { %v4581_v41 = vpop.eup %4580  ;;  %v5693_v43 = vadd.f32 %v1546_v37, %v1358_v15  ;;  %v1497_v44 = vmul.f32 1.442695, %v4579_v38  ;;  %v5696_v47 = vpop.f32.mrb[32].mxu0  ;;  %v1180_v50 = vadd.f32 %v4000_v45, %v5620_v10 }
 0x250   : > { %v4583_v48 = vpop.eup %4582  ;;  %4600 = vpow2.f32 %v1501_v40  ;;  %v1503_v20 = vmul.f32 1.442695, %v4581_v41  ;;  %v1171_v52 = vpop.f32.mrb[33].mxu1  ;;  %v1661_v28 = vpack.c.bf16 %v5691_v39, %v5683_v33  ;;  %v667_v40 = vld [vmem:[%s5410_s22 + $0xa8] sm:$0xff] }
 0x251   : > { %v5700_v53 = vpop.f32.mrb[33].mxu0  ;;  %v4585_v54 = vpop.eup %4584  ;;  %4602 = vpow2.f32 %v1497_v44  ;;  %v1499_v58 = vmul.f32 1.442695, %v4583_v48  ;;  %v1172_v59 = vadd.f32 %v5620_v10, %v1171_v52  ;;  %v1660_v29 = vpack.c.bf16 %v5693_v43, %v5687_v36  ;;  %v665_v48 = vld [vmem:[%s5410_s22 + $0x88] sm:$0xff] }
 0x252   : > { %v4001_v60 = vpop.f32.mrb[34].mxu1  ;;  %v5706_v61 = vpop.f32.mrb[34].mxu0  ;;  %v1551_v0 = vmul.f32 %v4585_v54, %v663_v18  ;;  %4604 = vpow2.f32 %v1503_v20 }
 0x253   : > { %v4587_v62 = vpop.eup %4586  ;;  %v1183_v4 = vadd.f32 %v4001_v60, %v5620_v10  ;;  %v1174_v6 = vpop.f32.mrb[35].mxu1  ;;  %4606 = vpow2.f32 %v1499_v58  ;;  %4078 = vmatprep.mubr.bf16.mxu1 %v1660_v29 }
 0x254   : > { %v5712_v7 = vpop.f32.mrb[35].mxu0  ;;  %v4589_v23 = vpop.eup %4588  ;;  %v1549_v11 = vmul.f32 %v4587_v62, %v661_v49  ;;  %v1175_v16 = vadd.f32 %v5620_v10, %v1174_v6  ;;  %v5717_v8 = vadd.f32 %v1551_v0, %v1379_v55  ;;  %4608 = vtanh.f32 %v1180_v50  ;;  %4079 = vmatmul.mubr.bf16.vlgmr.msra.gmra.mrb[48].mxu1 %v1661_v28  ;;  %v668_v55 = vld [vmem:[%s5410_s22 + $0xb8] sm:$0xff]  ;;  %v4456_v62 = vld [vmem:[%s6659_s11 + $0x10] sm:$0xff]  }
 0x255   : > { %v4591_v17 = vpop.eup %4590  ;;  %v1552_v19 = vmul.f32 %v4589_v23, %v664_v56  ;;  %4610 = vtanh.f32 %v1172_v59  ;;  %4159 = vmatpush3.bf16.msra.mxu1 %v5602_v3  ;;  %v1395_v3 = vadd.f32 %v5646_v42, %v5661_v57  ;;  %v1387_v23 = vadd.f32 %v5661_v57, %v5649_v46 }
 0x256   : > { %v4593_v21 = vpop.eup %4592  ;;  %v5721_v22 = vadd.f32 %v1549_v11, %v1371_v1  ;;  %v1550_v25 = vmul.f32 %v4591_v17, %v662_v2  ;;  %4612 = vtanh.f32 %v1183_v4  ;;  %v4004_v15 = vpop.f32.mrb[36].mxu1  ;;  %4160 = vmatprep.subr.bf16.mxu1 %v4454_v32  ;;  %v666_v2 = vld [vmem:[%s5410_s22 + $0x98] sm:$0xff]  ;;  %v1390_v42 = vadd.f32 %v5661_v57, %v5655_v51 }
 0x257   : > { %v4595_v27 = vpop.eup %4594  ;;  %v5727_v30 = vadd.f32 %v1552_v19, %v1382_v13  ;;  %v1509_v31 = vmul.f32 1.442695, %v4593_v21  ;;  %4614 = vtanh.f32 %v1175_v16  ;;  %v5734_v37 = vpop.f32.mrb[36].mxu0  ;;  %v1196_v18 = vadd.f32 %v4004_v15, %v5620_v10 }
 0x258   : > { %v4597_v12 = vpop.eup %4596  ;;  %v5732_v34 = vadd.f32 %v1550_v25, %v1374_v26  ;;  %v1505_v35 = vmul.f32 1.442695, %v4595_v27  ;;  %v1187_v44 = vpop.f32.mrb[37].mxu1  ;;  %v1398_v13 = vadd.f32 %v5652_v9, %v5661_v57 }
 0x259   : > { %v4599_v38 = vpop.eup %4598  ;;  %4616 = vpow2.f32 %v1509_v31  ;;  %v1511_v41 = vmul.f32 1.442695, %v4597_v12  ;;  %v5738_v45 = vpop.f32.mrb[37].mxu0  ;;  %v1188_v20 = vadd.f32 %v5620_v10, %v1187_v44  ;;  %4161 = vmatpush3.bf16.msra.mxu1 %v4454_v32  ;;  %v1663_v9 = vpack.c.bf16 %v5727_v30, %v5717_v8  ;;  %v671_v12 = vld [vmem:[%s5410_s22 + $0xe8] sm:$0xff] }
 0x25a   : > { %4618 = vpow2.f32 %v1505_v35  ;;  %v1507_v49 = vmul.f32 1.442695, %v4599_v38  ;;  %v4005_v50 = vpop.f32.mrb[38].mxu1  ;;  %v5742_v52 = vpop.f32.mrb[38].mxu0  ;;  %v1662_v60 = vpack.c.bf16 %v5732_v34, %v5721_v22  ;;  %4162 = vmatprep.subr.bf16.mxu1 %v4456_v62 }
 0x25b   : > { %v4601_v54 = vpop.eup %4600  ;;  %4620 = vpow2.f32 %v1511_v41  ;;  %v1199_v56 = vadd.f32 %v4005_v50, %v5620_v10  ;;  %v1190_v58 = vpop.f32.mrb[39].mxu1  ;;  %v1411_v41 = vadd.f32 %v5664_v63, %v5661_v57 }
 0x25c   : > { %v5747_v59 = vpop.f32.mrb[39].mxu0  ;;  %v4603_v0 = vpop.eup %4602  ;;  %v1555_v1 = vmul.f32 %v4601_v54, %v667_v40  ;;  %4622 = vpow2.f32 %v1507_v49  ;;  %v1191_v4 = vadd.f32 %v5620_v10, %v1190_v58  ;;  %4082 = vmatprep.mubr.bf16.mxu1 %v1662_v60  ;;  %v1403_v54 = vadd.f32 %v5661_v57, %v5668_v5 }
 0x25d   : > { %v4605_v6 = vpop.eup %4604  ;;  %v1553_v11 = vmul.f32 %v4603_v0, %v665_v48  ;;  %4624 = vtanh.f32 %v1196_v18  ;;  %4083 = vmatmul.mubr.bf16.gmra.mrb[52].mxu1 %v1663_v9  ;;  %v669_v18 = vld [vmem:[%s5410_s22 + $0xc8] sm:$0xff] }
 0x25e   : > { %v4607_v16 = vpop.eup %4606  ;;  %v5762_v17 = vadd.f32 %v1555_v1, %v1395_v3  ;;  %v1556_v19 = vmul.f32 %v4605_v6, %v668_v55  ;;  %4626 = vtanh.f32 %v1188_v20  ;;  %v4008_v28 = vpop.f32.mrb[40].mxu1  ;;  %4163 = vmatpush3.bf16.msra.mxu1 %v4456_v62  ;;  %v672_v55 = vld [vmem:[%s5410_s22 + $0xf8] sm:$0xff]  ;;  %v1414_v1 = vadd.f32 %v5672_v14, %v5661_v57 }
 0x25f   : > { %v4609_v26 = vpop.eup %4608  ;;  %v5766_v21 = vadd.f32 %v1553_v11, %v1387_v23  ;;  %v1554_v46 = vmul.f32 %v4607_v16, %v666_v2  ;;  %4628 = vtanh.f32 %v1199_v56  ;;  %v5772_v51 = vpop.f32.mrb[40].mxu0  ;;  %v1212_v48 = vadd.f32 %v4008_v28, %v5620_v10  ;;  %v670_v2 = vld [vmem:[%s5410_s22 + $0xd8] sm:$0xff] }
 0x260   : > { %v4611_v25 = vpop.eup %4610  ;;  %v5770_v29 = vadd.f32 %v1556_v19, %v1398_v13  ;;  %v1517_v27 = vmul.f32 1.442695, %v4609_v26  ;;  %4630 = vtanh.f32 %v1191_v4  ;;  %v1203_v15 = vpop.f32.mrb[41].mxu1  ;;  %v1406_v19 = vadd.f32 %v5661_v57, %v5678_v24 }
 0x261   : > { %v4613_v31 = vpop.eup %4612  ;;  %v5774_v32 = vadd.f32 %v1554_v46, %v1390_v42  ;;  %v1513_v35 = vmul.f32 1.442695, %v4611_v25  ;;  %v5777_v38 = vpop.f32.mrb[41].mxu0  ;;  %v1204_v58 = vadd.f32 %v5620_v10, %v1203_v15 }
 0x262   : > { %v4615_v40 = vpop.eup %4614  ;;  %4632 = vpow2.f32 %v1517_v27  ;;  %v1519_v44 = vmul.f32 1.442695, %v4613_v31  ;;  %v4009_v49 = vpop.f32.mrb[42].mxu1  ;;  %v1665_v46 = vpack.c.bf16 %v5770_v29, %v5762_v17 }
 0x263   : > { %v5783_v20 = vpop.f32.mrb[42].mxu0  ;;  %v4617_v50 = vpop.eup %4616  ;;  %4634 = vpow2.f32 %v1513_v35  ;;  %v1515_v56 = vmul.f32 1.442695, %v4615_v40  ;;  %v1215_v62 = vadd.f32 %v4009_v49, %v5620_v10  ;;  %v1664_v23 = vpack.c.bf16 %v5774_v32, %v5766_v21 }
 0x264   : > { %v1206_v63 = vpop.f32.mrb[43].mxu1  ;;  %v5789_v60 = vpop.f32.mrb[43].mxu0  ;;  %v1559_v3 = vmul.f32 %v4617_v50, %v671_v12  ;;  %4636 = vpow2.f32 %v1519_v44 }
 0x265   : > { %v4619_v0 = vpop.eup %4618  ;;  %4638 = vpow2.f32 %v1515_v56  ;;  %v1207_v5 = vadd.f32 %v5620_v10, %v1206_v63  ;;  %4086 = vmatprep.mubr.bf16.mxu1 %v1664_v23 }
 0x266   : > { %v4621_v4 = vpop.eup %4620  ;;  %v1557_v6 = vmul.f32 %v4619_v0, %v669_v18  ;;  %v5798_v13 = vadd.f32 %v1559_v3, %v1411_v41  ;;  %4640 = vtanh.f32 %v1212_v48  ;;  %v4012_v28 = vpop.f32.mrb[44].mxu1  ;;  %4087 = vmatmul.mubr.bf16.gmra.mrb[56].mxu1 %v1665_v46  ;;  %v675_v18 = vld [vmem:[%s5410_s22 + $0x128] sm:$0xff]  ;;  %v1427_v3 = vadd.f32 %v5696_v47, %v5661_v57 }
 0x267   : > { %v4623_v11 = vpop.eup %4622  ;;  %v1560_v16 = vmul.f32 %v4621_v4, %v672_v55  ;;  %4642 = vtanh.f32 %v1204_v58  ;;  %v5808_v31 = vpop.f32.mrb[44].mxu0  ;;  %v1228_v48 = vadd.f32 %v4012_v28, %v5620_v10  ;;  %v1430_v47 = vadd.f32 %v5706_v61, %v5661_v57 }
 0x268   : > { %v4625_v14 = vpop.eup %4624  ;;  %v5802_v42 = vadd.f32 %v1557_v6, %v1403_v54  ;;  %v1558_v26 = vmul.f32 %v4623_v11, %v670_v2  ;;  %4644 = vtanh.f32 %v1215_v62  ;;  %v1219_v15 = vpop.f32.mrb[45].mxu1  ;;  %v673_v54 = vld [vmem:[%s5410_s22 + $0x108] sm:$0xff]  ;;  %v674_v6 = vld [vmem:[%s5410_s22 + $0x118] sm:$0xff] }
 0x269   : > { %v4627_v9 = vpop.eup %4626  ;;  %v5806_v25 = vadd.f32 %v1560_v16, %v1414_v1  ;;  %v1525_v27 = vmul.f32 1.442695, %v4625_v14  ;;  %4646 = vtanh.f32 %v1207_v5  ;;  %v5812_v40 = vpop.f32.mrb[45].mxu0  ;;  %v1220_v56 = vadd.f32 %v5620_v10, %v1219_v15  ;;  %v676_v1 = vld [vmem:[%s5410_s22 + $0x138] sm:$0xff] }
 0x26a   : > { %v4629_v24 = vpop.eup %4628  ;;  %v5810_v12 = vadd.f32 %v1558_v26, %v1406_v19  ;;  %v1521_v35 = vmul.f32 1.442695, %v4627_v9  ;;  %v4013_v49 = vpop.f32.mrb[46].mxu1  ;;  %v1419_v16 = vadd.f32 %v5661_v57, %v5700_v53  ;;  %v1422_v53 = vadd.f32 %v5661_v57, %v5712_v7 }
 0x26b   : > { %v4631_v41 = vpop.eup %4630  ;;  %4648 = vpow2.f32 %v1525_v27  ;;  %v1527_v44 = vmul.f32 1.442695, %v4629_v24  ;;  %v5816_v50 = vpop.f32.mrb[46].mxu0  ;;  %v1231_v2 = vadd.f32 %v4013_v49, %v5620_v10  ;;  %v677_v49 = vld [vmem:[%s5410_s22 + $0x148] sm:$0xff] }
 0x26c   : > { %4650 = vpow2.f32 %v1521_v35  ;;  %v1523_v55 = vmul.f32 1.442695, %v4631_v41  ;;  %v1222_v58 = vpop.f32.mrb[47].mxu1  ;;  %v5820_v63 = vpop.f32.mrb[47].mxu0  ;;  %v1666_v23 = vpack.c.bf16 %v5810_v12, %v5802_v42 }
 0x26d   : > { %v4633_v0 = vpop.eup %4632  ;;  %4652 = vpow2.f32 %v1527_v44  ;;  %v1223_v5 = vadd.f32 %v5620_v10, %v1222_v58  ;;  %v1667_v10 = vpack.c.bf16 %v5806_v25, %v5798_v13 }
 0x26e   : > { %v4635_v62 = vpop.eup %4634  ;;  %v1563_v4 = vmul.f32 %v4633_v0, %v675_v18  ;;  %4654 = vpow2.f32 %v1523_v55  ;;  %4090 = vmatprep.mubr.bf16.mxu1 %v1666_v23  ;;  %v679_v18 = vld [vmem:[%s5410_s22 + $0x168] sm:$0xff]  ;;  %v680_v55 = vld [vmem:[%s5410_s22 + $0x178] sm:$0xff] }
 0x26f   : > { %v4637_v11 = vpop.eup %4636  ;;  %v1561_v19 = vmul.f32 %v4635_v62, %v673_v54  ;;  %4656 = vtanh.f32 %v1228_v48  ;;  %4091 = vmatmul.mubr.bf16.gmra.mrb[60].mxu1 %v1667_v10 }
 0x270   : > { %v4639_v14 = vpop.eup %4638  ;;  %v5834_v26 = vadd.f32 %v1563_v4, %v1427_v3  ;;  %v1564_v46 = vmul.f32 %v4637_v11, %v676_v1  ;;  %4658 = vtanh.f32 %v1220_v56  ;;  %v1443_v3 = vadd.f32 %v5734_v37, %v5661_v57 }
 0x271   : > { %v4641_v9 = vpop.eup %4640  ;;  %v5838_v27 = vadd.f32 %v1561_v19, %v1419_v16  ;;  %v1562_v28 = vmul.f32 %v4639_v14, %v674_v6  ;;  %4660 = vtanh.f32 %v1231_v2  ;;  %v678_v2 = vld [vmem:[%s5410_s22 + $0x158] sm:$0xff]  ;;  %v1435_v4 = vadd.f32 %v5661_v57, %v5738_v45 }
 0x272   : > { %v4643_v61 = vpop.eup %4642  ;;  %v5842_v24 = vadd.f32 %v1564_v46, %v1430_v47  ;;  %v1533_v35 = vmul.f32 1.442695, %v4641_v9  ;;  %4662 = vtanh.f32 %v1223_v5  ;;  %v1446_v11 = vadd.f32 %v5742_v52, %v5661_v57 }
 0x273   : > { %v4645_v15 = vpop.eup %4644  ;;  %v5844_v41 = vadd.f32 %v1562_v28, %v1422_v53  ;;  %v1529_v44 = vmul.f32 1.442695, %v4643_v61  ;;  %v1438_v45 = vadd.f32 %v5661_v57, %v5747_v59 }
 0x274   : > { %v4647_v48 = vpop.eup %4646  ;;  %4664 = vpow2.f32 %v1533_v35  ;;  %v1535_v54 = vmul.f32 1.442695, %v4645_v15  ;;  %v1669_v37 = vpack.c.bf16 %v5842_v24, %v5834_v26  ;;  %v683_v35 = vld [vmem:[%s5410_s22 + $0x1a8] sm:$0xff] }
 0x275   : > { %v4649_v7 = vpop.eup %4648  ;;  %4666 = vpow2.f32 %v1529_v44  ;;  %v1531_v56 = vmul.f32 1.442695, %v4647_v48  ;;  %v1668_v58 = vpack.c.bf16 %v5844_v41, %v5838_v27 }
 0x276   : > { %v4651_v0 = vpop.eup %4650  ;;  %v1567_v1 = vmul.f32 %v4649_v7, %v679_v18  ;;  %4668 = vpow2.f32 %v1535_v54  ;;  %v681_v18 = vld [vmem:[%s5410_s22 + $0x188] sm:$0xff]  ;;  %v1459_v7 = vadd.f32 %v5772_v51, %v5661_v57  ;;  %v1462_v51 = vadd.f32 %v5783_v20, %v5661_v57 }
 0x277   : > { %v4653_v62 = vpop.eup %4652  ;;  %v1565_v6 = vmul.f32 %v4651_v0, %v677_v49  ;;  %4670 = vpow2.f32 %v1531_v56  ;;  %4094 = vmatprep.mubr.bf16.mxu1 %v1668_v58  ;;  %v684_v49 = vld [vmem:[%s5410_s22 + $0x1b8] sm:$0xff]  ;;  %v1451_v0 = vadd.f32 %v5661_v57, %v5777_v38 }
 0x278   : > { %v4655_v5 = vpop.eup %4654  ;;  %v5856_v23 = vadd.f32 %v1567_v1, %v1443_v3  ;;  %v1568_v16 = vmul.f32 %v4653_v62, %v680_v55  ;;  %4095 = vmatmul.mubr.bf16.gmra.mrb[64].mxu1 %v1669_v37  ;;  %v682_v56 = vld [vmem:[%s5410_s22 + $0x198] sm:$0xff]  ;;  %v687_v37 = vld [vmem:[%s5410_s22 + $0x1e8] sm:$0xff] }
 0x279   : > { %v4657_v19 = vpop.eup %4656  ;;  %v5862_v47 = vadd.f32 %v1565_v6, %v1435_v4  ;;  %v1566_v14 = vmul.f32 %v4655_v5, %v678_v2  ;;  %v1454_v5 = vadd.f32 %v5661_v57, %v5789_v60 }
 0x27a   : > { %v4659_v46 = vpop.eup %4658  ;;  %v5866_v10 = vadd.f32 %v1568_v16, %v1446_v11  ;;  %v1541_v9 = vmul.f32 1.442695, %v4657_v19  ;;  %v685_v19 = vld [vmem:[%s5410_s22 + $0x1c8] sm:$0xff] }
 0x27b   : > { %v4661_v53 = vpop.eup %4660  ;;  %v5868_v52 = vadd.f32 %v1566_v14, %v1438_v45  ;;  %v1537_v28 = vmul.f32 1.442695, %v4659_v46  ;;  %v688_v14 = vld [vmem:[%s5410_s22 + $0x1f8] sm:$0xff] }
 0x27c   : > { %v4663_v61 = vpop.eup %4662  ;;  %4672 = vpow2.f32 %v1541_v9  ;;  %v1543_v15 = vmul.f32 1.442695, %v4661_v53  ;;  %v1671_v1 = vpack.c.bf16 %v5866_v10, %v5856_v23  ;;  %v1475_v9 = vadd.f32 %v5808_v31, %v5661_v57 }
 0x27d   : > { %6717 = vst [vmem:[#allocation14_spill] sm:$0xff] %v5868_v52  ;;  %4674 = vpow2.f32 %v1537_v28  ;;  %v1539_v44 = vmul.f32 1.442695, %v4663_v61  ;;  %v1670_v59 = vpack.c.bf16 %v5868_v52, %v5862_v47  ;;  %v686_v28 = vld [vmem:[%s5410_s22 + $0x1d8] sm:$0xff]  ;;  %v1467_v61 = vadd.f32 %v5661_v57, %v5812_v40 }
 0x27e   : > { %v4665_v48 = vpop.eup %4664  ;;  %4676 = vpow2.f32 %v1543_v15  ;;  %v1470_v31 = vadd.f32 %v5661_v57, %v5820_v63  ;;  %v4458_v63 = vld [vmem:[%s6657_s9 + $0x30] sm:$0xff]  }
 0x27f   : > { %v4667_v54 = vpop.eup %4666  ;;  %v1571_v55 = vmul.f32 %v4665_v48, %v683_v35  ;;  %4678 = vpow2.f32 %v1539_v44  ;;  %4098 = vmatprep.mubr.bf16.mxu1 %v1670_v59  ;;  %v1478_v59 = vadd.f32 %v5816_v50, %v5661_v57  ;;  %v4457_v50 = vld [vmem:[%s6659_s11 + $0x18] sm:$0xff]   ;;  %v4459_v57 = vld [vmem:[%s6659_s11 + $0x20] sm:$0xff]   ;;  %4122 = vmatprep.subr.bf16.mxu0 %v4458_v63 }
 0x280   : > { %v4669_v58 = vpop.eup %4668  ;;  %v1569_v3 = vmul.f32 %v4667_v54, %v681_v18  ;;  %4099 = vmatmul.mubr.bf16.gmra.mrb[68].mxu1 %v1671_v1  ;;  %4164 = vmatprep.subr.bf16.mxu1 %v4457_v50  ;;  %v4463_v1 = vld [vmem:[%s6659_s11 + $0x38] sm:$0xff]  }
 0x281   : > { %v4671_v2 = vpop.eup %4670  ;;  %v5882_v62 = vadd.f32 %v1571_v55, %v1459_v7  ;;  %v1572_v4 = vmul.f32 %v4669_v58, %v684_v49  ;;  %4165 = vmatpush3.bf16.msra.mxu1 %v4457_v50  ;;  %v4460_v58 = vld [vmem:[%s6659_s11 + $0x28] sm:$0xff]   ;;  %4123 = vmatpush3.bf16.msra.mxu0 %v4458_v63 }
 0x282   : > { %v5886_v6 = vadd.f32 %v1569_v3, %v1451_v0  ;;  %v1570_v11 = vmul.f32 %v4671_v2, %v682_v56  ;;  %4166 = vmatprep.subr.bf16.mxu1 %v4459_v57  ;;  %v4462_v0 = vld [vmem:[%s6659_s11 + $0x30] sm:$0xff]   ;;  %v4461_v3 = vld [vmem:[%s6657_s9 + $0x38] sm:$0xff]   ;;  %v4464_v2 = vld [vmem:[%s6661_s13] sm:$0xff]  }
 0x283   : > { %6718 = vst [vmem:[#allocation15_spill] sm:$0xff] %v5882_v62  ;;  %v5890_v38 = vadd.f32 %v1572_v4, %v1462_v51  ;;  %4124 = vmatprep.subr.bf16.mxu0 %v4461_v3  ;;  %v5949_v51 = vld [vmem:[%s6656_s8] ss:$0 sm:$0xff] }
 0x284   : > { %6719 = vst [vmem:[#allocation16_spill] sm:$0xff] %v5886_v6  ;;  %v5892_v16 = vadd.f32 %v1570_v11, %v1454_v5 }
 0x285   : > { %6720 = vst [vmem:[#allocation17_spill] sm:$0xff] %v5890_v38  ;;  %v1673_v15 = vpack.c.bf16 %v5890_v38, %v5882_v62  ;;  %4167 = vmatpush3.bf16.msra.mxu1 %v4459_v57  ;;  %4125 = vmatpush3.bf16.msra.mxu0 %v4461_v3 }
 0x286   : > { %6721 = vst [vmem:[#allocation18_spill] sm:$0xff] %v5892_v16  ;;  %v4673_v45 = vpop.eup %4672  ;;  %v1672_v20 = vpack.c.bf16 %v5892_v16, %v5886_v6  ;;  %4168 = vmatprep.subr.bf16.mxu1 %v4460_v58  ;;  %4206 = vmatprep.subr.bf16.mxu0 %v4464_v2 }
 0x287   : > { %v4675_v46 = vpop.eup %4674  ;;  %v1575_v53 = vmul.f32 %v4673_v45, %v687_v37 }
 0x288   : > { %v4677_v60 = vpop.eup %4676  ;;  %v1573_v35 = vmul.f32 %v4675_v46, %v685_v19  ;;  %4102 = vmatprep.mubr.bf16.mxu1 %v1672_v20 }
 0x289   : > { %v4679_v18 = vpop.eup %4678  ;;  %v5906_v44 = vadd.f32 %v1575_v53, %v1475_v9  ;;  %v1576_v48 = vmul.f32 %v4677_v60, %v688_v14  ;;  %4103 = vmatmul.mubr.bf16.gmra.mrb[72].mxu1 %v1673_v15 }
 0x28a   : > { %v5910_v49 = vadd.f32 %v1573_v35, %v1467_v61  ;;  %v1574_v54 = vmul.f32 %v4679_v18, %v686_v28  ;;  %4169 = vmatpush3.bf16.msra.mxu1 %v4460_v58 }
 0x28b   : > { %6722 = vst [vmem:[#allocation19_spill] sm:$0xff] %v5906_v44  ;;  %v5914_v40 = vadd.f32 %v1576_v48, %v1478_v59  ;;  %4170 = vmatprep.subr.bf16.mxu1 %v4462_v0 }
 0x28c   : > { %6723 = vst [vmem:[#allocation20_spill] sm:$0xff] %v5910_v49  ;;  %v5916_v7 = vadd.f32 %v1574_v54, %v1470_v31 }
 0x28d   : > { %6724 = vst [vmem:[#allocation21_spill] sm:$0xff] %v5914_v40  ;;  %v1675_v56 = vpack.c.bf16 %v5914_v40, %v5906_v44 }
 0x28e   : > { %6725 = vst [vmem:[#allocation22_spill] sm:$0xff] %v5916_v7  ;;  %v1674_v55 = vpack.c.bf16 %v5916_v7, %v5910_v49  ;;  %4171 = vmatpush3.bf16.msra.mxu1 %v4462_v0  ;;  %v4465_v0 = vld [vmem:[%s6661_s13 + $0x8] sm:$0xff]   ;;  %v5065_v7 = vld [vmem:[%s5410_s22] sm:$0xff] }
 0x28f   : > { %4172 = vmatprep.subr.bf16.mxu1 %v4463_v1 }
 0x290   : > { %4106 = vmatprep.mubr.bf16.mxu1 %v1674_v55 }
 0x291   : > { %4107 = vmatmul.mubr.bf16.gmra.mrb[76].mxu1 %v1675_v56 }
 0x292   : > { %4173 = vmatpush3.bf16.msra.mxu1 %v4463_v1 }
 0x327   : > { %v4080_v4 = vpop.f32.mrb[48].mxu1 }
 0x328   : > { %v1773_v5 = vadd.f32 %v4080_v4, %v5949_v51  ;;  %v1764_v11 = vpop.f32.mrb[49].mxu1 }
 0x329   : > { %v1765_v37 = vadd.f32 %v5949_v51, %v1764_v11  ;;  %v4081_v19 = vpop.f32.mrb[50].mxu1 }
 0x32a   : > { %4680 = vtanh.f32 %v1773_v5  ;;  %v1776_v45 = vadd.f32 %v4081_v19, %v5949_v51  ;;  %v1767_v14 = vpop.f32.mrb[51].mxu1 }
 0x32b   : > { %4682 = vtanh.f32 %v1765_v37  ;;  %v1768_v20 = vadd.f32 %v5949_v51, %v1767_v14  ;;  %v4466_v37 = vld [vmem:[%s6661_s13 + $0x10] sm:$0xff]  }
 0x32c   : > { %4684 = vtanh.f32 %v1776_v45 }
 0x32d   : > { %4686 = vtanh.f32 %v1768_v20 }
 0x330   : > { %v4084_v46 = vpop.f32.mrb[52].mxu1 }
 0x331   : > { %v1789_v9 = vadd.f32 %v4084_v46, %v5949_v51  ;;  %v1780_v53 = vpop.f32.mrb[53].mxu1 }
 0x332   : > { %v1781_v28 = vadd.f32 %v5949_v51, %v1780_v53  ;;  %v4085_v60 = vpop.f32.mrb[54].mxu1 }
 0x333   : > { %4688 = vtanh.f32 %v1789_v9  ;;  %v1792_v61 = vadd.f32 %v4085_v60, %v5949_v51  ;;  %v1783_v35 = vpop.f32.mrb[55].mxu1 }
 0x334   : > { %4690 = vtanh.f32 %v1781_v28  ;;  %v1784_v15 = vadd.f32 %v5949_v51, %v1783_v35  ;;  %v4681_v18 = vpop.eup %4680 }
 0x335   : > { %4692 = vtanh.f32 %v1792_v61  ;;  %v4683_v59 = vpop.eup %4682 }
 0x336   : > { %4694 = vtanh.f32 %v1784_v15  ;;  %v4685_v48 = vpop.eup %4684 }
 0x337   : > { %v4687_v31 = vpop.eup %4686  ;;  %v1924_v55 = vpack.c.bf16 %v4685_v48, %v4681_v18 }
 0x338   : > { %v1923_v57 = vpack.c.bf16 %v4687_v31, %v4683_v59 }
 0x339   : > { %v4088_v54 = vpop.f32.mrb[56].mxu1 }
 0x33a   : > { %v1805_v56 = vadd.f32 %v4088_v54, %v5949_v51  ;;  %v1796_v50 = vpop.f32.mrb[57].mxu1  ;;  %4126 = vmatprep.mubr.bf16.mxu0 %v1923_v57  ;;  %4174 = vmatprep.mubr.bf16.mxu1 %v1923_v57 }
 0x33b   : > { %v1797_v63 = vadd.f32 %v5949_v51, %v1796_v50  ;;  %v4089_v58 = vpop.f32.mrb[58].mxu1  ;;  %4127 = vmatmul.mubr.bf16.vlgmr.msra.gmra.mrb[48].mxu0 %v1924_v55  ;;  %4175 = vmatmul.mubr.bf16.vlgmr.msra.gmra.mrb[80].mxu1 %v1924_v55 }
 0x33c   : > { %4696 = vtanh.f32 %v1805_v56  ;;  %v1808_v3 = vadd.f32 %v4089_v58, %v5949_v51  ;;  %v1799_v1 = vpop.f32.mrb[59].mxu1  ;;  %4207 = vmatpush3.bf16.msra.mxu0 %v4464_v2  ;;  %v4467_v2 = vld [vmem:[%s6661_s13 + $0x18] sm:$0xff]  }
 0x33d   : > { %4698 = vtanh.f32 %v1797_v63  ;;  %v1800_v4 = vadd.f32 %v5949_v51, %v1799_v1  ;;  %v4689_v5 = vpop.eup %4688  ;;  %4208 = vmatprep.subr.bf16.mxu0 %v4465_v0 }
 0x33e   : > { %4700 = vtanh.f32 %v1808_v3  ;;  %v4691_v11 = vpop.eup %4690 }
 0x33f   : > { %4702 = vtanh.f32 %v1800_v4  ;;  %v4693_v19 = vpop.eup %4692 }
 0x340   : > { %v4695_v45 = vpop.eup %4694  ;;  %v1926_v20 = vpack.c.bf16 %v4693_v19, %v4689_v5  ;;  %4209 = vmatpush3.bf16.msra.mxu0 %v4465_v0 }
 0x341   : > { %v1925_v53 = vpack.c.bf16 %v4695_v45, %v4691_v11  ;;  %4210 = vmatprep.subr.bf16.mxu0 %v4466_v37 }
 0x342   : > { %v4092_v14 = vpop.f32.mrb[60].mxu1 }
 0x343   : > { %v1821_v46 = vadd.f32 %v4092_v14, %v5949_v51  ;;  %v1812_v9 = vpop.f32.mrb[61].mxu1  ;;  %4130 = vmatprep.mubr.bf16.mxu0 %v1925_v53  ;;  %4178 = vmatprep.mubr.bf16.mxu1 %v1925_v53 }
 0x344   : > { %v1813_v28 = vadd.f32 %v5949_v51, %v1812_v9  ;;  %v4093_v60 = vpop.f32.mrb[62].mxu1  ;;  %4131 = vmatmul.mubr.bf16.gmra.mrb[52].mxu0 %v1926_v20  ;;  %4179 = vmatmul.mubr.bf16.gmra.mrb[84].mxu1 %v1926_v20 }
 0x345   : > { %4704 = vtanh.f32 %v1821_v46  ;;  %v1824_v61 = vadd.f32 %v4093_v60, %v5949_v51  ;;  %v1815_v35 = vpop.f32.mrb[63].mxu1  ;;  %4211 = vmatpush3.bf16.msra.mxu0 %v4466_v37 }
 0x346   : > { %4706 = vtanh.f32 %v1813_v28  ;;  %v1816_v15 = vadd.f32 %v5949_v51, %v1815_v35  ;;  %v4697_v18 = vpop.eup %4696  ;;  %4212 = vmatprep.subr.bf16.mxu0 %v4467_v2 }
 0x347   : > { %4708 = vtanh.f32 %v1824_v61  ;;  %v4699_v59 = vpop.eup %4698 }
 0x348   : > { %4710 = vtanh.f32 %v1816_v15  ;;  %v4701_v48 = vpop.eup %4700 }
 0x349   : > { %v4703_v31 = vpop.eup %4702  ;;  %v1928_v55 = vpack.c.bf16 %v4701_v48, %v4697_v18  ;;  %4213 = vmatpush3.bf16.msra.mxu0 %v4467_v2 }
 0x34a   : > { %v1927_v57 = vpack.c.bf16 %v4703_v31, %v4699_v59 }
 0x34b   : > { %v4096_v54 = vpop.f32.mrb[64].mxu1 }
 0x34c   : > { %v1837_v56 = vadd.f32 %v4096_v54, %v5949_v51  ;;  %v1828_v50 = vpop.f32.mrb[65].mxu1  ;;  %4134 = vmatprep.mubr.bf16.mxu0 %v1927_v57  ;;  %4182 = vmatprep.mubr.bf16.mxu1 %v1927_v57 }
 0x34d   : > { %v1829_v63 = vadd.f32 %v5949_v51, %v1828_v50  ;;  %v4097_v58 = vpop.f32.mrb[66].mxu1  ;;  %4135 = vmatmul.mubr.bf16.gmra.mrb[56].mxu0 %v1928_v55  ;;  %4183 = vmatmul.mubr.bf16.gmra.mrb[88].mxu1 %v1928_v55 }
 0x34e   : > { %4712 = vtanh.f32 %v1837_v56  ;;  %v1840_v0 = vadd.f32 %v4097_v58, %v5949_v51  ;;  %v1831_v3 = vpop.f32.mrb[67].mxu1 }
 0x34f   : > { %4714 = vtanh.f32 %v1829_v63  ;;  %v1832_v1 = vadd.f32 %v5949_v51, %v1831_v3  ;;  %v4705_v4 = vpop.eup %4704 }
 0x350   : > { %4716 = vtanh.f32 %v1840_v0  ;;  %v4707_v5 = vpop.eup %4706 }
 0x351   : > { %4718 = vtanh.f32 %v1832_v1  ;;  %v4709_v11 = vpop.eup %4708 }
 0x352   : > { %v4711_v37 = vpop.eup %4710  ;;  %v1930_v45 = vpack.c.bf16 %v4709_v11, %v4705_v4 }
 0x353   : > { %v4100_v19 = vpop.f32.mrb[68].mxu1  ;;  %v1929_v46 = vpack.c.bf16 %v4711_v37, %v4707_v5 }
 0x354   : > { %v1853_v14 = vadd.f32 %v4100_v19, %v5949_v51  ;;  %v1844_v20 = vpop.f32.mrb[69].mxu1 }
 0x355   : > { %v1845_v9 = vadd.f32 %v5949_v51, %v1844_v20  ;;  %v4101_v53 = vpop.f32.mrb[70].mxu1  ;;  %4138 = vmatprep.mubr.bf16.mxu0 %v1929_v46  ;;  %4186 = vmatprep.mubr.bf16.mxu1 %v1929_v46 }
 0x356   : > { %4720 = vtanh.f32 %v1853_v14  ;;  %v1856_v28 = vadd.f32 %v4101_v53, %v5949_v51  ;;  %v1847_v60 = vpop.f32.mrb[71].mxu1  ;;  %4139 = vmatmul.mubr.bf16.gmra.mrb[60].mxu0 %v1930_v45  ;;  %4187 = vmatmul.mubr.bf16.gmra.mrb[92].mxu1 %v1930_v45 }
 0x357   : > { %4722 = vtanh.f32 %v1845_v9  ;;  %v1848_v2 = vadd.f32 %v5949_v51, %v1847_v60 }
 0x358   : > { %v4713_v61 = vpop.eup %4712  ;;  %4724 = vtanh.f32 %v1856_v28 }
 0x359   : > { %v4715_v35 = vpop.eup %4714  ;;  %4726 = vtanh.f32 %v1848_v2 }
 0x35a   : > { %v4717_v15 = vpop.eup %4716 }
 0x35b   : > { %v4719_v18 = vpop.eup %4718  ;;  %v1932_v48 = vpack.c.bf16 %v4717_v15, %v4713_v61 }
 0x35c   : > { %v4104_v59 = vpop.f32.mrb[72].mxu1  ;;  %v1931_v55 = vpack.c.bf16 %v4719_v18, %v4715_v35 }
 0x35d   : > { %v1869_v31 = vadd.f32 %v4104_v59, %v5949_v51  ;;  %v1860_v54 = vpop.f32.mrb[73].mxu1 }
 0x35e   : > { %v1861_v56 = vadd.f32 %v5949_v51, %v1860_v54  ;;  %v4105_v50 = vpop.f32.mrb[74].mxu1  ;;  %4142 = vmatprep.mubr.bf16.mxu0 %v1931_v55  ;;  %4190 = vmatprep.mubr.bf16.mxu1 %v1931_v55  ;;  %v4468_v55 = vld [vmem:[%s6661_s13 + $0x20] sm:$0xff]  }
 0x35f   : > { %4728 = vtanh.f32 %v1869_v31  ;;  %v1872_v57 = vadd.f32 %v4105_v50, %v5949_v51  ;;  %v1863_v63 = vpop.f32.mrb[75].mxu1  ;;  %4143 = vmatmul.mubr.bf16.gmra.mrb[64].mxu0 %v1932_v48  ;;  %4191 = vmatmul.mubr.bf16.gmra.mrb[96].mxu1 %v1932_v48  ;;  %v4470_v50 = vld [vmem:[%s6661_s13 + $0x30] sm:$0xff]  }
 0x360   : > { %4730 = vtanh.f32 %v1861_v56  ;;  %v1864_v58 = vadd.f32 %v5949_v51, %v1863_v63  ;;  %v4721_v0 = vpop.eup %4720  ;;  %4214 = vmatprep.subr.bf16.mxu0 %v4468_v55  ;;  %v4469_v56 = vld [vmem:[%s6661_s13 + $0x28] sm:$0xff]   ;;  %v4472_v63 = vld [vmem:[%s6663_s15] sm:$0xff]  }
 0x361   : > { %4732 = vtanh.f32 %v1872_v57  ;;  %v4723_v3 = vpop.eup %4722  ;;  %4215 = vmatpush3.bf16.msra.mxu0 %v4468_v55  ;;  %v4471_v57 = vld [vmem:[%s6661_s13 + $0x38] sm:$0xff]   ;;  %4254 = vmatprep.subr.bf16.mxu1 %v4472_v63 }
 0x362   : > { %4734 = vtanh.f32 %v1864_v58  ;;  %v4725_v1 = vpop.eup %4724  ;;  %4216 = vmatprep.subr.bf16.mxu0 %v4469_v56  ;;  %v4473_v58 = vld [vmem:[%s6663_s15 + $0x8] sm:$0xff]   ;;  %4255 = vmatpush3.bf16.msra.mxu1 %v4472_v63 }
 0x363   : > { %v4727_v4 = vpop.eup %4726  ;;  %v1934_v11 = vpack.c.bf16 %v4725_v1, %v4721_v0  ;;  %v6013_v0 = vld [vmem:[%s6665_s17] sm:$0xff]   ;;  %4256 = vmatprep.subr.bf16.mxu1 %v4473_v58  ;;  %v4475_v1 = vld [vmem:[%s6663_s15 + $0x18] sm:$0xff]  }
 0x364   : > { %v4108_v5 = vpop.f32.mrb[76].mxu1  ;;  %v1933_v45 = vpack.c.bf16 %v4727_v4, %v4723_v3  ;;  %v4474_v3 = vld [vmem:[%s6663_s15 + $0x10] sm:$0xff]   ;;  %v4477_v4 = vld [vmem:[%s6663_s15 + $0x20] sm:$0xff]  }
 0x365   : > { %v1885_v37 = vadd.f32 %v4108_v5, %v5949_v51  ;;  %v1876_v19 = vpop.f32.mrb[77].mxu1  ;;  %4217 = vmatpush3.bf16.msra.mxu0 %v4469_v56  ;;  %v4479_v5 = vld [vmem:[%s6663_s15 + $0x28] sm:$0xff]  }
 0x366   : > { %v1877_v14 = vadd.f32 %v5949_v51, %v1876_v19  ;;  %v4109_v20 = vpop.f32.mrb[78].mxu1  ;;  %4146 = vmatprep.mubr.bf16.mxu0 %v1933_v45  ;;  %4194 = vmatprep.mubr.bf16.mxu1 %v1933_v45 }
 0x367   : > { %4736 = vtanh.f32 %v1885_v37  ;;  %v1888_v46 = vadd.f32 %v4109_v20, %v5949_v51  ;;  %v1879_v9 = vpop.f32.mrb[79].mxu1  ;;  %4147 = vmatmul.mubr.bf16.gmra.mrb[68].mxu0 %v1934_v11  ;;  %4195 = vmatmul.mubr.bf16.gmra.mrb[100].mxu1 %v1934_v11  ;;  %v6031_v11 = vld [vmem:[%s6658_s10] ss:$0 sm:$0xff] }
 0x368   : > { %4738 = vtanh.f32 %v1877_v14  ;;  %v1880_v53 = vadd.f32 %v5949_v51, %v1879_v9  ;;  %4218 = vmatprep.subr.bf16.mxu0 %v4470_v50  ;;  %4257 = vmatpush3.bf16.msra.mxu1 %v4473_v58 }
 0x369   : > { %v4729_v28 = vpop.eup %4728  ;;  %4740 = vtanh.f32 %v1888_v46  ;;  %4219 = vmatpush3.bf16.msra.mxu0 %v4470_v50  ;;  %4258 = vmatprep.subr.bf16.mxu1 %v4474_v3 }
 0x36a   : > { %v4731_v60 = vpop.eup %4730  ;;  %4742 = vtanh.f32 %v1880_v53  ;;  %4220 = vmatprep.subr.bf16.mxu0 %v4471_v57 }
 0x36b   : > { %v4733_v2 = vpop.eup %4732 }
 0x36c   : > { %v4735_v61 = vpop.eup %4734  ;;  %v1936_v35 = vpack.c.bf16 %v4733_v2, %v4729_v28  ;;  %4259 = vmatpush3.bf16.msra.mxu1 %v4474_v3 }
 0x36d   : > { %v1935_v15 = vpack.c.bf16 %v4735_v61, %v4731_v60  ;;  %4221 = vmatpush3.bf16.msra.mxu0 %v4471_v57  ;;  %4260 = vmatprep.subr.bf16.mxu1 %v4475_v1 }
 0x36e   : > { %4302 = vmatprep.subr.bf16.mxu0 %v6013_v0 }
 0x36f   : > { %4150 = vmatprep.mubr.bf16.mxu0 %v1935_v15  ;;  %4198 = vmatprep.mubr.bf16.mxu1 %v1935_v15 }
 0x370   : > { %4151 = vmatmul.mubr.bf16.gmra.mrb[72].mxu0 %v1936_v35  ;;  %4199 = vmatmul.mubr.bf16.gmra.mrb[104].mxu1 %v1936_v35 }
 0x371   : > { %v4737_v18 = vpop.eup %4736  ;;  %4261 = vmatpush3.bf16.msra.mxu1 %v4475_v1 }
 0x372   : > { %v4739_v59 = vpop.eup %4738  ;;  %4262 = vmatprep.subr.bf16.mxu1 %v4477_v4 }
 0x373   : > { %v4741_v48 = vpop.eup %4740 }
 0x374   : > { %v4743_v31 = vpop.eup %4742  ;;  %v1938_v54 = vpack.c.bf16 %v4741_v48, %v4737_v18 }
 0x375   : > { %v1937_v51 = vpack.c.bf16 %v4743_v31, %v4739_v59  ;;  %4263 = vmatpush3.bf16.msra.mxu1 %v4477_v4 }
 0x376   : > { %4264 = vmatprep.subr.bf16.mxu1 %v4479_v5 }
 0x377   : > { %4154 = vmatprep.mubr.bf16.mxu0 %v1937_v51  ;;  %4202 = vmatprep.mubr.bf16.mxu1 %v1937_v51 }
 0x378   : > { %4155 = vmatmul.mubr.bf16.gmra.mrb[76].mxu0 %v1938_v54  ;;  %4203 = vmatmul.mubr.bf16.gmra.mrb[108].mxu1 %v1938_v54 }
 0x379   : > { %4265 = vmatpush3.bf16.msra.mxu1 %v4479_v5 }
 0x40e   : > { %v4128_v37 = vpop.f32.mrb[48].mxu0  ;;  %v6033_v19 = vpop.f32.mrb[80].mxu1 }
 0x40f   : > { %v2036_v45 = vadd.f32 %v4128_v37, %v6031_v11  ;;  %v2027_v14 = vpop.f32.mrb[49].mxu0  ;;  %v6036_v20 = vpop.f32.mrb[81].mxu1 }
 0x410   : > { %v2028_v46 = vadd.f32 %v6031_v11, %v2027_v14  ;;  %v4129_v9 = vpop.f32.mrb[50].mxu0  ;;  %v6039_v53 = vpop.f32.mrb[82].mxu1 }
 0x411   : > { %4744 = vtanh.f32 %v2036_v45  ;;  %v2039_v28 = vadd.f32 %v4129_v9, %v6031_v11  ;;  %v2030_v60 = vpop.f32.mrb[51].mxu0  ;;  %v6042_v2 = vpop.f32.mrb[83].mxu1 }
 0x412   : > { %4746 = vtanh.f32 %v2028_v46  ;;  %v2031_v61 = vadd.f32 %v6031_v11, %v2030_v60 }
 0x413   : > { %4748 = vtanh.f32 %v2039_v28 }
 0x414   : > { %4750 = vtanh.f32 %v2031_v61 }
 0x417   : > { %v4132_v35 = vpop.f32.mrb[52].mxu0  ;;  %v6045_v15 = vpop.f32.mrb[84].mxu1 }
 0x418   : > { %v2052_v18 = vadd.f32 %v4132_v35, %v6031_v11  ;;  %v2043_v59 = vpop.f32.mrb[53].mxu0  ;;  %v6048_v48 = vpop.f32.mrb[85].mxu1 }
 0x419   : > { %v2044_v31 = vadd.f32 %v6031_v11, %v2043_v59  ;;  %v4133_v54 = vpop.f32.mrb[54].mxu0  ;;  %v6051_v51 = vpop.f32.mrb[86].mxu1 }
 0x41a   : > { %4752 = vtanh.f32 %v2052_v18  ;;  %v2055_v55 = vadd.f32 %v4133_v54, %v6031_v11  ;;  %v2046_v56 = vpop.f32.mrb[55].mxu0  ;;  %v6054_v50 = vpop.f32.mrb[87].mxu1 }
 0x41b   : > { %4754 = vtanh.f32 %v2044_v31  ;;  %v2047_v57 = vadd.f32 %v6031_v11, %v2046_v56  ;;  %v4745_v63 = vpop.eup %4744 }
 0x41c   : > { %4756 = vtanh.f32 %v2055_v55  ;;  %v4747_v58 = vpop.eup %4746  ;;  %v2405_v3 = vmul.f32 1.442695, %v4745_v63 }
 0x41d   : > { %4758 = vtanh.f32 %v2047_v57  ;;  %v4749_v1 = vpop.eup %4748  ;;  %v2401_v4 = vmul.f32 1.442695, %v4747_v58 }
 0x41e   : > { %v4751_v5 = vpop.eup %4750  ;;  %4760 = vpow2.f32 %v2405_v3  ;;  %v2407_v37 = vmul.f32 1.442695, %v4749_v1 }
 0x41f   : > { %4762 = vpow2.f32 %v2401_v4  ;;  %v2403_v46 = vmul.f32 1.442695, %v4751_v5  ;;  %v6072_v4 = vld [vmem:[%s6660_s12] ss:$0 sm:$0xff] }
 0x420   : > { %v4136_v45 = vpop.f32.mrb[56].mxu0  ;;  %v6057_v14 = vpop.f32.mrb[88].mxu1  ;;  %4764 = vpow2.f32 %v2407_v37  ;;  %v2302_v38 = vadd.f32 %v6051_v51, %v6072_v4 }
 0x421   : > { %v2068_v9 = vadd.f32 %v4136_v45, %v6031_v11  ;;  %v2059_v28 = vpop.f32.mrb[57].mxu0  ;;  %v6060_v60 = vpop.f32.mrb[89].mxu1  ;;  %4766 = vpow2.f32 %v2403_v46 }
 0x422   : > { %v2060_v61 = vadd.f32 %v6031_v11, %v2059_v28  ;;  %v4137_v35 = vpop.f32.mrb[58].mxu0  ;;  %v6063_v18 = vpop.f32.mrb[90].mxu1 }
 0x423   : > { %v2071_v59 = vadd.f32 %v4137_v35, %v6031_v11  ;;  %v2062_v31 = vpop.f32.mrb[59].mxu0  ;;  %v6066_v54 = vpop.f32.mrb[91].mxu1  ;;  %4768 = vtanh.f32 %v2068_v9 }
 0x424   : > { %v2063_v55 = vadd.f32 %v6031_v11, %v2062_v31  ;;  %v4753_v56 = vpop.eup %4752  ;;  %4770 = vtanh.f32 %v2060_v61 }
 0x425   : > { %v4755_v57 = vpop.eup %4754  ;;  %v2413_v63 = vmul.f32 1.442695, %v4753_v56  ;;  %4772 = vtanh.f32 %v2071_v59 }
 0x426   : > { %v4757_v58 = vpop.eup %4756  ;;  %v2409_v3 = vmul.f32 1.442695, %v4755_v57  ;;  %4774 = vtanh.f32 %v2063_v55  ;;  %v2283_v57 = vadd.f32 %v6033_v19, %v6072_v4 }
 0x427   : > { %v4759_v1 = vpop.eup %4758  ;;  %4776 = vpow2.f32 %v2413_v63  ;;  %v2415_v5 = vmul.f32 1.442695, %v4757_v58  ;;  %v5064_v63 = vld [vmem:[%s5410_s22 + $0x20] sm:$0xff] }
 0x428   : > { %4778 = vpow2.f32 %v2409_v3  ;;  %v2411_v46 = vmul.f32 1.442695, %v4759_v1  ;;  %v4761_v35 = vpop.eup %4760 }
 0x429   : > { %v4140_v37 = vpop.f32.mrb[60].mxu0  ;;  %v6074_v45 = vpop.f32.mrb[92].mxu1  ;;  %4780 = vpow2.f32 %v2415_v5  ;;  %v2467_v58 = vmul.f32 %v5064_v63, %v4761_v35  ;;  %v5066_v35 = vld [vmem:[%s5410_s22 + $0x30] sm:$0xff] }
 0x42a   : > { %v2084_v9 = vadd.f32 %v4140_v37, %v6031_v11  ;;  %v2075_v28 = vpop.f32.mrb[61].mxu0  ;;  %v6077_v61 = vpop.f32.mrb[93].mxu1  ;;  %4782 = vpow2.f32 %v2411_v46  ;;  %v2286_v46 = vadd.f32 %v6039_v53, %v6072_v4 }
 0x42b   : > { %v2076_v59 = vadd.f32 %v6031_v11, %v2075_v28  ;;  %v4141_v31 = vpop.f32.mrb[62].mxu0  ;;  %v6080_v55 = vpop.f32.mrb[94].mxu1  ;;  %v2275_v28 = vadd.f32 %v6072_v4, %v6036_v20  ;;  %v6092_v44 = vadd.f32 %v2467_v58, %v2283_v57  ;;  %v2278_v20 = vadd.f32 %v6072_v4, %v6042_v2 }
 0x42c   : > { %v4763_v56 = vpop.eup %4762  ;;  %v2087_v3 = vadd.f32 %v4141_v31, %v6031_v11  ;;  %v2078_v1 = vpop.f32.mrb[63].mxu0  ;;  %4784 = vtanh.f32 %v2084_v9 }
 0x42d   : > { %v6086_v37 = vpop.f32.mrb[95].mxu1  ;;  %v4765_v5 = vpop.eup %4764  ;;  %v2465_v40 = vmul.f32 %v5065_v7, %v4763_v56  ;;  %v2079_v19 = vadd.f32 %v6031_v11, %v2078_v1  ;;  %4786 = vtanh.f32 %v2076_v59  ;;  %v5067_v7 = vld [vmem:[%s5410_s22 + $0x10] sm:$0xff]  ;;  %3483 = vst [vmem:[%s6104_s18 + $0x28] sm:$0xff] %v6092_v44 }
 0x42e   : > { %v4767_v49 = vpop.eup %4766  ;;  %v2468_v31 = vmul.f32 %v5066_v35, %v4765_v5  ;;  %4788 = vtanh.f32 %v2087_v3 }
 0x42f   : > { %v4769_v63 = vpop.eup %4768  ;;  %v6097_v16 = vadd.f32 %v2465_v40, %v2275_v28  ;;  %v2466_v56 = vmul.f32 %v5067_v7, %v4767_v49  ;;  %4790 = vtanh.f32 %v2079_v19 }
 0x430   : > { %v4771_v9 = vpop.eup %4770  ;;  %v6108_v53 = vadd.f32 %v2468_v31, %v2286_v46  ;;  %v2421_v59 = vmul.f32 1.442695, %v4769_v63  ;;  %v2299_v31 = vadd.f32 %v6045_v15, %v6072_v4 }
 0x431   : > { %v4773_v40 = vpop.eup %4772  ;;  %3481 = vst [vmem:[%s6104_s18 + $0x8] sm:$0xff] %v6097_v16  ;;  %v2498_v2 = vadd.f32 %v2466_v56, %v2278_v20  ;;  %v2417_v49 = vmul.f32 1.442695, %v4771_v9  ;;  %v5068_v9 = vld [vmem:[%s5410_s22 + $0x60] sm:$0xff] }
 0x432   : > { %v4144_v57 = vpop.f32.mrb[64].mxu0  ;;  %v6112_v58 = vpop.f32.mrb[96].mxu1  ;;  %v2581_v1 = vpack.c.bf16 %v6108_v53, %v6092_v44  ;;  %3484 = vst [vmem:[%s6104_s18 + $0x38] sm:$0xff] %v6108_v53  ;;  %4792 = vpow2.f32 %v2421_v59  ;;  %v2423_v5 = vmul.f32 1.442695, %v4773_v40  ;;  %v2291_v59 = vadd.f32 %v6072_v4, %v6048_v48  ;;  %v5070_v48 = vld [vmem:[%s5410_s22 + $0x70] sm:$0xff] }
 0x433   : > { %v4775_v3 = vpop.eup %4774  ;;  %v2100_v28 = vadd.f32 %v4144_v57, %v6031_v11  ;;  %v2091_v19 = vpop.f32.mrb[65].mxu0  ;;  %3482 = vst [vmem:[%s6104_s18 + $0x18] sm:$0xff] %v2498_v2  ;;  %4794 = vpow2.f32 %v2417_v49  ;;  %v2580_v51 = vpack.c.bf16 %v2498_v2, %v6097_v16 }
 0x434   : > { %v6119_v46 = vpop.f32.mrb[97].mxu1  ;;  %v4777_v35 = vpop.eup %4776  ;;  %v2419_v63 = vmul.f32 1.442695, %v4775_v3  ;;  %v2092_v44 = vadd.f32 %v6031_v11, %v2091_v19  ;;  %4796 = vpow2.f32 %v2423_v5  ;;  %v5069_v3 = vld [vmem:[%s5410_s22 + $0x40] sm:$0xff] }
 0x435   : > { %v4145_v20 = vpop.f32.mrb[66].mxu0  ;;  %v6125_v7 = vpop.f32.mrb[98].mxu1  ;;  %v2471_v53 = vmul.f32 %v5068_v9, %v4777_v35  ;;  %4222 = vmatprep.mubr.bf16.mxu0 %v2580_v51  ;;  %v4480_v51 = vld [vmem:[%s6665_s17 + $0x10] sm:$0xff]  }
 0x436   : > { %v4779_v56 = vpop.eup %4778  ;;  %v2103_v40 = vadd.f32 %v4145_v20, %v6031_v11  ;;  %v2094_v57 = vpop.f32.mrb[67].mxu0  ;;  %4798 = vpow2.f32 %v2419_v63  ;;  %v2294_v20 = vadd.f32 %v6072_v4, %v6054_v50  ;;  %v4478_v50 = vld [vmem:[%s6665_s17 + $0x8] sm:$0xff]   ;;  %4223 = vmatmul.mubr.bf16.vlgmr.msra.gmra.mrb[80].mxu0 %v2581_v1 }
 0x437   : > { %v6131_v15 = vpop.f32.mrb[99].mxu1  ;;  %v4781_v49 = vpop.eup %4780  ;;  %v2469_v19 = vmul.f32 %v5069_v3, %v4779_v56  ;;  %v2095_v35 = vadd.f32 %v6031_v11, %v2094_v57  ;;  %v6137_v6 = vadd.f32 %v2471_v53, %v2299_v31  ;;  %4800 = vtanh.f32 %v2100_v28  ;;  %v5071_v56 = vld [vmem:[%s5410_s22 + $0x50] sm:$0xff]  ;;  %4303 = vmatpush3.bf16.msra.mxu0 %v6013_v0  ;;  %v5072_v0 = vld [vmem:[%s5410_s22 + $0xa0] sm:$0xff] }
 0x438   : > { %v4783_v9 = vpop.eup %4782  ;;  %v2472_v5 = vmul.f32 %v5070_v48, %v4781_v49  ;;  %4802 = vtanh.f32 %v2092_v44  ;;  %4304 = vmatprep.subr.bf16.mxu0 %v4478_v50 }
 0x439   : > { %v4785_v62 = vpop.eup %4784  ;;  %v2501_v52 = vadd.f32 %v2469_v19, %v2291_v59  ;;  %v2470_v3 = vmul.f32 %v5071_v56, %v4783_v9  ;;  %3487 = vst [vmem:[%s6104_s18 + $0x68] sm:$0xff] %v6137_v6  ;;  %4804 = vtanh.f32 %v2103_v40 }
 0x43a   : > { %v4787_v63 = vpop.eup %4786  ;;  %v6146_v31 = vadd.f32 %v2472_v5, %v2302_v38  ;;  %v2429_v53 = vmul.f32 1.442695, %v4785_v62  ;;  %4806 = vtanh.f32 %v2095_v35  ;;  %v4148_v16 = vpop.f32.mrb[68].mxu0 }
 0x43b   : > { %v4789_v28 = vpop.eup %4788  ;;  %3485 = vst [vmem:[%s6104_s18 + $0x48] sm:$0xff] %v2501_v52  ;;  %v2502_v59 = vadd.f32 %v2470_v3, %v2294_v20  ;;  %v2425_v57 = vmul.f32 1.442695, %v4787_v63  ;;  %v6152_v2 = vpop.f32.mrb[100].mxu1  ;;  %v2116_v38 = vadd.f32 %v4148_v16, %v6031_v11  ;;  %4305 = vmatpush3.bf16.msra.mxu0 %v4478_v50 }
 0x43c   : > { %v4791_v44 = vpop.eup %4790  ;;  %3488 = vst [vmem:[%s6104_s18 + $0x78] sm:$0xff] %v6146_v31  ;;  %4808 = vpow2.f32 %v2429_v53  ;;  %v2431_v62 = vmul.f32 1.442695, %v4789_v28  ;;  %v2107_v40 = vpop.f32.mrb[69].mxu0  ;;  %v2315_v53 = vadd.f32 %v6057_v14, %v6072_v4  ;;  %4306 = vmatprep.subr.bf16.mxu0 %v4480_v51 }
 0x43d   : > { %v6157_v49 = vpop.f32.mrb[101].mxu1  ;;  %3486 = vst [vmem:[%s6104_s18 + $0x58] sm:$0xff] %v2502_v59  ;;  %4810 = vpow2.f32 %v2425_v57  ;;  %v2427_v19 = vmul.f32 1.442695, %v4791_v44  ;;  %v2108_v35 = vadd.f32 %v6031_v11, %v2107_v40  ;;  %v4149_v9 = vpop.f32.mrb[70].mxu0  ;;  %v2582_v3 = vpack.c.bf16 %v2502_v59, %v2501_v52  ;;  %v5073_v52 = vld [vmem:[%s5410_s22 + $0x80] sm:$0xff] }
 0x43e   : > { %v6161_v48 = vpop.f32.mrb[102].mxu1  ;;  %v4793_v5 = vpop.eup %4792  ;;  %4812 = vpow2.f32 %v2431_v62  ;;  %v2119_v1 = vadd.f32 %v4149_v9, %v6031_v11  ;;  %v2307_v44 = vadd.f32 %v6072_v4, %v6060_v60  ;;  %v2583_v62 = vpack.c.bf16 %v6146_v31, %v6137_v6  ;;  %v5074_v9 = vld [vmem:[%s5410_s22 + $0xb0] sm:$0xff] }
 0x43f   : > { %v2110_v20 = vpop.f32.mrb[71].mxu0  ;;  %v6165_v56 = vpop.f32.mrb[103].mxu1  ;;  %v2475_v28 = vmul.f32 %v5072_v0, %v4793_v5  ;;  %4814 = vpow2.f32 %v2427_v19  ;;  %4226 = vmatprep.mubr.bf16.mxu0 %v2582_v3  ;;  %v2318_v19 = vadd.f32 %v6063_v18, %v6072_v4  ;;  %v5075_v3 = vld [vmem:[%s5410_s22 + $0x90] sm:$0xff]  ;;  %4307 = vmatpush3.bf16.msra.mxu0 %v4480_v51 }
 0x440   : > { %v4795_v63 = vpop.eup %4794  ;;  %v2111_v57 = vadd.f32 %v6031_v11, %v2110_v20  ;;  %4816 = vtanh.f32 %v2116_v38  ;;  %v2310_v38 = vadd.f32 %v6072_v4, %v6066_v54  ;;  %4227 = vmatmul.mubr.bf16.gmra.mrb[84].mxu0 %v2583_v62 }
 0x441   : > { %v4797_v16 = vpop.eup %4796  ;;  %v2473_v59 = vmul.f32 %v5073_v52, %v4795_v63  ;;  %v6179_v14 = vadd.f32 %v2475_v28, %v2315_v53  ;;  %4818 = vtanh.f32 %v2108_v35 }
 0x442   : > { %v4799_v40 = vpop.eup %4798  ;;  %v2476_v5 = vmul.f32 %v5074_v9, %v4797_v16  ;;  %4820 = vtanh.f32 %v2119_v1 }
 0x443   : > { %v4801_v60 = vpop.eup %4800  ;;  %v2505_v20 = vadd.f32 %v2473_v59, %v2307_v44  ;;  %v2474_v63 = vmul.f32 %v5075_v3, %v4799_v40  ;;  %3491 = vst [vmem:[%s6104_s18 + $0xa8] sm:$0xff] %v6179_v14  ;;  %4822 = vtanh.f32 %v2111_v57  ;;  %v4152_v35 = vpop.f32.mrb[72].mxu0  ;;  %v2331_v44 = vadd.f32 %v6074_v45, %v6072_v4  ;;  %v5076_v3 = vld [vmem:[%s5410_s22 + $0xe0] sm:$0xff] }
 0x444   : > { %v4803_v6 = vpop.eup %4802  ;;  %v6189_v31 = vadd.f32 %v2476_v5, %v2318_v19  ;;  %v2437_v18 = vmul.f32 1.442695, %v4801_v60  ;;  %v6191_v50 = vpop.f32.mrb[104].mxu1  ;;  %v2132_v52 = vadd.f32 %v4152_v35, %v6031_v11  ;;  %v2323_v19 = vadd.f32 %v6072_v4, %v6077_v61  ;;  %v5077_v35 = vld [vmem:[%s5410_s22 + $0xc0] sm:$0xff] }
 0x445   : > { %v4805_v53 = vpop.eup %4804  ;;  %3489 = vst [vmem:[%s6104_s18 + $0x88] sm:$0xff] %v2505_v20  ;;  %v2506_v0 = vadd.f32 %v2474_v63, %v2310_v38  ;;  %v2433_v54 = vmul.f32 1.442695, %v4803_v6  ;;  %v2123_v28 = vpop.f32.mrb[73].mxu0 }
 0x446   : > { %v6194_v1 = vpop.f32.mrb[105].mxu1  ;;  %v4807_v16 = vpop.eup %4806  ;;  %3492 = vst [vmem:[%s6104_s18 + $0xb8] sm:$0xff] %v6189_v31  ;;  %4824 = vpow2.f32 %v2437_v18  ;;  %v2439_v57 = vmul.f32 1.442695, %v4805_v53  ;;  %v2124_v5 = vadd.f32 %v6031_v11, %v2123_v28 }
 0x447   : > { %v4153_v59 = vpop.f32.mrb[74].mxu0  ;;  %v6201_v40 = vpop.f32.mrb[106].mxu1  ;;  %3490 = vst [vmem:[%s6104_s18 + $0x98] sm:$0xff] %v2506_v0  ;;  %4826 = vpow2.f32 %v2433_v54  ;;  %v2435_v9 = vmul.f32 1.442695, %v4807_v16  ;;  %v2584_v53 = vpack.c.bf16 %v2506_v0, %v2505_v20  ;;  %v2585_v54 = vpack.c.bf16 %v6189_v31, %v6179_v14  ;;  %v5079_v20 = vld [vmem:[%s5410_s22 + $0xd0] sm:$0xff] }
 0x448   : > { %v4809_v62 = vpop.eup %4808  ;;  %v2126_v45 = vpop.f32.mrb[75].mxu0  ;;  %4828 = vpow2.f32 %v2439_v57  ;;  %v2135_v51 = vadd.f32 %v4153_v59, %v6031_v11  ;;  %v2334_v57 = vadd.f32 %v6080_v55, %v6072_v4 }
 0x449   : > { %v6207_v60 = vpop.f32.mrb[107].mxu1  ;;  %v4811_v38 = vpop.eup %4810  ;;  %v2479_v63 = vmul.f32 %v5076_v3, %v4809_v62  ;;  %v2127_v6 = vadd.f32 %v6031_v11, %v2126_v45  ;;  %4830 = vpow2.f32 %v2435_v9  ;;  %v5078_v62 = vld [vmem:[%s5410_s22 + $0xf0] sm:$0xff]  ;;  %v2326_v9 = vadd.f32 %v6072_v4, %v6086_v37  ;;  %4230 = vmatprep.mubr.bf16.mxu0 %v2584_v53 }
 0x44a   : > { %v4813_v18 = vpop.eup %4812  ;;  %v2477_v61 = vmul.f32 %v5077_v35, %v4811_v38  ;;  %4832 = vtanh.f32 %v2132_v52  ;;  %4231 = vmatmul.mubr.bf16.gmra.mrb[88].mxu0 %v2585_v54 }
 0x44b   : > { %v4815_v28 = vpop.eup %4814  ;;  %v6215_v16 = vadd.f32 %v2479_v63, %v2331_v44  ;;  %v2480_v59 = vmul.f32 %v5078_v62, %v4813_v18  ;;  %4834 = vtanh.f32 %v2124_v5  ;;  %v4156_v55 = vpop.f32.mrb[76].mxu0 }
 0x44c   : > { %v4817_v45 = vpop.eup %4816  ;;  %v2509_v3 = vadd.f32 %v2477_v61, %v2323_v19  ;;  %v2478_v0 = vmul.f32 %v5079_v20, %v4815_v28  ;;  %4836 = vtanh.f32 %v2135_v51  ;;  %v6225_v38 = vpop.f32.mrb[108].mxu1  ;;  %v2148_v51 = vadd.f32 %v4156_v55, %v6031_v11 }
 0x44d   : > { %v4819_v14 = vpop.eup %4818  ;;  %3495 = vst [vmem:[%s6104_s18 + $0xe8] sm:$0xff] %v6215_v16  ;;  %v2512_v31 = vadd.f32 %v2480_v59, %v2334_v57  ;;  %v2445_v44 = vmul.f32 1.442695, %v4817_v45  ;;  %4838 = vtanh.f32 %v2127_v6  ;;  %v2139_v37 = vpop.f32.mrb[77].mxu0  ;;  %v2347_v59 = vadd.f32 %v6112_v58, %v6072_v4 }
 0x44e   : > { %v4821_v52 = vpop.eup %4820  ;;  %3493 = vst [vmem:[%s6104_s18 + $0xc8] sm:$0xff] %v2509_v3  ;;  %v2510_v19 = vadd.f32 %v2478_v0, %v2326_v9  ;;  %v2441_v63 = vmul.f32 1.442695, %v4819_v14  ;;  %v6228_v5 = vpop.f32.mrb[109].mxu1  ;;  %v2140_v57 = vadd.f32 %v6031_v11, %v2139_v37  ;;  %v5080_v0 = vld [vmem:[%s5410_s22 + $0x120] sm:$0xff] }
 0x44f   : > { %v4823_v18 = vpop.eup %4822  ;;  %3496 = vst [vmem:[%s6104_s18 + $0xf8] sm:$0xff] %v2512_v31  ;;  %4840 = vpow2.f32 %v2445_v44  ;;  %v2447_v35 = vmul.f32 1.442695, %v4821_v52  ;;  %v4157_v61 = vpop.f32.mrb[78].mxu0  ;;  %v2587_v55 = vpack.c.bf16 %v2512_v31, %v6215_v16  ;;  %v5081_v37 = vld [vmem:[%s5410_s22 + $0x100] sm:$0xff]  ;;  %v5083_v31 = vld [vmem:[%s5410_s22 + $0x110] sm:$0xff] }
 0x450   : > { %v6232_v53 = vpop.f32.mrb[110].mxu1  ;;  %3494 = vst [vmem:[%s6104_s18 + $0xd8] sm:$0xff] %v2510_v19  ;;  %4842 = vpow2.f32 %v2441_v63  ;;  %v2443_v28 = vmul.f32 1.442695, %v4823_v18  ;;  %v2142_v6 = vpop.f32.mrb[79].mxu0  ;;  %v2151_v45 = vadd.f32 %v4157_v61, %v6031_v11  ;;  %v2586_v44 = vpack.c.bf16 %v2510_v19, %v2509_v3  ;;  %v5082_v61 = vld [vmem:[%s5410_s22 + $0x130] sm:$0xff] }
 0x451   : > { %v6236_v54 = vpop.f32.mrb[111].mxu1  ;;  %v4825_v62 = vpop.eup %4824  ;;  %4844 = vpow2.f32 %v2447_v35  ;;  %v2143_v9 = vadd.f32 %v6031_v11, %v2142_v6  ;;  %v2339_v63 = vadd.f32 %v6072_v4, %v6119_v46  ;;  %v2350_v11 = vadd.f32 %v6125_v7, %v6072_v4 }
 0x452   : > { %v4827_v20 = vpop.eup %4826  ;;  %v2483_v14 = vmul.f32 %v5080_v0, %v4825_v62  ;;  %4846 = vpow2.f32 %v2443_v28  ;;  %4234 = vmatprep.mubr.bf16.mxu0 %v2586_v44  ;;  %v2342_v46 = vadd.f32 %v6072_v4, %v6131_v15 }
 0x453   : > { %v4829_v52 = vpop.eup %4828  ;;  %v2481_v58 = vmul.f32 %v5081_v37, %v4827_v20  ;;  %4848 = vtanh.f32 %v2148_v51  ;;  %4235 = vmatmul.mubr.bf16.gmra.mrb[92].mxu0 %v2587_v55  ;;  %v5084_v55 = vld [vmem:[%s5410_s22 + $0x160] sm:$0xff] }
 0x454   : > { %v4831_v18 = vpop.eup %4830  ;;  %v2515_v35 = vadd.f32 %v2483_v14, %v2347_v59  ;;  %v2484_v6 = vmul.f32 %v5082_v61, %v4829_v52  ;;  %4850 = vtanh.f32 %v2140_v57 }
 0x455   : > { %v4833_v16 = vpop.eup %4832  ;;  %v2513_v3 = vadd.f32 %v2481_v58, %v2339_v63  ;;  %v2482_v19 = vmul.f32 %v5083_v31, %v4831_v18  ;;  %4852 = vtanh.f32 %v2151_v45  ;;  %v2355_v58 = vadd.f32 %v6072_v4, %v6157_v49  ;;  %v5085_v18 = vld [vmem:[%s5410_s22 + $0x140] sm:$0xff]  ;;  %v5087_v49 = vld [vmem:[%s5410_s22 + $0x150] sm:$0xff] }
 0x456   : > { %v4835_v51 = vpop.eup %4834  ;;  %3499 = vst [vmem:[%s6104_s18 + $0x128] sm:$0xff] %v2515_v35  ;;  %v2516_v28 = vadd.f32 %v2484_v6, %v2350_v11  ;;  %v2453_v62 = vmul.f32 1.442695, %v4833_v16  ;;  %4854 = vtanh.f32 %v2143_v9  ;;  %v2363_v9 = vadd.f32 %v6152_v2, %v6072_v4  ;;  %v5086_v2 = vld [vmem:[%s5410_s22 + $0x170] sm:$0xff] }
 0x457   : > { %v4837_v7 = vpop.eup %4836  ;;  %3497 = vst [vmem:[%s6104_s18 + $0x108] sm:$0xff] %v2513_v3  ;;  %v2514_v57 = vadd.f32 %v2482_v19, %v2342_v46  ;;  %v2449_v59 = vmul.f32 1.442695, %v4835_v51  ;;  %v2366_v6 = vadd.f32 %v6161_v48, %v6072_v4  ;;  %v2358_v31 = vadd.f32 %v6072_v4, %v6165_v56 }
 0x458   : > { %v4839_v20 = vpop.eup %4838  ;;  %3500 = vst [vmem:[%s6104_s18 + $0x138] sm:$0xff] %v2516_v28  ;;  %4856 = vpow2.f32 %v2453_v62  ;;  %v2455_v15 = vmul.f32 1.442695, %v4837_v7  ;;  %v2589_v0 = vpack.c.bf16 %v2516_v28, %v2515_v35 }
 0x459   : > { %v4841_v14 = vpop.eup %4840  ;;  %3498 = vst [vmem:[%s6104_s18 + $0x118] sm:$0xff] %v2514_v57  ;;  %4858 = vpow2.f32 %v2449_v59  ;;  %v2451_v45 = vmul.f32 1.442695, %v4839_v20  ;;  %v2588_v44 = vpack.c.bf16 %v2514_v57, %v2513_v3 }
 0x45a   : > { %v4843_v52 = vpop.eup %4842  ;;  %v2487_v63 = vmul.f32 %v5084_v55, %v4841_v14  ;;  %4860 = vpow2.f32 %v2455_v15 }
 0x45b   : > { %v4845_v37 = vpop.eup %4844  ;;  %v2485_v35 = vmul.f32 %v5085_v18, %v4843_v52  ;;  %4862 = vpow2.f32 %v2451_v45  ;;  %4238 = vmatprep.mubr.bf16.mxu0 %v2588_v44  ;;  %v5088_v52 = vld [vmem:[%s5410_s22 + $0x1a0] sm:$0xff] }
 0x45c   : > { %v4847_v11 = vpop.eup %4846  ;;  %v2519_v61 = vadd.f32 %v2487_v63, %v2363_v9  ;;  %v2488_v16 = vmul.f32 %v5086_v2, %v4845_v37  ;;  %4239 = vmatmul.mubr.bf16.gmra.mrb[96].mxu0 %v2589_v0  ;;  %v2379_v0 = vadd.f32 %v6191_v50, %v6072_v4  ;;  %v2371_v63 = vadd.f32 %v6072_v4, %v6194_v1  ;;  %v5089_v37 = vld [vmem:[%s5410_s22 + $0x180] sm:$0xff] }
 0x45d   : > { %v4849_v3 = vpop.eup %4848  ;;  %v2517_v46 = vadd.f32 %v2485_v35, %v2355_v58  ;;  %v2486_v19 = vmul.f32 %v5087_v49, %v4847_v11  ;;  %v2382_v50 = vadd.f32 %v6201_v40, %v6072_v4  ;;  %v5090_v11 = vld [vmem:[%s5410_s22 + $0x1b0] sm:$0xff]  ;;  %v2374_v2 = vadd.f32 %v6072_v4, %v6207_v60  ;;  %v5092_v60 = vld [vmem:[%s5410_s22 + $0x1e0] sm:$0xff] }
 0x45e   : > { %v4851_v51 = vpop.eup %4850  ;;  %3503 = vst [vmem:[%s6104_s18 + $0x168] sm:$0xff] %v2519_v61  ;;  %v2520_v28 = vadd.f32 %v2488_v16, %v2366_v6  ;;  %v2461_v62 = vmul.f32 1.442695, %v4849_v3  ;;  %v5091_v16 = vld [vmem:[%s5410_s22 + $0x190] sm:$0xff] }
 0x45f   : > { %v4853_v7 = vpop.eup %4852  ;;  %3501 = vst [vmem:[%s6104_s18 + $0x148] sm:$0xff] %v2517_v46  ;;  %v2518_v48 = vadd.f32 %v2486_v19, %v2358_v31  ;;  %v2457_v57 = vmul.f32 1.442695, %v4851_v51  ;;  %v2395_v51 = vadd.f32 %v6225_v38, %v6072_v4 }
 0x460   : > { %v4855_v59 = vpop.eup %4854  ;;  %3504 = vst [vmem:[%s6104_s18 + $0x178] sm:$0xff] %v2520_v28  ;;  %4864 = vpow2.f32 %v2461_v62  ;;  %v2463_v20 = vmul.f32 1.442695, %v4853_v7  ;;  %v2591_v15 = vpack.c.bf16 %v2520_v28, %v2519_v61  ;;  %v2387_v7 = vadd.f32 %v6072_v4, %v6228_v5 }
 0x461   : > { %3502 = vst [vmem:[%s6104_s18 + $0x158] sm:$0xff] %v2518_v48  ;;  %4866 = vpow2.f32 %v2457_v57  ;;  %v2459_v56 = vmul.f32 1.442695, %v4855_v59  ;;  %v2590_v14 = vpack.c.bf16 %v2518_v48, %v2517_v46  ;;  %v5093_v48 = vld [vmem:[%s5410_s22 + $0x1c0] sm:$0xff] }
 0x462   : > { %v4857_v45 = vpop.eup %4856  ;;  %4868 = vpow2.f32 %v2463_v20 }
 0x463   : > { %v4859_v44 = vpop.eup %4858  ;;  %v2491_v9 = vmul.f32 %v5088_v52, %v4857_v45  ;;  %4870 = vpow2.f32 %v2459_v56  ;;  %4242 = vmatprep.mubr.bf16.mxu0 %v2590_v14  ;;  %v5094_v56 = vld [vmem:[%s5410_s22 + $0x1f0] sm:$0xff]  ;;  %v2390_v45 = vadd.f32 %v6072_v4, %v6236_v54 }
 0x464   : > { %v4861_v55 = vpop.eup %4860  ;;  %v2489_v58 = vmul.f32 %v5089_v37, %v4859_v44  ;;  %4243 = vmatmul.mubr.bf16.gmra.mrb[100].mxu0 %v2591_v15  ;;  %v2398_v15 = vadd.f32 %v6232_v53, %v6072_v4  ;;  %v5095_v44 = vld [vmem:[%s5410_s22 + $0x1d0] sm:$0xff]  ;;  %v4481_v53 = vld [vmem:[%s6665_s17 + $0x18] sm:$0xff]   ;;  %v4483_v4 = vld [vmem:[%s6665_s17 + $0x20] sm:$0xff]   ;;  %s3528_s22 = sshll.u32 %s6104_s18, 4  ;;  %s6601_s22 = int_to_ptr.vmem [resolvable:$true] %s3528_s22 }
 0x465   : > { %v4863_v18 = vpop.eup %4862  ;;  %v2523_v35 = vadd.f32 %v2491_v9, %v2379_v0  ;;  %v2492_v61 = vmul.f32 %v5090_v11, %v4861_v55  ;;  %4308 = vmatprep.subr.bf16.mxu0 %v4481_v53  ;;  %v4482_v54 = vld [vmem:[%s6663_s15 + $0x30] sm:$0xff]   ;;  %p5133_p8 = scmp.lt.s32.totalorder %s6601_s22, %s5131_s4 }
 0x466   : > { %v2521_v6 = vadd.f32 %v2489_v58, %v2371_v63  ;;  %v2490_v3 = vmul.f32 %v5091_v16, %v4863_v18  ;;  %4309 = vmatpush3.bf16.msra.mxu0 %v4481_v53  ;;  %v4484_v63 = vld [vmem:[%s6665_s17 + $0x28] sm:$0xff]   ;;  %4266 = vmatprep.subr.bf16.mxu1 %v4482_v54  ;;  %v4486_v37 = vld [vmem:[%s6665_s17 + $0x30] sm:$0xff]   ;;  %v4485_v58 = vld [vmem:[%s6663_s15 + $0x38] sm:$0xff]  }
 0x467   : > { %3507 = vst [vmem:[%s6104_s18 + $0x1a8] sm:$0xff] %v2523_v35  ;;  %v2524_v1 = vadd.f32 %v2492_v61, %v2382_v50  ;;  %4310 = vmatprep.subr.bf16.mxu0 %v4483_v4  ;;  %4267 = vmatpush3.bf16.msra.mxu1 %v4482_v54  ;;  %v4487_v18 = vld [vmem:[%s6665_s17 + $0x38] sm:$0xff]  }
 0x468   : > { %3505 = vst [vmem:[%s6104_s18 + $0x188] sm:$0xff] %v2521_v6  ;;  %v2522_v46 = vadd.f32 %v2490_v3, %v2374_v2  ;;  %4268 = vmatprep.subr.bf16.mxu1 %v4485_v58 }
 0x469   : > { %3508 = vst [vmem:[%s6104_s18 + $0x1b8] sm:$0xff] %v2524_v1  ;;  %v2593_v31 = vpack.c.bf16 %v2524_v1, %v2523_v35  ;;  %v6329_v35 = vld [vmem:[%s6662_s14] ss:$0 sm:$0xff] }
 0x46a   : > { %v4865_v49 = vpop.eup %4864  ;;  %3506 = vst [vmem:[%s6104_s18 + $0x198] sm:$0xff] %v2522_v46  ;;  %v2592_v40 = vpack.c.bf16 %v2522_v46, %v2521_v6  ;;  %4311 = vmatpush3.bf16.msra.mxu0 %v4483_v4 }
 0x46b   : > { %v4867_v19 = vpop.eup %4866  ;;  %v2495_v28 = vmul.f32 %v5092_v60, %v4865_v49  ;;  %4312 = vmatprep.subr.bf16.mxu0 %v4484_v63  ;;  %4269 = vmatpush3.bf16.msra.mxu1 %v4485_v58 }
 0x46c   : > { %v4869_v62 = vpop.eup %4868  ;;  %v2493_v57 = vmul.f32 %v5093_v48, %v4867_v19  ;;  %4246 = vmatprep.mubr.bf16.mxu0 %v2592_v40 }
 0x46d   : > { %v4871_v59 = vpop.eup %4870  ;;  %v2527_v20 = vadd.f32 %v2495_v28, %v2395_v51  ;;  %v2496_v38 = vmul.f32 %v5094_v56, %v4869_v62  ;;  %4247 = vmatmul.mubr.bf16.gmra.mrb[104].mxu0 %v2593_v31 }
 0x46e   : > { %v2525_v14 = vadd.f32 %v2493_v57, %v2387_v7  ;;  %v2494_v0 = vmul.f32 %v5095_v44, %v4871_v59  ;;  %4313 = vmatpush3.bf16.msra.mxu0 %v4484_v63 }
 0x46f   : > { %3511 = vst [vmem:[%s6104_s18 + $0x1e8] sm:$0xff] %v2527_v20  ;;  %v2528_v5 = vadd.f32 %v2496_v38, %v2398_v15  ;;  %4314 = vmatprep.subr.bf16.mxu0 %v4486_v37 }
 0x470   : > { %3509 = vst [vmem:[%s6104_s18 + $0x1c8] sm:$0xff] %v2525_v14  ;;  %v2526_v52 = vadd.f32 %v2494_v0, %v2390_v45 }
 0x471   : > { %3512 = vst [vmem:[%s6104_s18 + $0x1f8] sm:$0xff] %v2528_v5  ;;  %v2595_v9 = vpack.c.bf16 %v2528_v5, %v2527_v20 }
 0x472   : > { %3510 = vst [vmem:[%s6104_s18 + $0x1d8] sm:$0xff] %v2526_v52  ;;  %v2594_v55 = vpack.c.bf16 %v2526_v52, %v2525_v14  ;;  %4315 = vmatpush3.bf16.msra.mxu0 %v4486_v37 }
 0x473   : > { %4316 = vmatprep.subr.bf16.mxu0 %v4487_v18 }
 0x474   : > { %4250 = vmatprep.mubr.bf16.mxu0 %v2594_v55 }
 0x475   : > { %4251 = vmatmul.mubr.bf16.gmra.mrb[108].mxu0 %v2595_v9 }
 0x476   : > { %4317 = vmatpush3.bf16.msra.mxu0 %v4487_v18 }
 0x509   : > { %v4224_v50 = vpop.f32.mrb[80].mxu0 }
 0x50a   : > { %v2693_v11 = vadd.f32 %v4224_v50, %v6329_v35  ;;  %v2684_v61 = vpop.f32.mrb[81].mxu0 }
 0x50b   : > { %v2685_v6 = vadd.f32 %v6329_v35, %v2684_v61  ;;  %v4225_v2 = vpop.f32.mrb[82].mxu0 }
 0x50c   : > { %4872 = vtanh.f32 %v2693_v11  ;;  %v2696_v16 = vadd.f32 %v4225_v2, %v6329_v35  ;;  %v2687_v3 = vpop.f32.mrb[83].mxu0 }
 0x50d   : > { %4874 = vtanh.f32 %v2685_v6  ;;  %v2688_v1 = vadd.f32 %v6329_v35, %v2687_v3 }
 0x50e   : > { %4876 = vtanh.f32 %v2696_v16 }
 0x50f   : > { %4878 = vtanh.f32 %v2688_v1 }
 0x513   : > { %v4228_v46 = vpop.f32.mrb[84].mxu0 }
 0x514   : > { %v2709_v31 = vadd.f32 %v4228_v46, %v6329_v35  ;;  %v2700_v49 = vpop.f32.mrb[85].mxu0 }
 0x515   : > { %v2701_v40 = vadd.f32 %v6329_v35, %v2700_v49  ;;  %v4229_v19 = vpop.f32.mrb[86].mxu0 }
 0x516   : > { %4880 = vtanh.f32 %v2709_v31  ;;  %v2712_v51 = vadd.f32 %v4229_v19, %v6329_v35  ;;  %v2703_v60 = vpop.f32.mrb[87].mxu0  ;;  %v4873_v62 = vpop.eup %4872 }
 0x517   : > { %4882 = vtanh.f32 %v2701_v40  ;;  %v2704_v28 = vadd.f32 %v6329_v35, %v2703_v60  ;;  %v4875_v7 = vpop.eup %4874 }
 0x518   : > { %4884 = vtanh.f32 %v2712_v51  ;;  %v4877_v48 = vpop.eup %4876 }
 0x519   : > { %4886 = vtanh.f32 %v2704_v28  ;;  %v4879_v57 = vpop.eup %4878  ;;  %v2844_v20 = vpack.c.bf16 %v4877_v48, %v4873_v62 }
 0x51a   : > { %v2843_v38 = vpack.c.bf16 %v4879_v57, %v4875_v7 }
 0x51c   : > { %4270 = vmatprep.mubr.bf16.mxu1 %v2843_v38  ;;  %4318 = vmatprep.mubr.bf16.mxu0 %v2843_v38 }
 0x51d   : > { %v4232_v59 = vpop.f32.mrb[88].mxu0  ;;  %4271 = vmatmul.mubr.bf16.vlgmr.msra.gmra.mrb[112].mxu1 %v2844_v20  ;;  %4319 = vmatmul.mubr.bf16.vlgmr.msra.gmra.mrb[112].mxu0 %v2844_v20 }
 0x51e   : > { %v2725_v15 = vadd.f32 %v4232_v59, %v6329_v35  ;;  %v2716_v56 = vpop.f32.mrb[89].mxu0 }
 0x51f   : > { %v2717_v14 = vadd.f32 %v6329_v35, %v2716_v56  ;;  %v4233_v45 = vpop.f32.mrb[90].mxu0 }
 0x520   : > { %4888 = vtanh.f32 %v2725_v15  ;;  %v2728_v44 = vadd.f32 %v4233_v45, %v6329_v35  ;;  %v2719_v0 = vpop.f32.mrb[91].mxu0  ;;  %v4881_v52 = vpop.eup %4880 }
 0x521   : > { %4890 = vtanh.f32 %v2717_v14  ;;  %v2720_v5 = vadd.f32 %v6329_v35, %v2719_v0  ;;  %v4883_v9 = vpop.eup %4882 }
 0x522   : > { %4892 = vtanh.f32 %v2728_v44  ;;  %v4885_v55 = vpop.eup %4884 }
 0x523   : > { %4894 = vtanh.f32 %v2720_v5  ;;  %v4887_v53 = vpop.eup %4886  ;;  %v2846_v54 = vpack.c.bf16 %v4885_v55, %v4881_v52 }
 0x524   : > { %v2845_v58 = vpack.c.bf16 %v4887_v53, %v4883_v9 }
 0x526   : > { %v4236_v4 = vpop.f32.mrb[92].mxu0  ;;  %4274 = vmatprep.mubr.bf16.mxu1 %v2845_v58  ;;  %4322 = vmatprep.mubr.bf16.mxu0 %v2845_v58 }
 0x527   : > { %v2741_v63 = vadd.f32 %v4236_v4, %v6329_v35  ;;  %v2732_v37 = vpop.f32.mrb[93].mxu0  ;;  %4275 = vmatmul.mubr.bf16.gmra.mrb[116].mxu1 %v2846_v54  ;;  %4323 = vmatmul.mubr.bf16.gmra.mrb[116].mxu0 %v2846_v54 }
 0x528   : > { %v2733_v18 = vadd.f32 %v6329_v35, %v2732_v37  ;;  %v4237_v50 = vpop.f32.mrb[94].mxu0 }
 0x529   : > { %4896 = vtanh.f32 %v2741_v63  ;;  %v2744_v11 = vadd.f32 %v4237_v50, %v6329_v35  ;;  %v2735_v61 = vpop.f32.mrb[95].mxu0 }
 0x52a   : > { %4898 = vtanh.f32 %v2733_v18  ;;  %v2736_v6 = vadd.f32 %v6329_v35, %v2735_v61  ;;  %v4889_v2 = vpop.eup %4888 }
 0x52b   : > { %4900 = vtanh.f32 %v2744_v11  ;;  %v4891_v16 = vpop.eup %4890 }
 0x52c   : > { %4902 = vtanh.f32 %v2736_v6  ;;  %v4893_v3 = vpop.eup %4892 }
 0x52d   : > { %v4895_v1 = vpop.eup %4894  ;;  %v2848_v31 = vpack.c.bf16 %v4893_v3, %v4889_v2 }
 0x52e   : > { %v2847_v19 = vpack.c.bf16 %v4895_v1, %v4891_v16 }
 0x52f   : > { %v4240_v46 = vpop.f32.mrb[96].mxu0 }
 0x530   : > { %v2757_v49 = vadd.f32 %v4240_v46, %v6329_v35  ;;  %v2748_v40 = vpop.f32.mrb[97].mxu0  ;;  %4278 = vmatprep.mubr.bf16.mxu1 %v2847_v19  ;;  %4326 = vmatprep.mubr.bf16.mxu0 %v2847_v19 }
 0x531   : > { %v2749_v51 = vadd.f32 %v6329_v35, %v2748_v40  ;;  %v4241_v60 = vpop.f32.mrb[98].mxu0  ;;  %4279 = vmatmul.mubr.bf16.gmra.mrb[120].mxu1 %v2848_v31  ;;  %4327 = vmatmul.mubr.bf16.gmra.mrb[120].mxu0 %v2848_v31 }
 0x532   : > { %4904 = vtanh.f32 %v2757_v49  ;;  %v2760_v28 = vadd.f32 %v4241_v60, %v6329_v35  ;;  %v2751_v62 = vpop.f32.mrb[99].mxu0 }
 0x533   : > { %4906 = vtanh.f32 %v2749_v51  ;;  %v2752_v7 = vadd.f32 %v6329_v35, %v2751_v62  ;;  %v4897_v48 = vpop.eup %4896 }
 0x534   : > { %4908 = vtanh.f32 %v2760_v28  ;;  %v4899_v57 = vpop.eup %4898 }
 0x535   : > { %4910 = vtanh.f32 %v2752_v7  ;;  %v4901_v59 = vpop.eup %4900 }
 0x536   : > { %v4903_v20 = vpop.eup %4902  ;;  %v2850_v56 = vpack.c.bf16 %v4901_v59, %v4897_v48 }
 0x537   : > { %v4244_v15 = vpop.f32.mrb[100].mxu0  ;;  %v2849_v45 = vpack.c.bf16 %v4903_v20, %v4899_v57 }
 0x538   : > { %v2773_v38 = vadd.f32 %v4244_v15, %v6329_v35  ;;  %v2764_v14 = vpop.f32.mrb[101].mxu0 }
 0x539   : > { %v2765_v44 = vadd.f32 %v6329_v35, %v2764_v14  ;;  %v4245_v0 = vpop.f32.mrb[102].mxu0  ;;  %4282 = vmatprep.mubr.bf16.mxu1 %v2849_v45  ;;  %4330 = vmatprep.mubr.bf16.mxu0 %v2849_v45 }
 0x53a   : > { %4912 = vtanh.f32 %v2773_v38  ;;  %v2776_v5 = vadd.f32 %v4245_v0, %v6329_v35  ;;  %v2767_v52 = vpop.f32.mrb[103].mxu0  ;;  %4283 = vmatmul.mubr.bf16.gmra.mrb[124].mxu1 %v2850_v56  ;;  %4331 = vmatmul.mubr.bf16.gmra.mrb[124].mxu0 %v2850_v56 }
 0x53b   : > { %4914 = vtanh.f32 %v2765_v44  ;;  %v2768_v9 = vadd.f32 %v6329_v35, %v2767_v52 }
 0x53c   : > { %v4905_v55 = vpop.eup %4904  ;;  %4916 = vtanh.f32 %v2776_v5 }
 0x53d   : > { %v4907_v53 = vpop.eup %4906  ;;  %4918 = vtanh.f32 %v2768_v9  ;;  %v6366_v9 = vld [vmem:[%s6664_s16] ss:$0 sm:$0xff] }
 0x53e   : > { %v4909_v4 = vpop.eup %4908 }
 0x53f   : > { %v4911_v54 = vpop.eup %4910  ;;  %v2852_v37 = vpack.c.bf16 %v4909_v4, %v4905_v55 }
 0x540   : > { %v4248_v63 = vpop.f32.mrb[104].mxu0  ;;  %v2851_v50 = vpack.c.bf16 %v4911_v54, %v4907_v53 }
 0x541   : > { %v2789_v58 = vadd.f32 %v4248_v63, %v6329_v35  ;;  %v2780_v18 = vpop.f32.mrb[105].mxu0 }
 0x542   : > { %v2781_v11 = vadd.f32 %v6329_v35, %v2780_v18  ;;  %v4249_v61 = vpop.f32.mrb[106].mxu0  ;;  %4286 = vmatprep.mubr.bf16.mxu1 %v2851_v50  ;;  %4334 = vmatprep.mubr.bf16.mxu0 %v2851_v50 }
 0x543   : > { %4920 = vtanh.f32 %v2789_v58  ;;  %v2792_v6 = vadd.f32 %v4249_v61, %v6329_v35  ;;  %v2783_v2 = vpop.f32.mrb[107].mxu0  ;;  %4287 = vmatmul.mubr.bf16.gmra.mrb[128].mxu1 %v2852_v37  ;;  %4335 = vmatmul.mubr.bf16.gmra.mrb[128].mxu0 %v2852_v37 }
 0x544   : > { %4922 = vtanh.f32 %v2781_v11  ;;  %v2784_v16 = vadd.f32 %v6329_v35, %v2783_v2  ;;  %v4913_v3 = vpop.eup %4912 }
 0x545   : > { %4924 = vtanh.f32 %v2792_v6  ;;  %v4915_v1 = vpop.eup %4914 }
 0x546   : > { %4926 = vtanh.f32 %v2784_v16  ;;  %v4917_v46 = vpop.eup %4916 }
 0x547   : > { %v4919_v31 = vpop.eup %4918  ;;  %v2854_v40 = vpack.c.bf16 %v4917_v46, %v4913_v3 }
 0x548   : > { %v4252_v49 = vpop.f32.mrb[108].mxu0  ;;  %v2853_v60 = vpack.c.bf16 %v4919_v31, %v4915_v1 }
 0x549   : > { %v2805_v19 = vadd.f32 %v4252_v49, %v6329_v35  ;;  %v2796_v51 = vpop.f32.mrb[109].mxu0 }
 0x54a   : > { %v2797_v28 = vadd.f32 %v6329_v35, %v2796_v51  ;;  %v4253_v62 = vpop.f32.mrb[110].mxu0  ;;  %4290 = vmatprep.mubr.bf16.mxu1 %v2853_v60  ;;  %4338 = vmatprep.mubr.bf16.mxu0 %v2853_v60 }
 0x54b   : > { %4928 = vtanh.f32 %v2805_v19  ;;  %v2808_v7 = vadd.f32 %v4253_v62, %v6329_v35  ;;  %v2799_v48 = vpop.f32.mrb[111].mxu0  ;;  %4291 = vmatmul.mubr.bf16.gmra.mrb[132].mxu1 %v2854_v40  ;;  %4339 = vmatmul.mubr.bf16.gmra.mrb[132].mxu0 %v2854_v40 }
 0x54c   : > { %4930 = vtanh.f32 %v2797_v28  ;;  %v2800_v57 = vadd.f32 %v6329_v35, %v2799_v48 }
 0x54d   : > { %v4921_v59 = vpop.eup %4920  ;;  %4932 = vtanh.f32 %v2808_v7 }
 0x54e   : > { %v4923_v20 = vpop.eup %4922  ;;  %4934 = vtanh.f32 %v2800_v57 }
 0x54f   : > { %v4925_v15 = vpop.eup %4924 }
 0x550   : > { %v4927_v56 = vpop.eup %4926  ;;  %v2856_v38 = vpack.c.bf16 %v4925_v15, %v4921_v59 }
 0x551   : > { %v2855_v14 = vpack.c.bf16 %v4927_v56, %v4923_v20 }
 0x553   : > { %4294 = vmatprep.mubr.bf16.mxu1 %v2855_v14  ;;  %4342 = vmatprep.mubr.bf16.mxu0 %v2855_v14 }
 0x554   : > { %4295 = vmatmul.mubr.bf16.gmra.mrb[136].mxu1 %v2856_v38  ;;  %4343 = vmatmul.mubr.bf16.gmra.mrb[136].mxu0 %v2856_v38 }
 0x555   : > { %v4929_v45 = vpop.eup %4928 }
 0x556   : > { %v4931_v44 = vpop.eup %4930 }
 0x557   : > { %v4933_v0 = vpop.eup %4932 }
 0x558   : > { %v4935_v5 = vpop.eup %4934  ;;  %v2858_v52 = vpack.c.bf16 %v4933_v0, %v4929_v45 }
 0x559   : > { %v2857_v35 = vpack.c.bf16 %v4935_v5, %v4931_v44 }
 0x55b   : > { %4298 = vmatprep.mubr.bf16.mxu1 %v2857_v35  ;;  %4346 = vmatprep.mubr.bf16.mxu0 %v2857_v35 }
 0x55c   : > { %4299 = vmatmul.mubr.bf16.gmra.mrb[140].mxu1 %v2858_v52  ;;  %4347 = vmatmul.mubr.bf16.gmra.mrb[140].mxu0 %v2858_v52 }
 0x5f0   : > { %v4272_v55 = vpop.f32.mrb[112].mxu1  ;;  %v6368_v53 = vpop.f32.mrb[112].mxu0 }
 0x5f1   : > { %v2956_v4 = vadd.f32 %v4272_v55, %v6366_v9  ;;  %v2947_v54 = vpop.f32.mrb[113].mxu1  ;;  %v6371_v63 = vpop.f32.mrb[113].mxu0 }
 0x5f2   : > { %v2948_v37 = vadd.f32 %v6366_v9, %v2947_v54  ;;  %v4273_v58 = vpop.f32.mrb[114].mxu1  ;;  %v6374_v18 = vpop.f32.mrb[114].mxu0 }
 0x5f3   : > { %4936 = vtanh.f32 %v2956_v4  ;;  %v2959_v50 = vadd.f32 %v4273_v58, %v6366_v9  ;;  %v2950_v11 = vpop.f32.mrb[115].mxu1  ;;  %v6377_v61 = vpop.f32.mrb[115].mxu0 }
 0x5f4   : > { %4938 = vtanh.f32 %v2948_v37  ;;  %v2951_v6 = vadd.f32 %v6366_v9, %v2950_v11 }
 0x5f5   : > { %4940 = vtanh.f32 %v2959_v50 }
 0x5f6   : > { %4942 = vtanh.f32 %v2951_v6 }
 0x5fa   : > { %v4276_v2 = vpop.f32.mrb[116].mxu1  ;;  %v6380_v16 = vpop.f32.mrb[116].mxu0 }
 0x5fb   : > { %v2972_v3 = vadd.f32 %v4276_v2, %v6366_v9  ;;  %v2963_v1 = vpop.f32.mrb[117].mxu1  ;;  %v6383_v46 = vpop.f32.mrb[117].mxu0 }
 0x5fc   : > { %v2964_v31 = vadd.f32 %v6366_v9, %v2963_v1  ;;  %v4277_v49 = vpop.f32.mrb[118].mxu1  ;;  %v6386_v40 = vpop.f32.mrb[118].mxu0  ;;  %v6407_v1 = vld [vmem:[%s6727_s2] ss:$0 sm:$0xff]  ;;  %s5126_s2 = scalar_lea.vmem %s6601_s22, 8192 }
 0x5fd   : > { %4944 = vtanh.f32 %v2972_v3  ;;  %v2975_v19 = vadd.f32 %v4277_v49, %v6366_v9  ;;  %v2966_v51 = vpop.f32.mrb[119].mxu1  ;;  %v6389_v60 = vpop.f32.mrb[119].mxu0  ;;  %p5127_p6 = scmp.ne.s32.totalorder %s6601_s22, %s5126_s2  ;;  %p5134_p10 = scmp.lt.s32.totalorder %s5132_s1, %s5126_s2 }
 0x5fe   : > { %4946 = vtanh.f32 %v2964_v31  ;;  %v2967_v28 = vadd.f32 %v6366_v9, %v2966_v51  ;;  %v4937_v62 = vpop.eup %4936 }
 0x5ff   : > { %4948 = vtanh.f32 %v2975_v19  ;;  %v4939_v7 = vpop.eup %4938  ;;  %v3325_v48 = vmul.f32 1.442695, %v4937_v62  ;;  %p5128_p12 = pnand %p5127_p6, %p6740_p11  ;;  %p5135_p0 = por %p5134_p10, %p5133_p8 }
 0x600   : > { %4950 = vtanh.f32 %v2967_v28  ;;  %v4941_v57 = vpop.eup %4940  ;;  %v3321_v59 = vmul.f32 1.442695, %v4939_v7 }
 0x601   : > { %v4943_v20 = vpop.eup %4942  ;;  %4952 = vpow2.f32 %v3325_v48  ;;  %v3327_v15 = vmul.f32 1.442695, %v4941_v57  ;;  %p5129_p13 = pneg %p5128_p12 }
 0x602   : > { %4954 = vpow2.f32 %v3321_v59  ;;  %v3323_v14 = vmul.f32 1.442695, %v4943_v20 }
 0x603   : > { %4956 = vpow2.f32 %v3327_v15  ;;  %p5136_p2 = pnand %p5135_p0, %p5129_p13 }
 0x604   : > { %v4280_v56 = vpop.f32.mrb[120].mxu1  ;;  %v6392_v38 = vpop.f32.mrb[120].mxu0  ;;  %4958 = vpow2.f32 %v3323_v14 }
 0x605   : > { %v2988_v45 = vadd.f32 %v4280_v56, %v6366_v9  ;;  %v2979_v44 = vpop.f32.mrb[121].mxu1  ;;  %v6395_v0 = vpop.f32.mrb[121].mxu0  ;;  %v3203_v56 = vadd.f32 %v6368_v53, %v6407_v1 }
 0x606   : > { %v2980_v5 = vadd.f32 %v6366_v9, %v2979_v44  ;;  %v4281_v52 = vpop.f32.mrb[122].mxu1  ;;  %v6398_v35 = vpop.f32.mrb[122].mxu0 }
 0x607   : > { %v2991_v55 = vadd.f32 %v4281_v52, %v6366_v9  ;;  %v2982_v4 = vpop.f32.mrb[123].mxu1  ;;  %v6401_v54 = vpop.f32.mrb[123].mxu0  ;;  %4960 = vtanh.f32 %v2988_v45 }
 0x608   : > { %v2983_v37 = vadd.f32 %v6366_v9, %v2982_v4  ;;  %v4945_v58 = vpop.eup %4944  ;;  %4962 = vtanh.f32 %v2980_v5 }
 0x609   : > { %v4947_v50 = vpop.eup %4946  ;;  %v3333_v11 = vmul.f32 1.442695, %v4945_v58  ;;  %4964 = vtanh.f32 %v2991_v55  ;;  %v3195_v55 = vadd.f32 %v6407_v1, %v6371_v63  ;;  %v3198_v63 = vadd.f32 %v6407_v1, %v6377_v61 }
 0x60a   : > { %v4949_v6 = vpop.eup %4948  ;;  %v3329_v2 = vmul.f32 1.442695, %v4947_v50  ;;  %4966 = vtanh.f32 %v2983_v37 }
 0x60b   : > { %v4951_v3 = vpop.eup %4950  ;;  %4968 = vpow2.f32 %v3333_v11  ;;  %v3335_v31 = vmul.f32 1.442695, %v4949_v6 }
 0x60c   : > { %4970 = vpow2.f32 %v3329_v2  ;;  %v3331_v51 = vmul.f32 1.442695, %v4951_v3  ;;  %v4953_v48 = vpop.eup %4952 }
 0x60d   : > { %v4284_v49 = vpop.f32.mrb[124].mxu1  ;;  %v6409_v19 = vpop.f32.mrb[124].mxu0  ;;  %4972 = vpow2.f32 %v3335_v31  ;;  %v3387_v14 = vmul.f32 %v4953_v48, %v5683_v33  ;;  %v3206_v33 = vadd.f32 %v6374_v18, %v6407_v1 }
 0x60e   : > { %v3004_v28 = vadd.f32 %v4284_v49, %v6366_v9  ;;  %v2995_v62 = vpop.f32.mrb[125].mxu1  ;;  %v6412_v7 = vpop.f32.mrb[125].mxu0  ;;  %4974 = vpow2.f32 %v3331_v51 }
 0x60f   : > { %v2996_v57 = vadd.f32 %v6366_v9, %v2995_v62  ;;  %v4285_v59 = vpop.f32.mrb[126].mxu1  ;;  %v6415_v20 = vpop.f32.mrb[126].mxu0  ;;  %v3419_v53 = vadd.f32 %v3387_v14, %v3203_v56 }
 0x610   : > { %v4955_v15 = vpop.eup %4954  ;;  %v3007_v45 = vadd.f32 %v4285_v59, %v6366_v9  ;;  %v2998_v44 = vpop.f32.mrb[127].mxu1  ;;  %4976 = vtanh.f32 %v3004_v28 }
 0x611   : > { %v6421_v5 = vpop.f32.mrb[127].mxu0  ;;  %v4957_v52 = vpop.eup %4956  ;;  %v3385_v4 = vmul.f32 %v4955_v15, %v5687_v36  ;;  %v2999_v37 = vadd.f32 %v6366_v9, %v2998_v44  ;;  %4978 = vtanh.f32 %v2996_v57  ;;  %3451 = vst [vmem:[%s6104_s18 + $0x20] sm:$0xff] %v3419_v53 }
 0x612   : > { %v4959_v58 = vpop.eup %4958  ;;  %v3388_v50 = vmul.f32 %v4957_v52, %v5691_v39  ;;  %4980 = vtanh.f32 %v3007_v45  ;;  %v3219_v52 = vadd.f32 %v6380_v16, %v6407_v1 }
 0x613   : > { %v4961_v11 = vpop.eup %4960  ;;  %v3417_v6 = vadd.f32 %v3385_v4, %v3195_v55  ;;  %v3386_v36 = vmul.f32 %v4959_v58, %v5693_v43  ;;  %4982 = vtanh.f32 %v2999_v37 }
 0x614   : > { %v4963_v2 = vpop.eup %4962  ;;  %v3420_v3 = vadd.f32 %v3388_v50, %v3206_v33  ;;  %v3341_v31 = vmul.f32 1.442695, %v4961_v11  ;;  %v3211_v33 = vadd.f32 %v6407_v1, %v6383_v46 }
 0x615   : > { %v4965_v49 = vpop.eup %4964  ;;  %3449 = vst [vmem:[%s6104_s18] sm:$0xff] %v3417_v6  ;;  %v3418_v18 = vadd.f32 %v3386_v36, %v3198_v63  ;;  %v3337_v39 = vmul.f32 1.442695, %v4963_v2 }
 0x616   : > { %v4288_v51 = vpop.f32.mrb[128].mxu1  ;;  %v6435_v28 = vpop.f32.mrb[128].mxu0  ;;  %3452 = vst [vmem:[%s6104_s18 + $0x30] sm:$0xff] %v3420_v3  ;;  %4984 = vpow2.f32 %v3341_v31  ;;  %v3343_v61 = vmul.f32 1.442695, %v4965_v49  ;;  %v3214_v3 = vadd.f32 %v6407_v1, %v6389_v60 }
 0x617   : > { %v4967_v62 = vpop.eup %4966  ;;  %v3020_v43 = vadd.f32 %v4288_v51, %v6366_v9  ;;  %v3011_v48 = vpop.f32.mrb[129].mxu1  ;;  %3450 = vst [vmem:[%s6104_s18 + $0x10] sm:$0xff] %v3418_v18  ;;  %4986 = vpow2.f32 %v3337_v39 }
 0x618   : > { %v6439_v57 = vpop.f32.mrb[129].mxu0  ;;  %v4969_v59 = vpop.eup %4968  ;;  %v3339_v15 = vmul.f32 1.442695, %v4967_v62  ;;  %v3012_v56 = vadd.f32 %v6366_v9, %v3011_v48  ;;  %4988 = vpow2.f32 %v3343_v61 }
 0x619   : > { %v4289_v14 = vpop.f32.mrb[130].mxu1  ;;  %v6443_v45 = vpop.f32.mrb[130].mxu0  ;;  %v3391_v55 = vmul.f32 %v4969_v59, %v5717_v8  ;;  %v3222_v8 = vadd.f32 %v6386_v40, %v6407_v1 }
 0x61a   : > { %v4971_v44 = vpop.eup %4970  ;;  %v3023_v4 = vadd.f32 %v4289_v14, %v6366_v9  ;;  %v3014_v37 = vpop.f32.mrb[131].mxu1  ;;  %4990 = vpow2.f32 %v3339_v15 }
 0x61b   : > { %v6449_v58 = vpop.f32.mrb[131].mxu0  ;;  %v4973_v53 = vpop.eup %4972  ;;  %v3389_v50 = vmul.f32 %v4971_v44, %v5721_v22  ;;  %v3015_v11 = vadd.f32 %v6366_v9, %v3014_v37  ;;  %v3423_v16 = vadd.f32 %v3391_v55, %v3219_v52  ;;  %4992 = vtanh.f32 %v3020_v43 }
 0x61c   : > { %v4975_v6 = vpop.eup %4974  ;;  %v3392_v63 = vmul.f32 %v4973_v53, %v5727_v30  ;;  %4994 = vtanh.f32 %v3012_v56  ;;  %v3235_v37 = vadd.f32 %v6392_v38, %v6407_v1 }
 0x61d   : > { %v4977_v36 = vpop.eup %4976  ;;  %v3421_v2 = vadd.f32 %v3389_v50, %v3211_v33  ;;  %v3390_v22 = vmul.f32 %v4975_v6, %v5732_v34  ;;  %3455 = vst [vmem:[%s6104_s18 + $0x60] sm:$0xff] %v3423_v16  ;;  %4996 = vtanh.f32 %v3023_v4 }
 0x61e   : > { %v4979_v46 = vpop.eup %4978  ;;  %v3424_v31 = vadd.f32 %v3392_v63, %v3222_v8  ;;  %v3349_v49 = vmul.f32 1.442695, %v4977_v36  ;;  %4998 = vtanh.f32 %v3015_v11  ;;  %v4292_v39 = vpop.f32.mrb[132].mxu1  ;;  %v3227_v11 = vadd.f32 %v6407_v1, %v6395_v0 }
 0x61f   : > { %v4981_v18 = vpop.eup %4980  ;;  %3453 = vst [vmem:[%s6104_s18 + $0x40] sm:$0xff] %v3421_v2  ;;  %v3422_v40 = vadd.f32 %v3390_v22, %v3214_v3  ;;  %v3345_v30 = vmul.f32 1.442695, %v4979_v46  ;;  %v6463_v51 = vpop.f32.mrb[132].mxu0  ;;  %v3036_v34 = vadd.f32 %v4292_v39, %v6366_v9  ;;  %v3238_v63 = vadd.f32 %v6398_v35, %v6407_v1 }
 0x620   : > { %v4983_v62 = vpop.eup %4982  ;;  %3456 = vst [vmem:[%s6104_s18 + $0x70] sm:$0xff] %v3424_v31  ;;  %5000 = vpow2.f32 %v3349_v49  ;;  %v3351_v60 = vmul.f32 1.442695, %v4981_v18  ;;  %v3027_v61 = vpop.f32.mrb[133].mxu1  ;;  %v3230_v2 = vadd.f32 %v6407_v1, %v6401_v54 }
 0x621   : > { %v6467_v43 = vpop.f32.mrb[133].mxu0  ;;  %3454 = vst [vmem:[%s6104_s18 + $0x50] sm:$0xff] %v3422_v40  ;;  %5002 = vpow2.f32 %v3345_v30  ;;  %v3347_v48 = vmul.f32 1.442695, %v4983_v62  ;;  %v3028_v59 = vadd.f32 %v6366_v9, %v3027_v61  ;;  %v4293_v15 = vpop.f32.mrb[134].mxu1 }
 0x622   : > { %v6471_v56 = vpop.f32.mrb[134].mxu0  ;;  %v4985_v14 = vpop.eup %4984  ;;  %5004 = vpow2.f32 %v3351_v60  ;;  %v3039_v44 = vadd.f32 %v4293_v15, %v6366_v9 }
 0x623   : > { %v3030_v52 = vpop.f32.mrb[135].mxu1  ;;  %v6474_v55 = vpop.f32.mrb[135].mxu0  ;;  %v3395_v53 = vmul.f32 %v4985_v14, %v5762_v17  ;;  %5006 = vpow2.f32 %v3347_v48  ;;  %v3251_v14 = vadd.f32 %v6409_v19, %v6407_v1  ;;  %v3254_v19 = vadd.f32 %v6415_v20, %v6407_v1 }
 0x624   : > { %v4987_v4 = vpop.eup %4986  ;;  %v3031_v33 = vadd.f32 %v6366_v9, %v3030_v52  ;;  %5008 = vtanh.f32 %v3036_v34 }
 0x625   : > { %v4989_v50 = vpop.eup %4988  ;;  %v3393_v6 = vmul.f32 %v4987_v4, %v5766_v21  ;;  %v3427_v8 = vadd.f32 %v3395_v53, %v3235_v37  ;;  %5010 = vtanh.f32 %v3028_v59  ;;  %v3243_v37 = vadd.f32 %v6407_v1, %v6412_v7 }
 0x626   : > { %v4991_v16 = vpop.eup %4990  ;;  %v3396_v38 = vmul.f32 %v4989_v50, %v5770_v29  ;;  %5012 = vtanh.f32 %v3039_v44 }
 0x627   : > { %v4993_v17 = vpop.eup %4992  ;;  %v3425_v36 = vadd.f32 %v3393_v6, %v3227_v11  ;;  %v3394_v3 = vmul.f32 %v4991_v16, %v5774_v32  ;;  %3459 = vst [vmem:[%s6104_s18 + $0xa0] sm:$0xff] %v3427_v8  ;;  %5014 = vtanh.f32 %v3031_v33  ;;  %v4296_v46 = vpop.f32.mrb[136].mxu1  ;;  %v3246_v8 = vadd.f32 %v6407_v1, %v6421_v5 }
 0x628   : > { %v4995_v21 = vpop.eup %4994  ;;  %v3428_v0 = vadd.f32 %v3396_v38, %v3238_v63  ;;  %v3357_v22 = vmul.f32 1.442695, %v4993_v17  ;;  %v6490_v35 = vpop.f32.mrb[136].mxu0  ;;  %v3052_v30 = vadd.f32 %v4296_v46, %v6366_v9 }
 0x629   : > { %v4997_v29 = vpop.eup %4996  ;;  %3457 = vst [vmem:[%s6104_s18 + $0x80] sm:$0xff] %v3425_v36  ;;  %v3426_v31 = vadd.f32 %v3394_v3, %v3230_v2  ;;  %v3353_v49 = vmul.f32 1.442695, %v4995_v21  ;;  %v3043_v18 = vpop.f32.mrb[137].mxu1 }
 0x62a   : > { %v6493_v40 = vpop.f32.mrb[137].mxu0  ;;  %v4999_v54 = vpop.eup %4998  ;;  %3460 = vst [vmem:[%s6104_s18 + $0xb0] sm:$0xff] %v3428_v0  ;;  %5016 = vpow2.f32 %v3357_v22  ;;  %v3359_v32 = vmul.f32 1.442695, %v4997_v29  ;;  %v3044_v61 = vadd.f32 %v6366_v9, %v3043_v18 }
 0x62b   : > { %v4297_v39 = vpop.f32.mrb[138].mxu1  ;;  %v6497_v62 = vpop.f32.mrb[138].mxu0  ;;  %3458 = vst [vmem:[%s6104_s18 + $0x90] sm:$0xff] %v3426_v31  ;;  %5018 = vpow2.f32 %v3353_v49  ;;  %v3355_v34 = vmul.f32 1.442695, %v4999_v54 }
 0x62c   : > { %v5001_v60 = vpop.eup %5000  ;;  %v3046_v48 = vpop.f32.mrb[139].mxu1  ;;  %5020 = vpow2.f32 %v3359_v32  ;;  %v3055_v52 = vadd.f32 %v4297_v39, %v6366_v9  ;;  %v3267_v39 = vadd.f32 %v6435_v28, %v6407_v1 }
 0x62d   : > { %v6501_v59 = vpop.f32.mrb[139].mxu0  ;;  %v5003_v15 = vpop.eup %5002  ;;  %v3399_v44 = vmul.f32 %v5001_v60, %v5798_v13  ;;  %5022 = vpow2.f32 %v3355_v34  ;;  %v3047_v33 = vadd.f32 %v6366_v9, %v3046_v48  ;;  %v3259_v48 = vadd.f32 %v6407_v1, %v6439_v57 }
 0x62e   : > { %v5005_v4 = vpop.eup %5004  ;;  %v3397_v53 = vmul.f32 %v5003_v15, %v5802_v42  ;;  %5024 = vtanh.f32 %v3052_v30 }
 0x62f   : > { %v5007_v50 = vpop.eup %5006  ;;  %v3431_v11 = vadd.f32 %v3399_v44, %v3251_v14  ;;  %v3400_v13 = vmul.f32 %v5005_v4, %v5806_v25  ;;  %5026 = vtanh.f32 %v3044_v61  ;;  %v4300_v17 = vpop.f32.mrb[140].mxu1  ;;  %v3262_v4 = vadd.f32 %v6407_v1, %v6449_v58 }
 0x630   : > { %v5009_v6 = vpop.eup %5008  ;;  %v3429_v16 = vadd.f32 %v3397_v53, %v3243_v37  ;;  %v3398_v7 = vmul.f32 %v5007_v50, %v5810_v12  ;;  %5028 = vtanh.f32 %v3055_v52  ;;  %v6518_v20 = vpop.f32.mrb[140].mxu0  ;;  %v3068_v0 = vadd.f32 %v4300_v17, %v6366_v9 }
 0x631   : > { %v5011_v42 = vpop.eup %5010  ;;  %3463 = vst [vmem:[%s6104_s18 + $0xe0] sm:$0xff] %v3431_v11  ;;  %v3432_v63 = vadd.f32 %v3400_v13, %v3254_v19  ;;  %v3365_v38 = vmul.f32 1.442695, %v5009_v6  ;;  %5030 = vtanh.f32 %v3047_v33  ;;  %v3059_v3 = vpop.f32.mrb[141].mxu1  ;;  %v3270_v52 = vadd.f32 %v6443_v45, %v6407_v1 }
 0x632   : > { %v5013_v25 = vpop.eup %5012  ;;  %3461 = vst [vmem:[%s6104_s18 + $0xc0] sm:$0xff] %v3429_v16  ;;  %v3430_v36 = vadd.f32 %v3398_v7, %v3246_v8  ;;  %v3361_v2 = vmul.f32 1.442695, %v5011_v42  ;;  %v6521_v5 = vpop.f32.mrb[141].mxu0  ;;  %v3060_v31 = vadd.f32 %v6366_v9, %v3059_v3  ;;  %v3283_v13 = vadd.f32 %v6463_v51, %v6407_v1 }
 0x633   : > { %v5015_v12 = vpop.eup %5014  ;;  %3464 = vst [vmem:[%s6104_s18 + $0xf0] sm:$0xff] %v3432_v63  ;;  %5032 = vpow2.f32 %v3365_v38  ;;  %v3367_v21 = vmul.f32 1.442695, %v5013_v25  ;;  %v4301_v22 = vpop.f32.mrb[142].mxu1  ;;  %v3275_v8 = vadd.f32 %v6407_v1, %v6467_v43  ;;  %v3286_v38 = vadd.f32 %v6471_v56, %v6407_v1 }
 0x634   : > { %v6525_v46 = vpop.f32.mrb[142].mxu0  ;;  %3462 = vst [vmem:[%s6104_s18 + $0xd0] sm:$0xff] %v3430_v36  ;;  %5034 = vpow2.f32 %v3361_v2  ;;  %v3363_v29 = vmul.f32 1.442695, %v5015_v12  ;;  %v3062_v49 = vpop.f32.mrb[143].mxu1  ;;  %v3071_v32 = vadd.f32 %v4301_v22, %v6366_v9  ;;  %v3278_v25 = vadd.f32 %v6407_v1, %v6474_v55  ;;  %v6728_v36 = vld [vmem:[#allocation14_spill] sm:$0xff] }
 0x635   : > { %v6529_v18 = vpop.f32.mrb[143].mxu0  ;;  %v5017_v54 = vpop.eup %5016  ;;  %5036 = vpow2.f32 %v3367_v21  ;;  %v3063_v34 = vadd.f32 %v6366_v9, %v3062_v49  ;;  %v6729_v49 = vld [vmem:[#allocation15_spill] sm:$0xff] }
 0x636   : > { %v5019_v30 = vpop.eup %5018  ;;  %v3403_v60 = vmul.f32 %v5017_v54, %v5834_v26  ;;  %5038 = vpow2.f32 %v3363_v29 }
 0x637   : > { %v5021_v61 = vpop.eup %5020  ;;  %v3401_v15 = vmul.f32 %v5019_v30, %v5838_v27  ;;  %5040 = vtanh.f32 %v3068_v0  ;;  %v3291_v30 = vadd.f32 %v6407_v1, %v6493_v40 }
 0x638   : > { %v5023_v14 = vpop.eup %5022  ;;  %v3435_v44 = vadd.f32 %v3403_v60, %v3267_v39  ;;  %v3404_v28 = vmul.f32 %v5021_v61, %v5842_v24  ;;  %5042 = vtanh.f32 %v3060_v31  ;;  %v3299_v31 = vadd.f32 %v6490_v35, %v6407_v1  ;;  %v6730_v39 = vld [vmem:[#allocation16_spill] sm:$0xff] }
 0x639   : > { %v5025_v26 = vpop.eup %5024  ;;  %v3433_v9 = vadd.f32 %v3401_v15, %v3259_v48  ;;  %v3402_v57 = vmul.f32 %v5023_v14, %v5844_v41  ;;  %5044 = vtanh.f32 %v3071_v32  ;;  %v3302_v48 = vadd.f32 %v6497_v62, %v6407_v1  ;;  %v6731_v15 = vld [vmem:[#allocation17_spill] sm:$0xff] }
 0x63a   : > { %v5027_v27 = vpop.eup %5026  ;;  %3467 = vst [vmem:[%s6104_s18 + $0x120] sm:$0xff] %v3435_v44  ;;  %v3436_v37 = vadd.f32 %v3404_v28, %v3270_v52  ;;  %v3373_v53 = vmul.f32 1.442695, %v5025_v26  ;;  %5046 = vtanh.f32 %v3063_v34  ;;  %v3294_v35 = vadd.f32 %v6407_v1, %v6501_v59  ;;  %v6733_v52 = vld [vmem:[#allocation18_spill] sm:$0xff] }
 0x63b   : > { %v5029_v33 = vpop.eup %5028  ;;  %3465 = vst [vmem:[%s6104_s18 + $0x100] sm:$0xff] %v3433_v9  ;;  %v3434_v45 = vadd.f32 %v3402_v57, %v3262_v4  ;;  %v3369_v24 = vmul.f32 1.442695, %v5027_v27  ;;  %v3315_v62 = vadd.f32 %v6518_v20, %v6407_v1  ;;  %v6734_v57 = vld [vmem:[#allocation19_spill] sm:$0xff]  ;;  %v3307_v59 = vadd.f32 %v6407_v1, %v6521_v5  ;;  %v6736_v20 = vld [vmem:[#allocation21_spill] sm:$0xff]  ;;  %v6738_v5 = vld [vmem:[#allocation22_spill] sm:$0xff] }
 0x63c   : > { %v5031_v50 = vpop.eup %5030  ;;  %3468 = vst [vmem:[%s6104_s18 + $0x130] sm:$0xff] %v3436_v37  ;;  %5048 = vpow2.f32 %v3373_v53  ;;  %v3375_v11 = vmul.f32 1.442695, %v5029_v33  ;;  %v6735_v53 = vld [vmem:[#allocation20_spill] sm:$0xff] }
 0x63d   : > { %v5033_v19 = vpop.eup %5032  ;;  %3466 = vst [vmem:[%s6104_s18 + $0x110] sm:$0xff] %v3434_v45  ;;  %5050 = vpow2.f32 %v3369_v24  ;;  %v3371_v58 = vmul.f32 1.442695, %v5031_v50  ;;  %v3318_v50 = vadd.f32 %v6525_v46, %v6407_v1 }
 0x63e   : > { %v5035_v41 = vpop.eup %5034  ;;  %v3407_v6 = vmul.f32 %v5033_v19, %v5856_v23  ;;  %5052 = vpow2.f32 %v3375_v11 }
 0x63f   : > { %v5037_v16 = vpop.eup %5036  ;;  %v3405_v7 = vmul.f32 %v5035_v41, %v5862_v47  ;;  %5054 = vpow2.f32 %v3371_v58  ;;  %v3310_v58 = vadd.f32 %v6407_v1, %v6529_v18 }
 0x640   : > { %v5039_v42 = vpop.eup %5038  ;;  %v3439_v63 = vadd.f32 %v3407_v6, %v3283_v13  ;;  %v3408_v51 = vmul.f32 %v5037_v16, %v5866_v10 }
 0x641   : > { %v5041_v17 = vpop.eup %5040  ;;  %v3437_v23 = vadd.f32 %v3405_v7, %v3275_v8  ;;  %v3406_v43 = vmul.f32 %v5039_v42, %v6728_v36 }
 0x642   : > { %v5043_v2 = vpop.eup %5042  ;;  %3471 = vst [vmem:[%s6104_s18 + $0x160] sm:$0xff] %v3439_v63  ;;  %v3440_v47 = vadd.f32 %v3408_v51, %v3286_v38  ;;  %v3381_v3 = vmul.f32 1.442695, %v5041_v17 }
 0x643   : > { %v5045_v12 = vpop.eup %5044  ;;  %3469 = vst [vmem:[%s6104_s18 + $0x140] sm:$0xff] %v3437_v23  ;;  %v3438_v21 = vadd.f32 %v3406_v43, %v3278_v25  ;;  %v3377_v0 = vmul.f32 1.442695, %v5043_v2 }
 0x644   : > { %v5047_v22 = vpop.eup %5046  ;;  %3472 = vst [vmem:[%s6104_s18 + $0x170] sm:$0xff] %v3440_v47  ;;  %5056 = vpow2.f32 %v3381_v3  ;;  %v3383_v10 = vmul.f32 1.442695, %v5045_v12 }
 0x645   : > { %3470 = vst [vmem:[%s6104_s18 + $0x150] sm:$0xff] %v3438_v21  ;;  %5058 = vpow2.f32 %v3377_v0  ;;  %v3379_v56 = vmul.f32 1.442695, %v5047_v22 }
 0x646   : > { %v5049_v29 = vpop.eup %5048  ;;  %5060 = vpow2.f32 %v3383_v10 }
 0x647   : > { %v5051_v55 = vpop.eup %5050  ;;  %v3411_v54 = vmul.f32 %v5049_v29, %v6729_v49  ;;  %5062 = vpow2.f32 %v3379_v56 }
 0x648   : > { %v5053_v32 = vpop.eup %5052  ;;  %v3409_v60 = vmul.f32 %v5051_v55, %v6730_v39 }
 0x649   : > { %v5055_v34 = vpop.eup %5054  ;;  %v3443_v61 = vadd.f32 %v3411_v54, %v3299_v31  ;;  %v3412_v14 = vmul.f32 %v5053_v32, %v6731_v15 }
 0x64a   : > { %v3441_v44 = vadd.f32 %v3409_v60, %v3291_v30  ;;  %v3410_v28 = vmul.f32 %v5055_v34, %v6733_v52 }
 0x64b   : > { %3475 = vst [vmem:[%s6104_s18 + $0x1a0] sm:$0xff] %v3443_v61  ;;  %v3444_v26 = vadd.f32 %v3412_v14, %v3302_v48 }
 0x64c   : > { %3473 = vst [vmem:[%s6104_s18 + $0x180] sm:$0xff] %v3441_v44  ;;  %v3442_v40 = vadd.f32 %v3410_v28, %v3294_v35 }
 0x64d   : > { %3476 = vst [vmem:[%s6104_s18 + $0x1b0] sm:$0xff] %v3444_v26 }
 0x64e   : > { %v5057_v9 = vpop.eup %5056  ;;  %3474 = vst [vmem:[%s6104_s18 + $0x190] sm:$0xff] %v3442_v40 }
 0x64f   : > { %v5059_v4 = vpop.eup %5058  ;;  %v3415_v27 = vmul.f32 %v5057_v9, %v6734_v57 }
 0x650   : > { %v5061_v37 = vpop.eup %5060  ;;  %v3413_v33 = vmul.f32 %v5059_v4, %v6735_v53 }
 0x651   : > { %v5063_v45 = vpop.eup %5062  ;;  %v3447_v24 = vadd.f32 %v3415_v27, %v3315_v62  ;;  %v3416_v11 = vmul.f32 %v5061_v37, %v6736_v20 }
 0x652   : > { %v3445_v19 = vadd.f32 %v3413_v33, %v3307_v59  ;;  %v3414_v41 = vmul.f32 %v5063_v45, %v6738_v5 }
 0x653   : > { %3479 = vst [vmem:[%s6104_s18 + $0x1e0] sm:$0xff] %v3447_v24  ;;  %v3448_v13 = vadd.f32 %v3416_v11, %v3318_v50 }
 0x654   : > { %3477 = vst [vmem:[%s6104_s18 + $0x1c0] sm:$0xff] %v3445_v19  ;;  %v3446_v46 = vadd.f32 %v3414_v41, %v3310_v58 }
 0x655   : > { %3480 = vst [vmem:[%s6104_s18 + $0x1f0] sm:$0xff] %v3448_v13 }
 0x656   : > { %3478 = vst [vmem:[%s6104_s18 + $0x1d0] sm:$0xff] %v3446_v46 }
 0x657   : > { %5139 = shalt.err (!%p5136_p2)
}
 0x658   : > { %s5140_s18 = scalar_lea.hbm %s6599_s0, 8192  ;;  %s5144_s26 = scalar_lea.hbm %s6739_s24, 16384 }
 0x659   : > { %p5141_p4 = scmp.ne.s32.totalorder %s6599_s0, %s5140_s18  ;;  %p5145_p9 = scmp.lt.u32.totalorder %s6599_s0, %s6739_s24 }
 0x65a   : > { %p5146_p1 = scmp.lt.u32.totalorder %s5144_s26, %s5140_s18  ;;  %p5148_p6 = scmp.lt.u32.totalorder %s5140_s18, %s6599_s0 }
 0x65b   : > { %p5142_p5 = pnand %p5141_p4, %p6740_p11 }
 0x65c   : > { %p5147_p3 = por %p5146_p1, %p5145_p9 }
 0x65d   : > { %p5143_p7 = pneg %p5142_p5 }
 0x65e   : > { %p5149_p12 = por %p5148_p6, %p5147_p3 }
 0x660   : > { %p5150_p13 = pnand %p5149_p12, %p5143_p7 }
 0x662   : > { %5153 = shalt.err (!%p5150_p13)
}
 0x663   : > { %s5198_s2 = smov 256   ;;  %s5199_s1 = smov 16  }
 0x664   : > { %s6741_s5 = scalar_lea.sflag [#allocation4], %s5404_s23 }
 0x665   : > { %4368 = dma.vmem_to_hbm [thread:$0]  (%p6740_p11), %s6601_s22, 8192, %s6599_s0, %s6741_s5, %s5198_s2, %s5198_s2, %s5199_s1  }
 0x666 PF: > { %s6742_s29 = sld [smem:[#allocation8_spill]]  ;;  %p6743_p8 = scmp.ne.s32.totalorder %s6708_s28, 0 }
 0x667   : > { %p6744_p10 = scmp.ge.s32.totalorder %s5192_s21, 2 }
 0x669   : > { %p4375_p0 = pnand %p6744_p10, %p6743_p8 }
 0x66c   : > { %s3543_s25 = sand.u32 1, %s6742_s29  }
 0x66d   : > { %s3544_s18 = scalar_lea.sflag [#allocation4], %s3543_s25 }
 0x66e   : > { %5175 = dma.done.wait (!%p4375_p0), %s3544_s18, 8192  }
 0x66f   : > { %5177 = vsyncadd (!%p4375_p0), %s3544_s18, 4294959104  ;;  %s6745_s21 = sld [smem:[#allocation11_spill]]  ;;  %s6746_s20 = sld [smem:[#allocation9_spill]] }
 0x670   : > { %s6747_s26 = sld [smem:[#allocation12_spill]]  ;;  %s6748_s0 = smov %s5184_s30 }
 0x675   : > { %p32_p2 = scmp.ge.s32.totalorder %s6745_s21, 4   ;;  %s6749_s30 = smov %s6746_s20 }
 0x676   : > { %s6750_s20 = smov %s6747_s26 }
 0x677   :  { %34 = sbr.rel (!%p32_p2) target bundleno = 14 (0xe), region = 141 }
 0x67e   :  { %3549 = vsyncpa [#allocation3], 1 }
 0x67f   :  { %3551 = vsyncpa [#allocation3 + $0x1], 1 }
 0x680   :  { %3552 = vsyncpa [#allocation4], 1 }
 0x681   :  { %3554 = vsyncpa [#allocation4 + $0x1], 1 }

</bundles_post_ra>
